<compile_context>
chip_gen: v6e
topology: v6e:2x2x1
jax: 0.10.0
libtpu: 0.0.40
codegen_flags: <defaults>
</compile_context>

<pallas_src>
import functools

import jax
import jax.numpy as jnp
from jax import lax
from jax.experimental import pallas as pl
from jax.experimental.pallas import tpu as pltpu

LANE = 128


def gru_fc_kernel(gi_ref, w_hh_ref, b_hh_ref, w_fc_ref, b_fc_ref, out_ref, *,
                  seq_len, hidden_size):
    """Single invocation: unrolled GRU recurrence over seq_len + fused FC.

    gi_ref:   (T, B, 3H)  precomputed x_t @ W_ih + b_ih (gate order r, z, n)
    w_hh_ref: (H, 3H)     recurrent weight (transposed vs. PyTorch)
    b_hh_ref: (1, 3H)
    w_fc_ref: (H, O_pad)  lane-padded FC weight (= fc.weight.T, zero-padded)
    b_fc_ref: (1, O_pad)
    out_ref:  (B, O_pad)
    """
    H = hidden_size
    B = gi_ref.shape[1]

    # Hoist loop-invariant load / broadcast out of the unrolled recurrence.
    w_hh = w_hh_ref[...]                                    # (H, 3H)
    b_hh = jnp.broadcast_to(b_hh_ref[...], (B, 3 * H))      # (B, 3H)

    def step(t, h_prev):
        gi = gi_ref[t]                                      # (B, 3H)
        gh = jnp.dot(h_prev, w_hh,
                     preferred_element_type=jnp.float32) + b_hh
        # PyTorch GRU equations (gate order: r, z, n).
        r = jax.nn.sigmoid(gi[:, 0 * H:1 * H] + gh[:, 0 * H:1 * H])
        z = jax.nn.sigmoid(gi[:, 1 * H:2 * H] + gh[:, 1 * H:2 * H])
        n = jnp.tanh(gi[:, 2 * H:3 * H] + r * gh[:, 2 * H:3 * H])
        return (1.0 - z) * n + z * h_prev

    h0 = jnp.zeros((B, H), jnp.float32)     # PyTorch default: h0 = 0
    h_last = lax.fori_loop(0, seq_len, step, h0, unroll=True)

    # flatten(gru_output[:, -1:]) == h_T ; fused fc, lane-dense (B, O_pad) store.
    out_ref[...] = (jnp.dot(h_last, w_fc_ref[...],
                            preferred_element_type=jnp.float32)
                    + b_fc_ref[...])


@jax.jit
def gru_model_forward(x, params):
    """x: (B, T, D_in) batch_first, float32.  Returns (B, output_size)."""
    B, T, D = x.shape
    H = params["w_hh"].shape[0]
    O = params["w_fc"].shape[1]
    O_pad = ((O + LANE - 1) // LANE) * LANE

    # Hoisted input projection: one (T*B, D) x (D, 3H) matmul for the whole
    # sequence; the 'tbg' output layout folds in the time-major reordering.
    gi = jnp.einsum("btd,dg->tbg", x, params["w_ih"],
                    precision=lax.Precision.HIGHEST) + params["b_ih"]  # (T,B,3H)

    # Lane-pad the tiny FC (O=3) so the kernel's only store is lane-dense.
    w_fc_pad = jnp.zeros((H, O_pad), jnp.float32).at[:, :O].set(params["w_fc"])
    b_fc_pad = jnp.zeros((1, O_pad), jnp.float32).at[:, :O].set(params["b_fc"])

    kernel = functools.partial(gru_fc_kernel, seq_len=T, hidden_size=H)
    vmem = pl.BlockSpec(memory_space=pltpu.MemorySpace.VMEM)
    out_pad = pl.pallas_call(
        kernel,
        out_shape=jax.ShapeDtypeStruct((B, O_pad), jnp.float32),
        in_specs=[vmem] * 5,        # whole operands resident in VMEM, no grid
        out_specs=vmem,
    )(gi, params["w_hh"], params["b_hh"], w_fc_pad, b_fc_pad)
    return out_pad[:, :O]


def gru_model_ref(x, params):
    """Pure-JAX reference (mirrors torch.nn.GRU + Linear) for validation."""
    H = params["w_hh"].shape[0]
    hi = lax.Precision.HIGHEST

    def cell(h, x_t):
        gi = jnp.dot(x_t, params["w_ih"], precision=hi) + params["b_ih"][0]
        gh = jnp.dot(h, params["w_hh"], precision=hi) + params["b_hh"][0]
        r = jax.nn.sigmoid(gi[:, :H] + gh[:, :H])
        z = jax.nn.sigmoid(gi[:, H:2 * H] + gh[:, H:2 * H])
        n = jnp.tanh(gi[:, 2 * H:] + r * gh[:, 2 * H:])
        return (1.0 - z) * n + z * h, None

    x_tm = jnp.transpose(x, (1, 0, 2))
    h0 = jnp.zeros((x.shape[0], H), jnp.float32)
    h_last, _ = lax.scan(cell, h0, x_tm)
    return jnp.dot(h_last, params["w_fc"], precision=hi) + params["b_fc"][0]


def init_params(key, input_size, hidden_size, output_size):
    """Deterministic init mimicking PyTorch's uniform(-1/sqrt(H), 1/sqrt(H))."""
    ks = jax.random.split(key, 6)
    bound = 1.0 / jnp.sqrt(hidden_size)
    u = lambda k, shape: jax.random.uniform(
        k, shape, jnp.float32, minval=-bound, maxval=bound)
    return {
        "w_ih": u(ks[0], (input_size, 3 * hidden_size)),   # = weight_ih_l0.T
        "w_hh": u(ks[1], (hidden_size, 3 * hidden_size)),  # = weight_hh_l0.T
        "b_ih": u(ks[2], (1, 3 * hidden_size)),
        "b_hh": u(ks[3], (1, 3 * hidden_size)),
        "w_fc": u(ks[4], (hidden_size, output_size)),      # = fc.weight.T
        "b_fc": u(ks[5], (1, output_size)),
    }


if __name__ == "__main__":
    input_size, hidden_size, output_size = 62, 256, 3
    batch, seq = 2, 8

    key = jax.random.PRNGKey(0)
    k_x, k_p = jax.random.split(key)
    x = jax.random.normal(k_x, (batch, seq, input_size), jnp.float32)
    params = init_params(k_p, input_size, hidden_size, output_size)

    out = jax.block_until_ready(gru_model_forward(x, params))
    ref = jax.block_until_ready(gru_model_ref(x, params))

    assert out.shape == (batch, output_size)
    assert jnp.allclose(out, ref, rtol=2e-5, atol=2e-5), (
        f"mismatch: max abs err {jnp.max(jnp.abs(out - ref))}")
    print("KERNEL_OK")
</pallas_src>

<mosaic_0001>
module attributes {stable_mosaic.version = 11 : i64} {
  func.func @gru_fc_kernel(%arg0: memref<8x2x768xf32, #tpu.memory_space<vmem>>, %arg1: memref<256x768xf32, #tpu.memory_space<vmem>>, %arg2: memref<1x768xf32, #tpu.memory_space<vmem>>, %arg3: memref<256x128xf32, #tpu.memory_space<vmem>>, %arg4: memref<1x128xf32, #tpu.memory_space<vmem>>, %arg5: memref<2x128xf32, #tpu.memory_space<vmem>>) attributes {dimension_semantics = [], scalar_prefetch = 0 : i64, scratch_operands = 0 : i64, tpu.core_type = #tpu.core_type<tc>} {
    %c0 = arith.constant 0 : index
    %c0_0 = arith.constant 0 : index
    %0 = vector.load %arg1[%c0, %c0_0] : memref<256x768xf32, #tpu.memory_space<vmem>>, vector<256x768xf32>
    %c0_1 = arith.constant 0 : index
    %c0_2 = arith.constant 0 : index
    %1 = vector.load %arg2[%c0_1, %c0_2] : memref<1x768xf32, #tpu.memory_space<vmem>>, vector<1x768xf32>
    %2 = vector.shape_cast %1 : vector<1x768xf32> to vector<1x768xf32>
    %3 = vector.broadcast %2 : vector<1x768xf32> to vector<2x768xf32>
    %cst = arith.constant 0.000000e+00 : f32
    %4 = vector.broadcast %cst : f32 to vector<2x256xf32>
    %c0_i32 = arith.constant 0 : i32
    %5 = arith.index_cast %c0_i32 : i32 to index
    %c0_3 = arith.constant 0 : index
    %c0_4 = arith.constant 0 : index
    %6 = vector.load %arg0[%5, %c0_3, %c0_4] : memref<8x2x768xf32, #tpu.memory_space<vmem>>, vector<1x2x768xf32>
    %7 = vector.shape_cast %6 : vector<1x2x768xf32> to vector<2x768xf32>
    %cst_5 = arith.constant dense<0.000000e+00> : vector<2x768xf32>
    %8 = tpu.matmul %4, %0, %cst_5 {dimension_numbers = #tpu.dot_dimension_numbers<[1], [0], [0], [1], [0, 0, 1, 1], [], []>} : vector<2x256xf32>, vector<256x768xf32>, vector<2x768xf32> -> vector<2x768xf32>
    %9 = arith.addf %8, %3 : vector<2x768xf32>
    %10 = vector.extract_strided_slice %7 {offsets = [0, 0], sizes = [2, 256], strides = [1, 1]} : vector<2x768xf32> to vector<2x256xf32>
    %11 = vector.extract_strided_slice %9 {offsets = [0, 0], sizes = [2, 256], strides = [1, 1]} : vector<2x768xf32> to vector<2x256xf32>
    %12 = arith.addf %10, %11 : vector<2x256xf32>
    %13 = arith.negf %12 : vector<2x256xf32>
    %14 = math.exp %13 : vector<2x256xf32>
    %cst_6 = arith.constant 1.000000e+00 : f32
    %15 = vector.broadcast %cst_6 : f32 to vector<2x256xf32>
    %16 = arith.addf %15, %14 : vector<2x256xf32>
    %17 = arith.divf %15, %16 : vector<2x256xf32>
    %18 = vector.extract_strided_slice %7 {offsets = [0, 256], sizes = [2, 256], strides = [1, 1]} : vector<2x768xf32> to vector<2x256xf32>
    %19 = vector.extract_strided_slice %9 {offsets = [0, 256], sizes = [2, 256], strides = [1, 1]} : vector<2x768xf32> to vector<2x256xf32>
    %20 = arith.addf %18, %19 : vector<2x256xf32>
    %21 = arith.negf %20 : vector<2x256xf32>
    %22 = math.exp %21 : vector<2x256xf32>
    %cst_7 = arith.constant 1.000000e+00 : f32
    %23 = vector.broadcast %cst_7 : f32 to vector<2x256xf32>
    %24 = arith.addf %23, %22 : vector<2x256xf32>
    %25 = arith.divf %23, %24 : vector<2x256xf32>
    %26 = vector.extract_strided_slice %7 {offsets = [0, 512], sizes = [2, 256], strides = [1, 1]} : vector<2x768xf32> to vector<2x256xf32>
    %27 = vector.extract_strided_slice %9 {offsets = [0, 512], sizes = [2, 256], strides = [1, 1]} : vector<2x768xf32> to vector<2x256xf32>
    %28 = arith.mulf %17, %27 : vector<2x256xf32>
    %29 = arith.addf %26, %28 : vector<2x256xf32>
    %30 = math.tanh %29 : vector<2x256xf32>
    %cst_8 = arith.constant 1.000000e+00 : f32
    %31 = vector.broadcast %cst_8 : f32 to vector<2x256xf32>
    %32 = arith.subf %31, %25 : vector<2x256xf32>
    %33 = arith.mulf %32, %30 : vector<2x256xf32>
    %34 = arith.mulf %25, %4 : vector<2x256xf32>
    %35 = arith.addf %33, %34 : vector<2x256xf32>
    %c1_i32 = arith.constant 1 : i32
    %36 = arith.index_cast %c1_i32 : i32 to index
    %c0_9 = arith.constant 0 : index
    %c0_10 = arith.constant 0 : index
    %37 = vector.load %arg0[%36, %c0_9, %c0_10] : memref<8x2x768xf32, #tpu.memory_space<vmem>>, vector<1x2x768xf32>
    %38 = vector.shape_cast %37 : vector<1x2x768xf32> to vector<2x768xf32>
    %cst_11 = arith.constant dense<0.000000e+00> : vector<2x768xf32>
    %39 = tpu.matmul %35, %0, %cst_11 {dimension_numbers = #tpu.dot_dimension_numbers<[1], [0], [0], [1], [0, 0, 1, 1], [], []>} : vector<2x256xf32>, vector<256x768xf32>, vector<2x768xf32> -> vector<2x768xf32>
    %40 = arith.addf %39, %3 : vector<2x768xf32>
    %41 = vector.extract_strided_slice %38 {offsets = [0, 0], sizes = [2, 256], strides = [1, 1]} : vector<2x768xf32> to vector<2x256xf32>
    %42 = vector.extract_strided_slice %40 {offsets = [0, 0], sizes = [2, 256], strides = [1, 1]} : vector<2x768xf32> to vector<2x256xf32>
    %43 = arith.addf %41, %42 : vector<2x256xf32>
    %44 = arith.negf %43 : vector<2x256xf32>
    %45 = math.exp %44 : vector<2x256xf32>
    %cst_12 = arith.constant 1.000000e+00 : f32
    %46 = vector.broadcast %cst_12 : f32 to vector<2x256xf32>
    %47 = arith.addf %46, %45 : vector<2x256xf32>
    %48 = arith.divf %46, %47 : vector<2x256xf32>
    %49 = vector.extract_strided_slice %38 {offsets = [0, 256], sizes = [2, 256], strides = [1, 1]} : vector<2x768xf32> to vector<2x256xf32>
    %50 = vector.extract_strided_slice %40 {offsets = [0, 256], sizes = [2, 256], strides = [1, 1]} : vector<2x768xf32> to vector<2x256xf32>
    %51 = arith.addf %49, %50 : vector<2x256xf32>
    %52 = arith.negf %51 : vector<2x256xf32>
    %53 = math.exp %52 : vector<2x256xf32>
    %cst_13 = arith.constant 1.000000e+00 : f32
    %54 = vector.broadcast %cst_13 : f32 to vector<2x256xf32>
    %55 = arith.addf %54, %53 : vector<2x256xf32>
    %56 = arith.divf %54, %55 : vector<2x256xf32>
    %57 = vector.extract_strided_slice %38 {offsets = [0, 512], sizes = [2, 256], strides = [1, 1]} : vector<2x768xf32> to vector<2x256xf32>
    %58 = vector.extract_strided_slice %40 {offsets = [0, 512], sizes = [2, 256], strides = [1, 1]} : vector<2x768xf32> to vector<2x256xf32>
    %59 = arith.mulf %48, %58 : vector<2x256xf32>
    %60 = arith.addf %57, %59 : vector<2x256xf32>
    %61 = math.tanh %60 : vector<2x256xf32>
    %cst_14 = arith.constant 1.000000e+00 : f32
    %62 = vector.broadcast %cst_14 : f32 to vector<2x256xf32>
    %63 = arith.subf %62, %56 : vector<2x256xf32>
    %64 = arith.mulf %63, %61 : vector<2x256xf32>
    %65 = arith.mulf %56, %35 : vector<2x256xf32>
    %66 = arith.addf %64, %65 : vector<2x256xf32>
    %c2_i32 = arith.constant 2 : i32
    %67 = arith.index_cast %c2_i32 : i32 to index
    %c0_15 = arith.constant 0 : index
    %c0_16 = arith.constant 0 : index
    %68 = vector.load %arg0[%67, %c0_15, %c0_16] : memref<8x2x768xf32, #tpu.memory_space<vmem>>, vector<1x2x768xf32>
    %69 = vector.shape_cast %68 : vector<1x2x768xf32> to vector<2x768xf32>
    %cst_17 = arith.constant dense<0.000000e+00> : vector<2x768xf32>
    %70 = tpu.matmul %66, %0, %cst_17 {dimension_numbers = #tpu.dot_dimension_numbers<[1], [0], [0], [1], [0, 0, 1, 1], [], []>} : vector<2x256xf32>, vector<256x768xf32>, vector<2x768xf32> -> vector<2x768xf32>
    %71 = arith.addf %70, %3 : vector<2x768xf32>
    %72 = vector.extract_strided_slice %69 {offsets = [0, 0], sizes = [2, 256], strides = [1, 1]} : vector<2x768xf32> to vector<2x256xf32>
    %73 = vector.extract_strided_slice %71 {offsets = [0, 0], sizes = [2, 256], strides = [1, 1]} : vector<2x768xf32> to vector<2x256xf32>
    %74 = arith.addf %72, %73 : vector<2x256xf32>
    %75 = arith.negf %74 : vector<2x256xf32>
    %76 = math.exp %75 : vector<2x256xf32>
    %cst_18 = arith.constant 1.000000e+00 : f32
    %77 = vector.broadcast %cst_18 : f32 to vector<2x256xf32>
    %78 = arith.addf %77, %76 : vector<2x256xf32>
    %79 = arith.divf %77, %78 : vector<2x256xf32>
    %80 = vector.extract_strided_slice %69 {offsets = [0, 256], sizes = [2, 256], strides = [1, 1]} : vector<2x768xf32> to vector<2x256xf32>
    %81 = vector.extract_strided_slice %71 {offsets = [0, 256], sizes = [2, 256], strides = [1, 1]} : vector<2x768xf32> to vector<2x256xf32>
    %82 = arith.addf %80, %81 : vector<2x256xf32>
    %83 = arith.negf %82 : vector<2x256xf32>
    %84 = math.exp %83 : vector<2x256xf32>
    %cst_19 = arith.constant 1.000000e+00 : f32
    %85 = vector.broadcast %cst_19 : f32 to vector<2x256xf32>
    %86 = arith.addf %85, %84 : vector<2x256xf32>
    %87 = arith.divf %85, %86 : vector<2x256xf32>
    %88 = vector.extract_strided_slice %69 {offsets = [0, 512], sizes = [2, 256], strides = [1, 1]} : vector<2x768xf32> to vector<2x256xf32>
    %89 = vector.extract_strided_slice %71 {offsets = [0, 512], sizes = [2, 256], strides = [1, 1]} : vector<2x768xf32> to vector<2x256xf32>
    %90 = arith.mulf %79, %89 : vector<2x256xf32>
    %91 = arith.addf %88, %90 : vector<2x256xf32>
    %92 = math.tanh %91 : vector<2x256xf32>
    %cst_20 = arith.constant 1.000000e+00 : f32
    %93 = vector.broadcast %cst_20 : f32 to vector<2x256xf32>
    %94 = arith.subf %93, %87 : vector<2x256xf32>
    %95 = arith.mulf %94, %92 : vector<2x256xf32>
    %96 = arith.mulf %87, %66 : vector<2x256xf32>
    %97 = arith.addf %95, %96 : vector<2x256xf32>
    %c3_i32 = arith.constant 3 : i32
    %98 = arith.index_cast %c3_i32 : i32 to index
    %c0_21 = arith.constant 0 : index
    %c0_22 = arith.constant 0 : index
    %99 = vector.load %arg0[%98, %c0_21, %c0_22] : memref<8x2x768xf32, #tpu.memory_space<vmem>>, vector<1x2x768xf32>
    %100 = vector.shape_cast %99 : vector<1x2x768xf32> to vector<2x768xf32>
    %cst_23 = arith.constant dense<0.000000e+00> : vector<2x768xf32>
    %101 = tpu.matmul %97, %0, %cst_23 {dimension_numbers = #tpu.dot_dimension_numbers<[1], [0], [0], [1], [0, 0, 1, 1], [], []>} : vector<2x256xf32>, vector<256x768xf32>, vector<2x768xf32> -> vector<2x768xf32>
    %102 = arith.addf %101, %3 : vector<2x768xf32>
    %103 = vector.extract_strided_slice %100 {offsets = [0, 0], sizes = [2, 256], strides = [1, 1]} : vector<2x768xf32> to vector<2x256xf32>
    %104 = vector.extract_strided_slice %102 {offsets = [0, 0], sizes = [2, 256], strides = [1, 1]} : vector<2x768xf32> to vector<2x256xf32>
    %105 = arith.addf %103, %104 : vector<2x256xf32>
    %106 = arith.negf %105 : vector<2x256xf32>
    %107 = math.exp %106 : vector<2x256xf32>
    %cst_24 = arith.constant 1.000000e+00 : f32
    %108 = vector.broadcast %cst_24 : f32 to vector<2x256xf32>
    %109 = arith.addf %108, %107 : vector<2x256xf32>
    %110 = arith.divf %108, %109 : vector<2x256xf32>
    %111 = vector.extract_strided_slice %100 {offsets = [0, 256], sizes = [2, 256], strides = [1, 1]} : vector<2x768xf32> to vector<2x256xf32>
    %112 = vector.extract_strided_slice %102 {offsets = [0, 256], sizes = [2, 256], strides = [1, 1]} : vector<2x768xf32> to vector<2x256xf32>
    %113 = arith.addf %111, %112 : vector<2x256xf32>
    %114 = arith.negf %113 : vector<2x256xf32>
    %115 = math.exp %114 : vector<2x256xf32>
    %cst_25 = arith.constant 1.000000e+00 : f32
    %116 = vector.broadcast %cst_25 : f32 to vector<2x256xf32>
    %117 = arith.addf %116, %115 : vector<2x256xf32>
    %118 = arith.divf %116, %117 : vector<2x256xf32>
    %119 = vector.extract_strided_slice %100 {offsets = [0, 512], sizes = [2, 256], strides = [1, 1]} : vector<2x768xf32> to vector<2x256xf32>
    %120 = vector.extract_strided_slice %102 {offsets = [0, 512], sizes = [2, 256], strides = [1, 1]} : vector<2x768xf32> to vector<2x256xf32>
    %121 = arith.mulf %110, %120 : vector<2x256xf32>
    %122 = arith.addf %119, %121 : vector<2x256xf32>
    %123 = math.tanh %122 : vector<2x256xf32>
    %cst_26 = arith.constant 1.000000e+00 : f32
    %124 = vector.broadcast %cst_26 : f32 to vector<2x256xf32>
    %125 = arith.subf %124, %118 : vector<2x256xf32>
    %126 = arith.mulf %125, %123 : vector<2x256xf32>
    %127 = arith.mulf %118, %97 : vector<2x256xf32>
    %128 = arith.addf %126, %127 : vector<2x256xf32>
    %c4_i32 = arith.constant 4 : i32
    %129 = arith.index_cast %c4_i32 : i32 to index
    %c0_27 = arith.constant 0 : index
    %c0_28 = arith.constant 0 : index
    %130 = vector.load %arg0[%129, %c0_27, %c0_28] : memref<8x2x768xf32, #tpu.memory_space<vmem>>, vector<1x2x768xf32>
    %131 = vector.shape_cast %130 : vector<1x2x768xf32> to vector<2x768xf32>
    %cst_29 = arith.constant dense<0.000000e+00> : vector<2x768xf32>
    %132 = tpu.matmul %128, %0, %cst_29 {dimension_numbers = #tpu.dot_dimension_numbers<[1], [0], [0], [1], [0, 0, 1, 1], [], []>} : vector<2x256xf32>, vector<256x768xf32>, vector<2x768xf32> -> vector<2x768xf32>
    %133 = arith.addf %132, %3 : vector<2x768xf32>
    %134 = vector.extract_strided_slice %131 {offsets = [0, 0], sizes = [2, 256], strides = [1, 1]} : vector<2x768xf32> to vector<2x256xf32>
    %135 = vector.extract_strided_slice %133 {offsets = [0, 0], sizes = [2, 256], strides = [1, 1]} : vector<2x768xf32> to vector<2x256xf32>
    %136 = arith.addf %134, %135 : vector<2x256xf32>
    %137 = arith.negf %136 : vector<2x256xf32>
    %138 = math.exp %137 : vector<2x256xf32>
    %cst_30 = arith.constant 1.000000e+00 : f32
    %139 = vector.broadcast %cst_30 : f32 to vector<2x256xf32>
    %140 = arith.addf %139, %138 : vector<2x256xf32>
    %141 = arith.divf %139, %140 : vector<2x256xf32>
    %142 = vector.extract_strided_slice %131 {offsets = [0, 256], sizes = [2, 256], strides = [1, 1]} : vector<2x768xf32> to vector<2x256xf32>
    %143 = vector.extract_strided_slice %133 {offsets = [0, 256], sizes = [2, 256], strides = [1, 1]} : vector<2x768xf32> to vector<2x256xf32>
    %144 = arith.addf %142, %143 : vector<2x256xf32>
    %145 = arith.negf %144 : vector<2x256xf32>
    %146 = math.exp %145 : vector<2x256xf32>
    %cst_31 = arith.constant 1.000000e+00 : f32
    %147 = vector.broadcast %cst_31 : f32 to vector<2x256xf32>
    %148 = arith.addf %147, %146 : vector<2x256xf32>
    %149 = arith.divf %147, %148 : vector<2x256xf32>
    %150 = vector.extract_strided_slice %131 {offsets = [0, 512], sizes = [2, 256], strides = [1, 1]} : vector<2x768xf32> to vector<2x256xf32>
    %151 = vector.extract_strided_slice %133 {offsets = [0, 512], sizes = [2, 256], strides = [1, 1]} : vector<2x768xf32> to vector<2x256xf32>
    %152 = arith.mulf %141, %151 : vector<2x256xf32>
    %153 = arith.addf %150, %152 : vector<2x256xf32>
    %154 = math.tanh %153 : vector<2x256xf32>
    %cst_32 = arith.constant 1.000000e+00 : f32
    %155 = vector.broadcast %cst_32 : f32 to vector<2x256xf32>
    %156 = arith.subf %155, %149 : vector<2x256xf32>
    %157 = arith.mulf %156, %154 : vector<2x256xf32>
    %158 = arith.mulf %149, %128 : vector<2x256xf32>
    %159 = arith.addf %157, %158 : vector<2x256xf32>
    %c5_i32 = arith.constant 5 : i32
    %160 = arith.index_cast %c5_i32 : i32 to index
    %c0_33 = arith.constant 0 : index
    %c0_34 = arith.constant 0 : index
    %161 = vector.load %arg0[%160, %c0_33, %c0_34] : memref<8x2x768xf32, #tpu.memory_space<vmem>>, vector<1x2x768xf32>
    %162 = vector.shape_cast %161 : vector<1x2x768xf32> to vector<2x768xf32>
    %cst_35 = arith.constant dense<0.000000e+00> : vector<2x768xf32>
    %163 = tpu.matmul %159, %0, %cst_35 {dimension_numbers = #tpu.dot_dimension_numbers<[1], [0], [0], [1], [0, 0, 1, 1], [], []>} : vector<2x256xf32>, vector<256x768xf32>, vector<2x768xf32> -> vector<2x768xf32>
    %164 = arith.addf %163, %3 : vector<2x768xf32>
    %165 = vector.extract_strided_slice %162 {offsets = [0, 0], sizes = [2, 256], strides = [1, 1]} : vector<2x768xf32> to vector<2x256xf32>
    %166 = vector.extract_strided_slice %164 {offsets = [0, 0], sizes = [2, 256], strides = [1, 1]} : vector<2x768xf32> to vector<2x256xf32>
    %167 = arith.addf %165, %166 : vector<2x256xf32>
    %168 = arith.negf %167 : vector<2x256xf32>
    %169 = math.exp %168 : vector<2x256xf32>
    %cst_36 = arith.constant 1.000000e+00 : f32
    %170 = vector.broadcast %cst_36 : f32 to vector<2x256xf32>
    %171 = arith.addf %170, %169 : vector<2x256xf32>
    %172 = arith.divf %170, %171 : vector<2x256xf32>
    %173 = vector.extract_strided_slice %162 {offsets = [0, 256], sizes = [2, 256], strides = [1, 1]} : vector<2x768xf32> to vector<2x256xf32>
    %174 = vector.extract_strided_slice %164 {offsets = [0, 256], sizes = [2, 256], strides = [1, 1]} : vector<2x768xf32> to vector<2x256xf32>
    %175 = arith.addf %173, %174 : vector<2x256xf32>
    %176 = arith.negf %175 : vector<2x256xf32>
    %177 = math.exp %176 : vector<2x256xf32>
    %cst_37 = arith.constant 1.000000e+00 : f32
    %178 = vector.broadcast %cst_37 : f32 to vector<2x256xf32>
    %179 = arith.addf %178, %177 : vector<2x256xf32>
    %180 = arith.divf %178, %179 : vector<2x256xf32>
    %181 = vector.extract_strided_slice %162 {offsets = [0, 512], sizes = [2, 256], strides = [1, 1]} : vector<2x768xf32> to vector<2x256xf32>
    %182 = vector.extract_strided_slice %164 {offsets = [0, 512], sizes = [2, 256], strides = [1, 1]} : vector<2x768xf32> to vector<2x256xf32>
    %183 = arith.mulf %172, %182 : vector<2x256xf32>
    %184 = arith.addf %181, %183 : vector<2x256xf32>
    %185 = math.tanh %184 : vector<2x256xf32>
    %cst_38 = arith.constant 1.000000e+00 : f32
    %186 = vector.broadcast %cst_38 : f32 to vector<2x256xf32>
    %187 = arith.subf %186, %180 : vector<2x256xf32>
    %188 = arith.mulf %187, %185 : vector<2x256xf32>
    %189 = arith.mulf %180, %159 : vector<2x256xf32>
    %190 = arith.addf %188, %189 : vector<2x256xf32>
    %c6_i32 = arith.constant 6 : i32
    %191 = arith.index_cast %c6_i32 : i32 to index
    %c0_39 = arith.constant 0 : index
    %c0_40 = arith.constant 0 : index
    %192 = vector.load %arg0[%191, %c0_39, %c0_40] : memref<8x2x768xf32, #tpu.memory_space<vmem>>, vector<1x2x768xf32>
    %193 = vector.shape_cast %192 : vector<1x2x768xf32> to vector<2x768xf32>
    %cst_41 = arith.constant dense<0.000000e+00> : vector<2x768xf32>
    %194 = tpu.matmul %190, %0, %cst_41 {dimension_numbers = #tpu.dot_dimension_numbers<[1], [0], [0], [1], [0, 0, 1, 1], [], []>} : vector<2x256xf32>, vector<256x768xf32>, vector<2x768xf32> -> vector<2x768xf32>
    %195 = arith.addf %194, %3 : vector<2x768xf32>
    %196 = vector.extract_strided_slice %193 {offsets = [0, 0], sizes = [2, 256], strides = [1, 1]} : vector<2x768xf32> to vector<2x256xf32>
    %197 = vector.extract_strided_slice %195 {offsets = [0, 0], sizes = [2, 256], strides = [1, 1]} : vector<2x768xf32> to vector<2x256xf32>
    %198 = arith.addf %196, %197 : vector<2x256xf32>
    %199 = arith.negf %198 : vector<2x256xf32>
    %200 = math.exp %199 : vector<2x256xf32>
    %cst_42 = arith.constant 1.000000e+00 : f32
    %201 = vector.broadcast %cst_42 : f32 to vector<2x256xf32>
    %202 = arith.addf %201, %200 : vector<2x256xf32>
    %203 = arith.divf %201, %202 : vector<2x256xf32>
    %204 = vector.extract_strided_slice %193 {offsets = [0, 256], sizes = [2, 256], strides = [1, 1]} : vector<2x768xf32> to vector<2x256xf32>
    %205 = vector.extract_strided_slice %195 {offsets = [0, 256], sizes = [2, 256], strides = [1, 1]} : vector<2x768xf32> to vector<2x256xf32>
    %206 = arith.addf %204, %205 : vector<2x256xf32>
    %207 = arith.negf %206 : vector<2x256xf32>
    %208 = math.exp %207 : vector<2x256xf32>
    %cst_43 = arith.constant 1.000000e+00 : f32
    %209 = vector.broadcast %cst_43 : f32 to vector<2x256xf32>
    %210 = arith.addf %209, %208 : vector<2x256xf32>
    %211 = arith.divf %209, %210 : vector<2x256xf32>
    %212 = vector.extract_strided_slice %193 {offsets = [0, 512], sizes = [2, 256], strides = [1, 1]} : vector<2x768xf32> to vector<2x256xf32>
    %213 = vector.extract_strided_slice %195 {offsets = [0, 512], sizes = [2, 256], strides = [1, 1]} : vector<2x768xf32> to vector<2x256xf32>
    %214 = arith.mulf %203, %213 : vector<2x256xf32>
    %215 = arith.addf %212, %214 : vector<2x256xf32>
    %216 = math.tanh %215 : vector<2x256xf32>
    %cst_44 = arith.constant 1.000000e+00 : f32
    %217 = vector.broadcast %cst_44 : f32 to vector<2x256xf32>
    %218 = arith.subf %217, %211 : vector<2x256xf32>
    %219 = arith.mulf %218, %216 : vector<2x256xf32>
    %220 = arith.mulf %211, %190 : vector<2x256xf32>
    %221 = arith.addf %219, %220 : vector<2x256xf32>
    %c7_i32 = arith.constant 7 : i32
    %222 = arith.index_cast %c7_i32 : i32 to index
    %c0_45 = arith.constant 0 : index
    %c0_46 = arith.constant 0 : index
    %223 = vector.load %arg0[%222, %c0_45, %c0_46] : memref<8x2x768xf32, #tpu.memory_space<vmem>>, vector<1x2x768xf32>
    %224 = vector.shape_cast %223 : vector<1x2x768xf32> to vector<2x768xf32>
    %cst_47 = arith.constant dense<0.000000e+00> : vector<2x768xf32>
    %225 = tpu.matmul %221, %0, %cst_47 {dimension_numbers = #tpu.dot_dimension_numbers<[1], [0], [0], [1], [0, 0, 1, 1], [], []>} : vector<2x256xf32>, vector<256x768xf32>, vector<2x768xf32> -> vector<2x768xf32>
    %226 = arith.addf %225, %3 : vector<2x768xf32>
    %227 = vector.extract_strided_slice %224 {offsets = [0, 0], sizes = [2, 256], strides = [1, 1]} : vector<2x768xf32> to vector<2x256xf32>
    %228 = vector.extract_strided_slice %226 {offsets = [0, 0], sizes = [2, 256], strides = [1, 1]} : vector<2x768xf32> to vector<2x256xf32>
    %229 = arith.addf %227, %228 : vector<2x256xf32>
    %230 = arith.negf %229 : vector<2x256xf32>
    %231 = math.exp %230 : vector<2x256xf32>
    %cst_48 = arith.constant 1.000000e+00 : f32
    %232 = vector.broadcast %cst_48 : f32 to vector<2x256xf32>
    %233 = arith.addf %232, %231 : vector<2x256xf32>
    %234 = arith.divf %232, %233 : vector<2x256xf32>
    %235 = vector.extract_strided_slice %224 {offsets = [0, 256], sizes = [2, 256], strides = [1, 1]} : vector<2x768xf32> to vector<2x256xf32>
    %236 = vector.extract_strided_slice %226 {offsets = [0, 256], sizes = [2, 256], strides = [1, 1]} : vector<2x768xf32> to vector<2x256xf32>
    %237 = arith.addf %235, %236 : vector<2x256xf32>
    %238 = arith.negf %237 : vector<2x256xf32>
    %239 = math.exp %238 : vector<2x256xf32>
    %cst_49 = arith.constant 1.000000e+00 : f32
    %240 = vector.broadcast %cst_49 : f32 to vector<2x256xf32>
    %241 = arith.addf %240, %239 : vector<2x256xf32>
    %242 = arith.divf %240, %241 : vector<2x256xf32>
    %243 = vector.extract_strided_slice %224 {offsets = [0, 512], sizes = [2, 256], strides = [1, 1]} : vector<2x768xf32> to vector<2x256xf32>
    %244 = vector.extract_strided_slice %226 {offsets = [0, 512], sizes = [2, 256], strides = [1, 1]} : vector<2x768xf32> to vector<2x256xf32>
    %245 = arith.mulf %234, %244 : vector<2x256xf32>
    %246 = arith.addf %243, %245 : vector<2x256xf32>
    %247 = math.tanh %246 : vector<2x256xf32>
    %cst_50 = arith.constant 1.000000e+00 : f32
    %248 = vector.broadcast %cst_50 : f32 to vector<2x256xf32>
    %249 = arith.subf %248, %242 : vector<2x256xf32>
    %250 = arith.mulf %249, %247 : vector<2x256xf32>
    %251 = arith.mulf %242, %221 : vector<2x256xf32>
    %252 = arith.addf %250, %251 : vector<2x256xf32>
    %c8_i32 = arith.constant 8 : i32
    %c0_51 = arith.constant 0 : index
    %c0_52 = arith.constant 0 : index
    %253 = vector.load %arg3[%c0_51, %c0_52] : memref<256x128xf32, #tpu.memory_space<vmem>>, vector<256x128xf32>
    %cst_53 = arith.constant dense<0.000000e+00> : vector<2x128xf32>
    %254 = tpu.matmul %252, %253, %cst_53 {dimension_numbers = #tpu.dot_dimension_numbers<[1], [0], [0], [1], [0, 0, 1, 1], [], []>} : vector<2x256xf32>, vector<256x128xf32>, vector<2x128xf32> -> vector<2x128xf32>
    %c0_54 = arith.constant 0 : index
    %c0_55 = arith.constant 0 : index
    %255 = vector.load %arg4[%c0_54, %c0_55] : memref<1x128xf32, #tpu.memory_space<vmem>>, vector<1x128xf32>
    %256 = vector.broadcast %255 : vector<1x128xf32> to vector<2x128xf32>
    %257 = arith.addf %254, %256 : vector<2x128xf32>
    %c0_56 = arith.constant 0 : index
    %c0_57 = arith.constant 0 : index
    %258 = vector.load %arg5[%c0_56, %c0_57] : memref<2x128xf32, #tpu.memory_space<vmem>>, vector<2x128xf32>
    tpu.vector_store %arg5[%c0_56, %c0_57], %257 {strides = array<i32>} : memref<2x128xf32, #tpu.memory_space<vmem>>, vector<2x128xf32>,
    return
  }
}

</mosaic_0001>

<bundles_post_ra>
// kernel: gru_model_forward.1
= control target key start
LH: loop header
LB: loop body
LE: loop exit
PB: predicated region body
PF: predicated region fallthrough
CT: control target
= control target key end

     0   :  { %v7980_v4 = vmov 0.0   ;;  %s7974_s0 = inlined_call_operand.vmem [shape: f32[8,2,768], index: 0, kind: input, shape index: {}]   ;;  %s7975_s1 = inlined_call_operand.vmem [shape: f32[256,768], index: 1, kind: input, shape index: {}]   ;;  %s7976_s2 = inlined_call_operand.vmem [shape: f32[1,768], index: 2, kind: input, shape index: {}]   ;;  %s7977_s3 = inlined_call_operand.vmem [shape: f32[256,128], index: 3, kind: input, shape index: {}]   ;;  %s7978_s4 = inlined_call_operand.vmem [shape: f32[1,128], index: 4, kind: input, shape index: {}]   ;;  %s7979_s5 = inlined_call_operand.hbm [shape: f32[2,128], index: 5, kind: output, shape index: {}]  }
   0x1   :  { %v3231_v0 = vld [vmem:[%s7975_s1 + $0x2d8] sm:$0xff]  ;;  %v3236_v1 = vld [vmem:[%s7975_s1 + $0x2d0] sm:$0xff]  ;;  %v3241_v2 = vld [vmem:[%s7975_s1 + $0x2a8] sm:$0xff]  ;;  %311 = vmatprep.mubr.f32.mxu0 %v7980_v4  ;;  %382 = vmatprep.mubr.f32.mxu1 %v7980_v4 }
   0x2   :  { %247 = vmatprep.subr.mxu0 %v3231_v0  ;;  %v3247_v3 = vld [vmem:[%s7975_s1 + $0x2a0] sm:$0xff]  ;;  %v3254_v5 = vld [vmem:[%s7975_s1 + $0x278] sm:$0xff]  ;;  %v3261_v6 = vld [vmem:[%s7975_s1 + $0x270] sm:$0xff] }
   0x3   :  { %248 = vmatpush1.msra.mxu0 %v3236_v1  ;;  %v3267_v7 = vld [vmem:[%s7975_s1 + $0x248] sm:$0xff]  ;;  %v3273_v8 = vld [vmem:[%s7975_s1 + $0x240] sm:$0xff]  ;;  %v3279_v9 = vld [vmem:[%s7975_s1 + $0x218] sm:$0xff] }
   0x4   :  { %249 = vmatprep.subr.mxu0 %v3241_v2  ;;  %v3285_v10 = vld [vmem:[%s7975_s1 + $0x210] sm:$0xff]  ;;  %v3291_v11 = vld [vmem:[%s7975_s1 + $0x1e8] sm:$0xff]  ;;  %v3297_v12 = vld [vmem:[%s7975_s1 + $0x1e0] sm:$0xff] }
   0x5   :  { %250 = vmatpush1.msra.mxu0 %v3247_v3  ;;  %v3303_v13 = vld [vmem:[%s7975_s1 + $0x1b8] sm:$0xff]  ;;  %v3309_v14 = vld [vmem:[%s7975_s1 + $0x1b0] sm:$0xff]  ;;  %v3315_v15 = vld [vmem:[%s7975_s1 + $0x188] sm:$0xff] }
   0x6   :  { %251 = vmatprep.subr.mxu0 %v3254_v5  ;;  %v3321_v16 = vld [vmem:[%s7975_s1 + $0x180] sm:$0xff]  ;;  %v3327_v17 = vld [vmem:[%s7975_s1 + $0x158] sm:$0xff]  ;;  %v3333_v18 = vld [vmem:[%s7975_s1 + $0x150] sm:$0xff] }
   0x7   :  { %252 = vmatpush1.msra.mxu0 %v3261_v6  ;;  %v3338_v19 = vld [vmem:[%s7975_s1 + $0x2e8] sm:$0xff]  ;;  %v3343_v20 = vld [vmem:[%s7975_s1 + $0x2e0] sm:$0xff]  ;;  %v3355_v22 = vld [vmem:[%s7975_s1 + $0x2b8] sm:$0xff] }
   0x8   :  { %253 = vmatprep.subr.mxu0 %v3267_v7  ;;  %v3349_v21 = vld [vmem:[%s7975_s1 + $0x128] sm:$0xff]  ;;  %318 = vmatprep.subr.mxu1 %v3338_v19  ;;  %v3361_v23 = vld [vmem:[%s7975_s1 + $0x120] sm:$0xff]  ;;  %v3367_v24 = vld [vmem:[%s7975_s1 + $0x2b0] sm:$0xff] }
   0x9   :  { %254 = vmatpush1.msra.mxu0 %v3273_v8  ;;  %319 = vmatpush1.msra.mxu1 %v3343_v20  ;;  %v3372_v25 = vld [vmem:[%s7975_s1 + $0x288] sm:$0xff]  ;;  %v3378_v26 = vld [vmem:[%s7975_s1 + $0xf8] sm:$0xff]  ;;  %v3384_v27 = vld [vmem:[%s7975_s1 + $0x280] sm:$0xff] }
   0xa   :  { %255 = vmatprep.subr.mxu0 %v3279_v9  ;;  %320 = vmatprep.subr.mxu1 %v3355_v22  ;;  %8631 = vst [vmem:[#allocation5_spill] sm:$0xff] %v3384_v27  ;;  %v3390_v28 = vld [vmem:[%s7975_s1 + $0xf0] sm:$0xff]  ;;  %v3396_v29 = vld [vmem:[%s7975_s1 + $0x258] sm:$0xff]  ;;  %v3402_v30 = vld [vmem:[%s7975_s1 + $0xc8] sm:$0xff] }
   0xb   :  { %256 = vmatpush1.msra.mxu0 %v3285_v10  ;;  %321 = vmatpush1.msra.mxu1 %v3367_v24  ;;  %8632 = vst [vmem:[#allocation6_spill] sm:$0xff] %v3396_v29  ;;  %v3408_v31 = vld [vmem:[%s7975_s1 + $0x250] sm:$0xff]  ;;  %v3414_v32 = vld [vmem:[%s7975_s1 + $0xc0] sm:$0xff]  ;;  %v3420_v33 = vld [vmem:[%s7975_s1 + $0x228] sm:$0xff] }
   0xc   :  { %257 = vmatprep.subr.mxu0 %v3291_v11  ;;  %322 = vmatprep.subr.mxu1 %v3372_v25  ;;  %8633 = vst [vmem:[#allocation7_spill] sm:$0xff] %v3408_v31  ;;  %8634 = vst [vmem:[#allocation8_spill] sm:$0xff] %v3420_v33  ;;  %v3426_v34 = vld [vmem:[%s7975_s1 + $0x98] sm:$0xff]  ;;  %v3432_v35 = vld [vmem:[%s7975_s1 + $0x220] sm:$0xff] }
   0xd   :  { %258 = vmatpush1.msra.mxu0 %v3297_v12  ;;  %323 = vmatpush1.msra.mxu1 %v3384_v27  ;;  %8635 = vst [vmem:[#allocation9_spill] sm:$0xff] %v3432_v35  ;;  %v3438_v36 = vld [vmem:[%s7975_s1 + $0x90] sm:$0xff]  ;;  %v3444_v37 = vld [vmem:[%s7975_s1 + $0x1f8] sm:$0xff]  ;;  %v3450_v38 = vld [vmem:[%s7975_s1 + $0x68] sm:$0xff] }
   0xe   :  { %259 = vmatprep.subr.mxu0 %v3303_v13  ;;  %324 = vmatprep.subr.mxu1 %v3396_v29  ;;  %8636 = vst [vmem:[#allocation10_spill] sm:$0xff] %v3444_v37  ;;  %v3456_v39 = vld [vmem:[%s7975_s1 + $0x1f0] sm:$0xff]  ;;  %v3462_v40 = vld [vmem:[%s7975_s1 + $0x60] sm:$0xff]  ;;  %v3468_v41 = vld [vmem:[%s7975_s1 + $0x1c8] sm:$0xff] }
   0xf   :  { %260 = vmatpush1.msra.mxu0 %v3309_v14  ;;  %325 = vmatpush1.msra.mxu1 %v3408_v31  ;;  %8637 = vst [vmem:[#allocation11_spill] sm:$0xff] %v3456_v39  ;;  %8638 = vst [vmem:[#allocation12_spill] sm:$0xff] %v3468_v41  ;;  %v3474_v42 = vld [vmem:[%s7975_s1 + $0x38] sm:$0xff]  ;;  %v3480_v43 = vld [vmem:[%s7975_s1 + $0x1c0] sm:$0xff] }
  0x10   :  { %261 = vmatprep.subr.mxu0 %v3315_v15  ;;  %326 = vmatprep.subr.mxu1 %v3420_v33  ;;  %8639 = vst [vmem:[#allocation13_spill] sm:$0xff] %v3480_v43  ;;  %v3486_v44 = vld [vmem:[%s7975_s1 + $0x30] sm:$0xff]  ;;  %v3492_v45 = vld [vmem:[%s7975_s1 + $0x198] sm:$0xff]  ;;  %v3498_v46 = vld [vmem:[%s7975_s1 + $0x8] sm:$0xff] }
  0x11   :  { %262 = vmatpush1.msra.mxu0 %v3321_v16  ;;  %327 = vmatpush1.msra.mxu1 %v3432_v35  ;;  %8640 = vst [vmem:[#allocation14_spill] sm:$0xff] %v3492_v45  ;;  %v3504_v47 = vld [vmem:[%s7975_s1 + $0x190] sm:$0xff]  ;;  %v3510_v48 = vld [vmem:[%s7975_s1] sm:$0xff]  ;;  %v3516_v49 = vld [vmem:[%s7975_s1 + $0x168] sm:$0xff] }
  0x12   :  { %263 = vmatprep.subr.mxu0 %v3327_v17  ;;  %328 = vmatprep.subr.mxu1 %v3444_v37  ;;  %8641 = vst [vmem:[#allocation15_spill] sm:$0xff] %v3504_v47  ;;  %8642 = vst [vmem:[#allocation16_spill] sm:$0xff] %v3516_v49  ;;  %v3522_v50 = vld [vmem:[%s7975_s1 + $0x5d8] sm:$0xff]  ;;  %v3528_v51 = vld [vmem:[%s7975_s1 + $0x160] sm:$0xff] }
  0x13   :  { %264 = vmatpush1.msra.mxu0 %v3333_v18  ;;  %329 = vmatpush1.msra.mxu1 %v3456_v39  ;;  %8643 = vst [vmem:[#allocation17_spill] sm:$0xff] %v3528_v51  ;;  %v3534_v52 = vld [vmem:[%s7975_s1 + $0x5d0] sm:$0xff]  ;;  %v3540_v53 = vld [vmem:[%s7975_s1 + $0x138] sm:$0xff]  ;;  %v3546_v54 = vld [vmem:[%s7975_s1 + $0x5a8] sm:$0xff] }
  0x14   :  { %265 = vmatprep.subr.mxu0 %v3349_v21  ;;  %330 = vmatprep.subr.mxu1 %v3468_v41  ;;  %8644 = vst [vmem:[#allocation18_spill] sm:$0xff] %v3540_v53  ;;  %v3552_v55 = vld [vmem:[%s7975_s1 + $0x130] sm:$0xff]  ;;  %v3558_v56 = vld [vmem:[%s7975_s1 + $0x5a0] sm:$0xff]  ;;  %v3564_v57 = vld [vmem:[%s7975_s1 + $0x108] sm:$0xff] }
  0x15   :  { %266 = vmatpush1.msra.mxu0 %v3361_v23  ;;  %331 = vmatpush1.msra.mxu1 %v3480_v43  ;;  %8645 = vst [vmem:[#allocation19_spill] sm:$0xff] %v3552_v55  ;;  %8646 = vst [vmem:[#allocation20_spill] sm:$0xff] %v3564_v57  ;;  %v3570_v58 = vld [vmem:[%s7975_s1 + $0x578] sm:$0xff]  ;;  %v3576_v59 = vld [vmem:[%s7975_s1 + $0x100] sm:$0xff] }
  0x16   :  { %267 = vmatprep.subr.mxu0 %v3378_v26  ;;  %332 = vmatprep.subr.mxu1 %v3492_v45  ;;  %8647 = vst [vmem:[#allocation21_spill] sm:$0xff] %v3576_v59  ;;  %v3582_v60 = vld [vmem:[%s7975_s1 + $0x570] sm:$0xff]  ;;  %v3588_v61 = vld [vmem:[%s7975_s1 + $0xd8] sm:$0xff]  ;;  %v3594_v62 = vld [vmem:[%s7975_s1 + $0x548] sm:$0xff] }
  0x17   :  { %268 = vmatpush1.msra.mxu0 %v3390_v28  ;;  %333 = vmatpush1.msra.mxu1 %v3504_v47  ;;  %8648 = vst [vmem:[#allocation22_spill] sm:$0xff] %v3588_v61  ;;  %v3600_v63 = vld [vmem:[%s7975_s1 + $0xd0] sm:$0xff]  ;;  %v3606_v4 = vld [vmem:[%s7975_s1 + $0x540] sm:$0xff]  ;;  %v3660_v47 = vld [vmem:[%s7975_s1 + $0x48] sm:$0xff] }
  0x18   :  { %269 = vmatprep.subr.mxu0 %v3402_v30  ;;  %334 = vmatprep.subr.mxu1 %v3516_v49  ;;  %8649 = vst [vmem:[#allocation23_spill] sm:$0xff] %v3600_v63  ;;  %v3648_v49 = vld [vmem:[%s7975_s1 + $0x70] sm:$0xff]  ;;  %8654 = vst [vmem:[#allocation28_spill] sm:$0xff] %v3660_v47  ;;  %v3672_v45 = vld [vmem:[%s7975_s1 + $0x40] sm:$0xff] }
  0x19   :  { %270 = vmatpush1.msra.mxu0 %v3414_v32  ;;  %335 = vmatpush1.msra.mxu1 %v3528_v51  ;;  %v3636_v51 = vld [vmem:[%s7975_s1 + $0x78] sm:$0xff]  ;;  %8653 = vst [vmem:[#allocation27_spill] sm:$0xff] %v3648_v49  ;;  %8655 = vst [vmem:[#allocation29_spill] sm:$0xff] %v3672_v45  ;;  %v3696_v41 = vld [vmem:[%s7975_s1 + $0x10] sm:$0xff] }
  0x1a   :  { %271 = vmatprep.subr.mxu0 %v3426_v34  ;;  %336 = vmatprep.subr.mxu1 %v3540_v53  ;;  %v3624_v53 = vld [vmem:[%s7975_s1 + $0xa0] sm:$0xff]  ;;  %8652 = vst [vmem:[#allocation26_spill] sm:$0xff] %v3636_v51  ;;  %v3684_v43 = vld [vmem:[%s7975_s1 + $0x18] sm:$0xff]  ;;  %8657 = vst [vmem:[#allocation31_spill] sm:$0xff] %v3696_v41 }
  0x1b   :  { %272 = vmatpush1.msra.mxu0 %v3438_v36  ;;  %337 = vmatpush1.msra.mxu1 %v3552_v55  ;;  %v3612_v55 = vld [vmem:[%s7975_s1 + $0xa8] sm:$0xff]  ;;  %8651 = vst [vmem:[#allocation25_spill] sm:$0xff] %v3624_v53  ;;  %8656 = vst [vmem:[#allocation30_spill] sm:$0xff] %v3684_v43  ;;  %v3720_v37 = vld [vmem:[%s7975_s1 + $0x5e0] sm:$0xff] }
  0x1c   :  { %273 = vmatprep.subr.mxu0 %v3450_v38  ;;  %338 = vmatprep.subr.mxu1 %v3564_v57  ;;  %8650 = vst [vmem:[#allocation24_spill] sm:$0xff] %v3612_v55  ;;  %v3618_v57 = vld [vmem:[%s7975_s1 + $0x518] sm:$0xff]  ;;  %v3708_v39 = vld [vmem:[%s7975_s1 + $0x5e8] sm:$0xff]  ;;  %8659 = vst [vmem:[#allocation33_spill] sm:$0xff] %v3720_v37 }
  0x1d   :  { %274 = vmatpush1.msra.mxu0 %v3462_v40  ;;  %339 = vmatpush1.msra.mxu1 %v3576_v59  ;;  %v3630_v59 = vld [vmem:[%s7975_s1 + $0x510] sm:$0xff]  ;;  %8658 = vst [vmem:[#allocation32_spill] sm:$0xff] %v3708_v39  ;;  %v3732_v35 = vld [vmem:[%s7975_s1 + $0x5b8] sm:$0xff]  ;;  %v3756_v31 = vld [vmem:[%s7975_s1 + $0x588] sm:$0xff] }
  0x1e   :  { %275 = vmatprep.subr.mxu0 %v3474_v42  ;;  %340 = vmatprep.subr.mxu1 %v3588_v61  ;;  %v3642_v61 = vld [vmem:[%s7975_s1 + $0x4e8] sm:$0xff]  ;;  %8661 = vst [vmem:[#allocation35_spill] sm:$0xff] %v3732_v35  ;;  %v3744_v33 = vld [vmem:[%s7975_s1 + $0x5b0] sm:$0xff]  ;;  %8665 = vst [vmem:[#allocation39_spill] sm:$0xff] %v3756_v31 }
  0x1f   :  { %276 = vmatpush1.msra.mxu0 %v3486_v44  ;;  %341 = vmatpush1.msra.mxu1 %v3600_v63  ;;  %v3654_v63 = vld [vmem:[%s7975_s1 + $0x4e0] sm:$0xff]  ;;  %8663 = vst [vmem:[#allocation37_spill] sm:$0xff] %v3744_v33  ;;  %v3780_v27 = vld [vmem:[%s7975_s1 + $0x558] sm:$0xff] }
  0x20   :  { %277 = vmatprep.subr.mxu0 %v3498_v46  ;;  %342 = vmatprep.subr.mxu1 %v3612_v55  ;;  %v3666_v55 = vld [vmem:[%s7975_s1 + $0x4b8] sm:$0xff]  ;;  %v3768_v29 = vld [vmem:[%s7975_s1 + $0x580] sm:$0xff]  ;;  %8669 = vst [vmem:[#allocation43_spill] sm:$0xff] %v3780_v27 }
  0x21   :  { %278 = vmatpush1.msra.mxu0 %v3510_v48  ;;  %343 = vmatpush1.msra.mxu1 %v3624_v53  ;;  %v3678_v53 = vld [vmem:[%s7975_s1 + $0x4b0] sm:$0xff]  ;;  %8667 = vst [vmem:[#allocation41_spill] sm:$0xff] %v3768_v29 }
  0x22   :  { %279 = vmatprep.subr.mxu0 %v3522_v50  ;;  %344 = vmatprep.subr.mxu1 %v3636_v51  ;;  %v3690_v51 = vld [vmem:[%s7975_s1 + $0x488] sm:$0xff] }
  0x23   :  { %280 = vmatpush2.msra.mxu0 %v3534_v52  ;;  %345 = vmatpush1.msra.mxu1 %v3648_v49  ;;  %v3702_v49 = vld [vmem:[%s7975_s1 + $0x480] sm:$0xff] }
  0x24   :  { %281 = vmatprep.subr.mxu0 %v3546_v54  ;;  %346 = vmatprep.subr.mxu1 %v3660_v47  ;;  %v3714_v47 = vld [vmem:[%s7975_s1 + $0x458] sm:$0xff] }
  0x25   :  { %282 = vmatpush2.msra.mxu0 %v3558_v56  ;;  %347 = vmatpush1.msra.mxu1 %v3672_v45  ;;  %v3726_v45 = vld [vmem:[%s7975_s1 + $0x450] sm:$0xff] }
  0x26   :  { %283 = vmatprep.subr.mxu0 %v3570_v58  ;;  %348 = vmatprep.subr.mxu1 %v3684_v43  ;;  %8660 = vst [vmem:[#allocation34_spill] sm:$0xff] %v3726_v45  ;;  %v3738_v43 = vld [vmem:[%s7975_s1 + $0x428] sm:$0xff] }
  0x27   :  { %284 = vmatpush2.msra.mxu0 %v3582_v60  ;;  %349 = vmatpush1.msra.mxu1 %v3696_v41  ;;  %8662 = vst [vmem:[#allocation36_spill] sm:$0xff] %v3738_v43  ;;  %v3750_v41 = vld [vmem:[%s7975_s1 + $0x420] sm:$0xff] }
  0x28   :  { %285 = vmatprep.subr.mxu0 %v3594_v62  ;;  %350 = vmatprep.subr.mxu1 %v3708_v39  ;;  %8664 = vst [vmem:[#allocation38_spill] sm:$0xff] %v3750_v41  ;;  %v3762_v39 = vld [vmem:[%s7975_s1 + $0x3f8] sm:$0xff] }
  0x29   :  { %286 = vmatpush2.msra.mxu0 %v3606_v4  ;;  %351 = vmatpush2.msra.mxu1 %v3720_v37  ;;  %8666 = vst [vmem:[#allocation40_spill] sm:$0xff] %v3762_v39  ;;  %v3774_v37 = vld [vmem:[%s7975_s1 + $0x3f0] sm:$0xff] }
  0x2a   :  { %287 = vmatprep.subr.mxu0 %v3618_v57  ;;  %352 = vmatprep.subr.mxu1 %v3732_v35  ;;  %8668 = vst [vmem:[#allocation42_spill] sm:$0xff] %v3774_v37  ;;  %v3786_v35 = vld [vmem:[%s7975_s1 + $0x3c8] sm:$0xff] }
  0x2b   :  { %288 = vmatpush2.msra.mxu0 %v3630_v59  ;;  %353 = vmatpush2.msra.mxu1 %v3744_v33  ;;  %8670 = vst [vmem:[#allocation44_spill] sm:$0xff] %v3786_v35  ;;  %v3798_v33 = vld [vmem:[%s7975_s1 + $0x3c0] sm:$0xff] }
  0x2c   :  { %289 = vmatprep.subr.mxu0 %v3642_v61  ;;  %354 = vmatprep.subr.mxu1 %v3756_v31  ;;  %8672 = vst [vmem:[#allocation46_spill] sm:$0xff] %v3798_v33  ;;  %v3810_v31 = vld [vmem:[%s7975_s1 + $0x398] sm:$0xff] }
  0x2d   :  { %290 = vmatpush2.msra.mxu0 %v3654_v63  ;;  %355 = vmatpush2.msra.mxu1 %v3768_v29  ;;  %8674 = vst [vmem:[#allocation48_spill] sm:$0xff] %v3810_v31  ;;  %v3822_v29 = vld [vmem:[%s7975_s1 + $0x390] sm:$0xff] }
  0x2e   :  { %291 = vmatprep.subr.mxu0 %v3666_v55  ;;  %356 = vmatprep.subr.mxu1 %v3780_v27  ;;  %8676 = vst [vmem:[#allocation50_spill] sm:$0xff] %v3822_v29  ;;  %v3834_v27 = vld [vmem:[%s7975_s1 + $0x368] sm:$0xff] }
  0x2f   :  { %292 = vmatpush2.msra.mxu0 %v3678_v53  ;;  %8678 = vst [vmem:[#allocation52_spill] sm:$0xff] %v3834_v27 }
  0x30   :  { %293 = vmatprep.subr.mxu0 %v3690_v51 }
  0x31   :  { %294 = vmatpush2.msra.mxu0 %v3702_v49 }
  0x32   :  { %295 = vmatprep.subr.mxu0 %v3714_v47 }
  0x33   :  { %296 = vmatpush2.msra.mxu0 %v3726_v45 }
  0x34   :  { %297 = vmatprep.subr.mxu0 %v3738_v43  ;;  %v3792_v43 = vld [vmem:[%s7975_s1 + $0x550] sm:$0xff] }
  0x35   :  { %298 = vmatpush2.msra.mxu0 %v3750_v41  ;;  %8671 = vst [vmem:[#allocation45_spill] sm:$0xff] %v3792_v43  ;;  %v3804_v41 = vld [vmem:[%s7975_s1 + $0x528] sm:$0xff]  ;;  %357 = vmatpush2.msra.mxu1 %v3792_v43  ;;  %v3846_v43 = vld [vmem:[%s7975_s1 + $0x360] sm:$0xff] }
  0x36   :  { %299 = vmatprep.subr.mxu0 %v3762_v39  ;;  %8673 = vst [vmem:[#allocation47_spill] sm:$0xff] %v3804_v41  ;;  %v3816_v39 = vld [vmem:[%s7975_s1 + $0x520] sm:$0xff]  ;;  %358 = vmatprep.subr.mxu1 %v3804_v41  ;;  %8680 = vst [vmem:[#allocation54_spill] sm:$0xff] %v3846_v43  ;;  %v3858_v41 = vld [vmem:[%s7975_s1 + $0x338] sm:$0xff] }
  0x37   :  { %300 = vmatpush2.msra.mxu0 %v3774_v37  ;;  %8675 = vst [vmem:[#allocation49_spill] sm:$0xff] %v3816_v39  ;;  %v3828_v37 = vld [vmem:[%s7975_s1 + $0x4f8] sm:$0xff]  ;;  %359 = vmatpush2.msra.mxu1 %v3816_v39  ;;  %8682 = vst [vmem:[#allocation56_spill] sm:$0xff] %v3858_v41  ;;  %v3870_v39 = vld [vmem:[%s7975_s1 + $0x330] sm:$0xff] }
  0x38   :  { %301 = vmatprep.subr.mxu0 %v3786_v35  ;;  %8677 = vst [vmem:[#allocation51_spill] sm:$0xff] %v3828_v37  ;;  %v3840_v35 = vld [vmem:[%s7975_s1 + $0x4f0] sm:$0xff]  ;;  %360 = vmatprep.subr.mxu1 %v3828_v37  ;;  %8684 = vst [vmem:[#allocation58_spill] sm:$0xff] %v3870_v39  ;;  %v3882_v37 = vld [vmem:[%s7975_s1 + $0x308] sm:$0xff] }
  0x39   :  { %302 = vmatpush2.msra.mxu0 %v3798_v33  ;;  %8679 = vst [vmem:[#allocation53_spill] sm:$0xff] %v3840_v35  ;;  %v3852_v33 = vld [vmem:[%s7975_s1 + $0x4c8] sm:$0xff]  ;;  %361 = vmatpush2.msra.mxu1 %v3840_v35  ;;  %8686 = vst [vmem:[#allocation60_spill] sm:$0xff] %v3882_v37  ;;  %v3894_v35 = vld [vmem:[%s7975_s1 + $0x300] sm:$0xff] }
  0x3a   :  { %303 = vmatprep.subr.mxu0 %v3810_v31  ;;  %8681 = vst [vmem:[#allocation55_spill] sm:$0xff] %v3852_v33  ;;  %v3864_v31 = vld [vmem:[%s7975_s1 + $0x4c0] sm:$0xff]  ;;  %362 = vmatprep.subr.mxu1 %v3852_v33  ;;  %8688 = vst [vmem:[#allocation62_spill] sm:$0xff] %v3894_v35  ;;  %v3906_v33 = vld [vmem:[%s7975_s1 + $0x2f8] sm:$0xff] }
  0x3b   :  { %304 = vmatpush2.msra.mxu0 %v3822_v29  ;;  %8683 = vst [vmem:[#allocation57_spill] sm:$0xff] %v3864_v31  ;;  %v3876_v29 = vld [vmem:[%s7975_s1 + $0x498] sm:$0xff]  ;;  %363 = vmatpush2.msra.mxu1 %v3864_v31  ;;  %8690 = vst [vmem:[#allocation64_spill] sm:$0xff] %v3906_v33  ;;  %v3913_v31 = vld [vmem:[%s7975_s1 + $0x2f0] sm:$0xff] }
  0x3c   :  { %305 = vmatprep.subr.mxu0 %v3834_v27  ;;  %8685 = vst [vmem:[#allocation59_spill] sm:$0xff] %v3876_v29  ;;  %v3888_v27 = vld [vmem:[%s7975_s1 + $0x490] sm:$0xff]  ;;  %364 = vmatprep.subr.mxu1 %v3876_v29  ;;  %8691 = vst [vmem:[#allocation65_spill] sm:$0xff] %v3913_v31  ;;  %v3925_v29 = vld [vmem:[%s7975_s1 + $0x2c8] sm:$0xff] }
  0x3d   :  { %306 = vmatpush2.msra.mxu0 %v3846_v43  ;;  %8687 = vst [vmem:[#allocation61_spill] sm:$0xff] %v3888_v27  ;;  %v3900_v43 = vld [vmem:[%s7975_s1 + $0x468] sm:$0xff]  ;;  %365 = vmatpush2.msra.mxu1 %v3888_v27  ;;  %8693 = vst [vmem:[#allocation67_spill] sm:$0xff] %v3925_v29 }
  0x3e   :  { %307 = vmatprep.subr.mxu0 %v3858_v41  ;;  %8689 = vst [vmem:[#allocation63_spill] sm:$0xff] %v3900_v43  ;;  %366 = vmatprep.subr.mxu1 %v3900_v43 }
  0x3f   :  { %308 = vmatpush2.msra.mxu0 %v3870_v39  ;;  %v3919_v39 = vld [vmem:[%s7975_s1 + $0x460] sm:$0xff] }
  0x40   :  { %309 = vmatprep.subr.mxu0 %v3882_v37  ;;  %8692 = vst [vmem:[#allocation66_spill] sm:$0xff] %v3919_v39  ;;  %v3931_v37 = vld [vmem:[%s7975_s1 + $0x438] sm:$0xff] }
  0x41   :  { %310 = vmatpush2.msra.mxu0 %v3894_v35  ;;  %8694 = vst [vmem:[#allocation68_spill] sm:$0xff] %v3931_v37 }
  0x42   :  { %10 = vsyncpa [#allocation3], 0  ;;  %v8695_v27 = vmov 0.0   ;;  %389 = vmatprep.subr.mxu0 %v3906_v33  ;;  %v3938_v35 = vld [vmem:[%s7975_s1 + $0x2c0] sm:$0xff]  ;;  %v3943_v41 = vld [vmem:[%s7975_s1 + $0x430] sm:$0xff]  ;;  %367 = vmatpush2.msra.mxu1 %v3919_v39  ;;  %s3197_s6 = smov [#allocation2]  }
  0x43   :  { %312 = vmatmul.mubr.f32.vlgmr.msra.gmra.mxu0 %v8695_v27  ;;  %8696 = vst [vmem:[#allocation69_spill] sm:$0xff] %v3938_v35  ;;  %8697 = vst [vmem:[#allocation70_spill] sm:$0xff] %v3943_v41  ;;  %v3949_v43 = vld [vmem:[%s7975_s1 + $0x298] sm:$0xff]  ;;  %v3955_v33 = vld [vmem:[%s7975_s1 + $0x408] sm:$0xff]  ;;  %368 = vmatprep.subr.mxu1 %v3931_v37  ;;  %s2632_s7 = sshll.u32 %s3197_s6, 4  ;;  %s2633_s7 = int_to_ptr.vmem [resolvable:$true] %s2632_s7 }
  0x44   :  { %390 = vmatpush1.msra.mxu0 %v3913_v31  ;;  %8698 = vst [vmem:[#allocation71_spill] sm:$0xff] %v3949_v43  ;;  %8699 = vst [vmem:[#allocation72_spill] sm:$0xff] %v3955_v33  ;;  %v3961_v45 = vld [vmem:[%s7975_s1 + $0x290] sm:$0xff]  ;;  %v3967_v31 = vld [vmem:[%s7975_s1 + $0x400] sm:$0xff]  ;;  %369 = vmatpush2.msra.mxu1 %v3943_v41  ;;  %s3173_s8 = scalar_lea.vmem %s2633_s7, 32  ;;  %p3178_p1 = scmp.lt.s32.totalorder %s2633_s7, %s2633_s7 }
  0x45   :  { %391 = vmatprep.subr.mxu0 %v3925_v29  ;;  %8700 = vst [vmem:[#allocation73_spill] sm:$0xff] %v3961_v45  ;;  %8701 = vst [vmem:[#allocation74_spill] sm:$0xff] %v3967_v31  ;;  %v3973_v39 = vld [vmem:[%s7975_s1 + $0x268] sm:$0xff]  ;;  %v3979_v29 = vld [vmem:[%s7975_s1 + $0x3d8] sm:$0xff]  ;;  %370 = vmatprep.subr.mxu1 %v3955_v33  ;;  %p3174_p0 = scmp.ne.s32.totalorder %s2633_s7, %s3173_s8  ;;  %p3179_p2 = scmp.lt.s32.totalorder %s3173_s8, %s3173_s8 }
  0x46   :  { %392 = vmatpush1.msra.mxu0 %v3938_v35  ;;  %8702 = vst [vmem:[#allocation75_spill] sm:$0xff] %v3973_v39  ;;  %8703 = vst [vmem:[#allocation76_spill] sm:$0xff] %v3979_v29  ;;  %v3985_v37 = vld [vmem:[%s7975_s1 + $0x260] sm:$0xff]  ;;  %v3991_v35 = vld [vmem:[%s7975_s1 + $0x3d0] sm:$0xff]  ;;  %371 = vmatpush2.msra.mxu1 %v3967_v31 }
  0x47   :  { %393 = vmatprep.subr.mxu0 %v3949_v43  ;;  %8704 = vst [vmem:[#allocation77_spill] sm:$0xff] %v3985_v37  ;;  %8705 = vst [vmem:[#allocation78_spill] sm:$0xff] %v3991_v35  ;;  %v3997_v41 = vld [vmem:[%s7975_s1 + $0x238] sm:$0xff]  ;;  %v4003_v43 = vld [vmem:[%s7975_s1 + $0x3a8] sm:$0xff]  ;;  %372 = vmatprep.subr.mxu1 %v3979_v29  ;;  %p3180_p3 = por %p3179_p2, %p3178_p1 }
  0x48   :  { %394 = vmatpush1.msra.mxu0 %v3961_v45  ;;  %8706 = vst [vmem:[#allocation79_spill] sm:$0xff] %v3997_v41  ;;  %8707 = vst [vmem:[#allocation80_spill] sm:$0xff] %v4003_v43  ;;  %v4009_v33 = vld [vmem:[%s7975_s1 + $0x230] sm:$0xff]  ;;  %v4015_v45 = vld [vmem:[%s7975_s1 + $0x3a0] sm:$0xff]  ;;  %373 = vmatpush2.msra.mxu1 %v3991_v35 }
  0x49   :  { %395 = vmatprep.subr.mxu0 %v3973_v39  ;;  %8708 = vst [vmem:[#allocation81_spill] sm:$0xff] %v4009_v33  ;;  %8709 = vst [vmem:[#allocation82_spill] sm:$0xff] %v4015_v45  ;;  %v4021_v31 = vld [vmem:[%s7975_s1 + $0x208] sm:$0xff]  ;;  %v4027_v39 = vld [vmem:[%s7975_s1 + $0x378] sm:$0xff]  ;;  %374 = vmatprep.subr.mxu1 %v4003_v43  ;;  %p3181_p4 = pnand %p3180_p3, %p3174_p0 }
  0x4a   :  { %396 = vmatpush1.msra.mxu0 %v3985_v37  ;;  %8710 = vst [vmem:[#allocation83_spill] sm:$0xff] %v4021_v31  ;;  %8711 = vst [vmem:[#allocation84_spill] sm:$0xff] %v4027_v39  ;;  %v4033_v29 = vld [vmem:[%s7975_s1 + $0x200] sm:$0xff]  ;;  %v4039_v37 = vld [vmem:[%s7975_s1 + $0x370] sm:$0xff]  ;;  %375 = vmatpush2.msra.mxu1 %v4015_v45 }
  0x4b   :  { %397 = vmatprep.subr.mxu0 %v3997_v41  ;;  %8712 = vst [vmem:[#allocation85_spill] sm:$0xff] %v4033_v29  ;;  %8713 = vst [vmem:[#allocation86_spill] sm:$0xff] %v4039_v37  ;;  %v4045_v35 = vld [vmem:[%s7975_s1 + $0x1d8] sm:$0xff]  ;;  %v4051_v41 = vld [vmem:[%s7975_s1 + $0x348] sm:$0xff]  ;;  %376 = vmatprep.subr.mxu1 %v4027_v39 }
  0x4c   :  { %398 = vmatpush1.msra.mxu0 %v4009_v33  ;;  %8714 = vst [vmem:[#allocation87_spill] sm:$0xff] %v4045_v35  ;;  %8715 = vst [vmem:[#allocation88_spill] sm:$0xff] %v4051_v41  ;;  %v4057_v43 = vld [vmem:[%s7975_s1 + $0x1d0] sm:$0xff]  ;;  %v4063_v33 = vld [vmem:[%s7975_s1 + $0x340] sm:$0xff]  ;;  %377 = vmatpush2.msra.mxu1 %v4039_v37 }
  0x4d   :  { %399 = vmatprep.subr.mxu0 %v4021_v31  ;;  %8716 = vst [vmem:[#allocation89_spill] sm:$0xff] %v4057_v43  ;;  %8717 = vst [vmem:[#allocation90_spill] sm:$0xff] %v4063_v33  ;;  %v4069_v45 = vld [vmem:[%s7975_s1 + $0x1a8] sm:$0xff]  ;;  %v4075_v31 = vld [vmem:[%s7975_s1 + $0x318] sm:$0xff]  ;;  %378 = vmatprep.subr.mxu1 %v4051_v41 }
  0x4e   :  { %400 = vmatpush1.msra.mxu0 %v4033_v29  ;;  %8718 = vst [vmem:[#allocation91_spill] sm:$0xff] %v4069_v45  ;;  %8719 = vst [vmem:[#allocation92_spill] sm:$0xff] %v4075_v31  ;;  %v4081_v39 = vld [vmem:[%s7975_s1 + $0x1a0] sm:$0xff]  ;;  %v4087_v29 = vld [vmem:[%s7975_s1 + $0x310] sm:$0xff]  ;;  %379 = vmatpush2.msra.mxu1 %v4063_v33 }
  0x4f   :  { %401 = vmatprep.subr.mxu0 %v4045_v35  ;;  %8720 = vst [vmem:[#allocation93_spill] sm:$0xff] %v4081_v39  ;;  %8721 = vst [vmem:[#allocation94_spill] sm:$0xff] %v4087_v29  ;;  %v4093_v37 = vld [vmem:[%s7975_s1 + $0x178] sm:$0xff]  ;;  %v4100_v35 = vld [vmem:[%s7975_s1 + $0x170] sm:$0xff]  ;;  %380 = vmatprep.subr.mxu1 %v4075_v31 }
  0x50   :  { %402 = vmatpush1.msra.mxu0 %v4057_v43  ;;  %8722 = vst [vmem:[#allocation95_spill] sm:$0xff] %v4093_v37  ;;  %8723 = vst [vmem:[#allocation96_spill] sm:$0xff] %v4100_v35  ;;  %v4107_v43 = vld [vmem:[%s7975_s1 + $0x148] sm:$0xff]  ;;  %381 = vmatpush2.msra.mxu1 %v4087_v29 }
  0x51   :  { %403 = vmatprep.subr.mxu0 %v4069_v45  ;;  %8724 = vst [vmem:[#allocation97_spill] sm:$0xff] %v4107_v43  ;;  %v4114_v45 = vld [vmem:[%s7975_s1 + $0x140] sm:$0xff]  ;;  %383 = vmatmul.mubr.f32.vlgmr.msra.gmra.mxu1 %v8695_v27 }
  0x52   :  { %404 = vmatpush1.msra.mxu0 %v4081_v39  ;;  %v4121_v39 = vld [vmem:[%s7975_s1 + $0x118] sm:$0xff]  ;;  %453 = vmatprep.mubr.f32.mxu0 %v8695_v27 }
  0x53   :  { %405 = vmatprep.subr.mxu0 %v4093_v37  ;;  %v4128_v37 = vld [vmem:[%s7975_s1 + $0x110] sm:$0xff]  ;;  %531 = vmatprep.subr.mxu1 %v3231_v0  ;;  %v4149_v0 = vld [vmem:[%s7975_s1 + $0xb8] sm:$0xff] }
  0x54   :  { %406 = vmatpush1.msra.mxu0 %v4100_v35  ;;  %v4135_v35 = vld [vmem:[%s7975_s1 + $0xe8] sm:$0xff]  ;;  %532 = vmatpush1.msra.mxu1 %v3236_v1  ;;  %v4156_v1 = vld [vmem:[%s7975_s1 + $0xb0] sm:$0xff] }
  0x55   :  { %407 = vmatprep.subr.mxu0 %v4107_v43  ;;  %v4142_v43 = vld [vmem:[%s7975_s1 + $0xe0] sm:$0xff]  ;;  %533 = vmatprep.subr.mxu1 %v3241_v2  ;;  %v4163_v2 = vld [vmem:[%s7975_s1 + $0x88] sm:$0xff] }
  0x56   :  { %408 = vmatpush1.msra.mxu0 %v4114_v45  ;;  %534 = vmatpush1.msra.mxu1 %v3247_v3  ;;  %v4170_v3 = vld [vmem:[%s7975_s1 + $0x80] sm:$0xff] }
  0x57   :  { %409 = vmatprep.subr.mxu0 %v4121_v39  ;;  %535 = vmatprep.subr.mxu1 %v3254_v5  ;;  %v4177_v5 = vld [vmem:[%s7975_s1 + $0x58] sm:$0xff] }
  0x58   :  { %410 = vmatpush1.msra.mxu0 %v4128_v37  ;;  %536 = vmatpush1.msra.mxu1 %v3261_v6  ;;  %v4184_v6 = vld [vmem:[%s7975_s1 + $0x50] sm:$0xff] }
  0x59   :  { %411 = vmatprep.subr.mxu0 %v4135_v35  ;;  %537 = vmatprep.subr.mxu1 %v3267_v7  ;;  %v4191_v7 = vld [vmem:[%s7975_s1 + $0x28] sm:$0xff] }
  0x5a   :  { %412 = vmatpush1.msra.mxu0 %v4142_v43  ;;  %538 = vmatpush1.msra.mxu1 %v3273_v8  ;;  %v4198_v8 = vld [vmem:[%s7975_s1 + $0x20] sm:$0xff] }
  0x5b   :  { %413 = vmatprep.subr.mxu0 %v4149_v0  ;;  %539 = vmatprep.subr.mxu1 %v3279_v9  ;;  %v4205_v9 = vld [vmem:[%s7975_s1 + $0x5f8] sm:$0xff] }
  0x5c   :  { %414 = vmatpush1.msra.mxu0 %v4156_v1  ;;  %540 = vmatpush1.msra.mxu1 %v3285_v10  ;;  %v4212_v10 = vld [vmem:[%s7975_s1 + $0x5f0] sm:$0xff] }
  0x5d   :  { %415 = vmatprep.subr.mxu0 %v4163_v2  ;;  %541 = vmatprep.subr.mxu1 %v3291_v11  ;;  %v4219_v11 = vld [vmem:[%s7975_s1 + $0x5c8] sm:$0xff] }
  0x5e   :  { %416 = vmatpush1.msra.mxu0 %v4170_v3  ;;  %542 = vmatpush1.msra.mxu1 %v3297_v12  ;;  %v4226_v12 = vld [vmem:[%s7975_s1 + $0x5c0] sm:$0xff] }
  0x5f   :  { %417 = vmatprep.subr.mxu0 %v4177_v5  ;;  %543 = vmatprep.subr.mxu1 %v3303_v13  ;;  %v4233_v13 = vld [vmem:[%s7975_s1 + $0x598] sm:$0xff] }
  0x60   :  { %418 = vmatpush1.msra.mxu0 %v4184_v6  ;;  %544 = vmatpush1.msra.mxu1 %v3309_v14  ;;  %v4240_v14 = vld [vmem:[%s7975_s1 + $0x590] sm:$0xff] }
  0x61   :  { %419 = vmatprep.subr.mxu0 %v4191_v7  ;;  %545 = vmatprep.subr.mxu1 %v3315_v15  ;;  %v4247_v15 = vld [vmem:[%s7975_s1 + $0x568] sm:$0xff] }
  0x62   :  { %420 = vmatpush1.msra.mxu0 %v4198_v8  ;;  %546 = vmatpush1.msra.mxu1 %v3321_v16  ;;  %v4254_v16 = vld [vmem:[%s7975_s1 + $0x560] sm:$0xff] }
  0x63   :  { %421 = vmatprep.subr.mxu0 %v4205_v9  ;;  %547 = vmatprep.subr.mxu1 %v3327_v17  ;;  %v4261_v17 = vld [vmem:[%s7975_s1 + $0x538] sm:$0xff] }
  0x64   :  { %422 = vmatpush2.msra.mxu0 %v4212_v10  ;;  %548 = vmatpush1.msra.mxu1 %v3333_v18  ;;  %v4268_v18 = vld [vmem:[%s7975_s1 + $0x530] sm:$0xff] }
  0x65   :  { %423 = vmatprep.subr.mxu0 %v4219_v11  ;;  %549 = vmatprep.subr.mxu1 %v3349_v21  ;;  %v4275_v21 = vld [vmem:[%s7975_s1 + $0x508] sm:$0xff] }
  0x66   :  { %424 = vmatpush2.msra.mxu0 %v4226_v12  ;;  %550 = vmatpush1.msra.mxu1 %v3361_v23  ;;  %v4282_v23 = vld [vmem:[%s7975_s1 + $0x500] sm:$0xff] }
  0x67   :  { %425 = vmatprep.subr.mxu0 %v4233_v13  ;;  %551 = vmatprep.subr.mxu1 %v3378_v26  ;;  %v4289_v26 = vld [vmem:[%s7975_s1 + $0x4d8] sm:$0xff] }
  0x68   :  { %426 = vmatpush2.msra.mxu0 %v4240_v14  ;;  %552 = vmatpush1.msra.mxu1 %v3390_v28  ;;  %v4296_v28 = vld [vmem:[%s7975_s1 + $0x4d0] sm:$0xff] }
  0x69   :  { %427 = vmatprep.subr.mxu0 %v4247_v15  ;;  %553 = vmatprep.subr.mxu1 %v3402_v30  ;;  %v4303_v30 = vld [vmem:[%s7975_s1 + $0x4a8] sm:$0xff] }
  0x6a   :  { %428 = vmatpush2.msra.mxu0 %v4254_v16  ;;  %554 = vmatpush1.msra.mxu1 %v3414_v32  ;;  %v4310_v32 = vld [vmem:[%s7975_s1 + $0x4a0] sm:$0xff] }
  0x6b   :  { %429 = vmatprep.subr.mxu0 %v4261_v17  ;;  %555 = vmatprep.subr.mxu1 %v3426_v34  ;;  %v4317_v34 = vld [vmem:[%s7975_s1 + $0x478] sm:$0xff] }
  0x6c   :  { %430 = vmatpush2.msra.mxu0 %v4268_v18  ;;  %556 = vmatpush1.msra.mxu1 %v3438_v36  ;;  %v4324_v36 = vld [vmem:[%s7975_s1 + $0x470] sm:$0xff] }
  0x6d   :  { %431 = vmatprep.subr.mxu0 %v4275_v21  ;;  %557 = vmatprep.subr.mxu1 %v3450_v38  ;;  %v4331_v38 = vld [vmem:[%s7975_s1 + $0x448] sm:$0xff] }
  0x6e   :  { %432 = vmatpush2.msra.mxu0 %v4282_v23  ;;  %558 = vmatpush1.msra.mxu1 %v3462_v40  ;;  %v4338_v40 = vld [vmem:[%s7975_s1 + $0x440] sm:$0xff] }
  0x6f   :  { %433 = vmatprep.subr.mxu0 %v4289_v26  ;;  %559 = vmatprep.subr.mxu1 %v3474_v42  ;;  %v4345_v42 = vld [vmem:[%s7975_s1 + $0x418] sm:$0xff] }
  0x70   :  { %434 = vmatpush2.msra.mxu0 %v4296_v28  ;;  %560 = vmatpush1.msra.mxu1 %v3486_v44  ;;  %v4352_v44 = vld [vmem:[%s7975_s1 + $0x410] sm:$0xff] }
  0x71   :  { %435 = vmatprep.subr.mxu0 %v4303_v30  ;;  %561 = vmatprep.subr.mxu1 %v3498_v46  ;;  %v4359_v46 = vld [vmem:[%s7975_s1 + $0x3e8] sm:$0xff] }
  0x72   :  { %436 = vmatpush2.msra.mxu0 %v4310_v32  ;;  %562 = vmatpush1.msra.mxu1 %v3510_v48  ;;  %v4366_v48 = vld [vmem:[%s7975_s1 + $0x3e0] sm:$0xff] }
  0x73   :  { %437 = vmatprep.subr.mxu0 %v4317_v34  ;;  %563 = vmatprep.subr.mxu1 %v3522_v50  ;;  %v4373_v50 = vld [vmem:[%s7975_s1 + $0x3b8] sm:$0xff] }
  0x74   :  { %438 = vmatpush2.msra.mxu0 %v4324_v36  ;;  %564 = vmatpush2.msra.mxu1 %v3534_v52  ;;  %v4380_v52 = vld [vmem:[%s7975_s1 + $0x3b0] sm:$0xff] }
  0x75   :  { %439 = vmatprep.subr.mxu0 %v4331_v38  ;;  %565 = vmatprep.subr.mxu1 %v3546_v54  ;;  %v4387_v54 = vld [vmem:[%s7975_s1 + $0x388] sm:$0xff] }
  0x76   :  { %440 = vmatpush2.msra.mxu0 %v4338_v40  ;;  %566 = vmatpush2.msra.mxu1 %v3558_v56  ;;  %v4394_v56 = vld [vmem:[%s7975_s1 + $0x380] sm:$0xff] }
  0x77   :  { %441 = vmatprep.subr.mxu0 %v4345_v42  ;;  %567 = vmatprep.subr.mxu1 %v3570_v58  ;;  %8725 = vst [vmem:[#allocation98_spill] sm:$0xff] %v4394_v56  ;;  %v4401_v58 = vld [vmem:[%s7975_s1 + $0x358] sm:$0xff] }
  0x78   :  { %442 = vmatpush2.msra.mxu0 %v4352_v44  ;;  %568 = vmatpush2.msra.mxu1 %v3582_v60  ;;  %8726 = vst [vmem:[#allocation99_spill] sm:$0xff] %v4401_v58  ;;  %v4408_v60 = vld [vmem:[%s7975_s1 + $0x350] sm:$0xff] }
  0x79   :  { %443 = vmatprep.subr.mxu0 %v4359_v46  ;;  %569 = vmatprep.subr.mxu1 %v3594_v62  ;;  %8727 = vst [vmem:[#allocation100_spill] sm:$0xff] %v4408_v60  ;;  %v4415_v62 = vld [vmem:[%s7975_s1 + $0x328] sm:$0xff] }
  0x7a   :  { %444 = vmatpush2.msra.mxu0 %v4366_v48  ;;  %570 = vmatpush2.msra.mxu1 %v3606_v4  ;;  %8728 = vst [vmem:[#allocation101_spill] sm:$0xff] %v4415_v62  ;;  %v4422_v4 = vld [vmem:[%s7975_s1 + $0x320] sm:$0xff] }
  0x7b   :  { %445 = vmatprep.subr.mxu0 %v4373_v50  ;;  %571 = vmatprep.subr.mxu1 %v3618_v57  ;;  %8729 = vst [vmem:[#allocation102_spill] sm:$0xff] %v4422_v4  ;;  %v8741_v57 = vld [vmem:[#allocation10_spill] sm:$0xff] }
  0x7c   :  { %446 = vmatpush2.msra.mxu0 %v4380_v52  ;;  %572 = vmatpush2.msra.mxu1 %v3630_v59  ;;  %v8742_v59 = vld [vmem:[#allocation46_spill] sm:$0xff] }
  0x7d   :  { %447 = vmatprep.subr.mxu0 %v4387_v54  ;;  %573 = vmatprep.subr.mxu1 %v3642_v61  ;;  %v8743_v61 = vld [vmem:[#allocation11_spill] sm:$0xff] }
  0x7e   :  { %448 = vmatpush2.msra.mxu0 %v4394_v56  ;;  %574 = vmatpush2.msra.mxu1 %v3654_v63  ;;  %v8744_v63 = vld [vmem:[#allocation48_spill] sm:$0xff] }
  0x7f   :  { %449 = vmatprep.subr.mxu0 %v4401_v58  ;;  %575 = vmatprep.subr.mxu1 %v3666_v55  ;;  %v8730_v55 = vld [vmem:[#allocation34_spill] sm:$0xff] }
  0x80   :  { %450 = vmatpush2.msra.mxu0 %v4408_v60  ;;  %576 = vmatpush2.msra.mxu1 %v3678_v53  ;;  %v8731_v53 = vld [vmem:[#allocation5_spill] sm:$0xff] }
  0x81   :  { %451 = vmatprep.subr.mxu0 %v4415_v62  ;;  %577 = vmatprep.subr.mxu1 %v3690_v51  ;;  %v8735_v51 = vld [vmem:[#allocation7_spill] sm:$0xff] }
  0x82   :  { %452 = vmatpush2.msra.mxu0 %v4422_v4  ;;  %578 = vmatpush2.msra.mxu1 %v3702_v49  ;;  %v8737_v49 = vld [vmem:[#allocation8_spill] sm:$0xff]  ;;  %v8763_v4 = vld [vmem:[#allocation22_spill] sm:$0xff] }
  0x83   :  { %454 = vmatmul.mubr.f32.vlgmr.msra.gmra.mxu0 %v8695_v27  ;;  %602 = vmatprep.subr.mxu0 %v3338_v19  ;;  %v8732_v27 = vld [vmem:[#allocation36_spill] sm:$0xff]  ;;  %v8733_v19 = vld [vmem:[#allocation6_spill] sm:$0xff] }
  0x84   :  { %603 = vmatpush1.msra.mxu0 %v3343_v20  ;;  %579 = vmatprep.subr.mxu1 %v3714_v47  ;;  %v8734_v20 = vld [vmem:[#allocation38_spill] sm:$0xff]  ;;  %v8739_v47 = vld [vmem:[#allocation9_spill] sm:$0xff] }
  0x85   :  { %604 = vmatprep.subr.mxu0 %v3355_v22  ;;  %580 = vmatpush2.msra.mxu1 %v8730_v55  ;;  %v8736_v22 = vld [vmem:[#allocation40_spill] sm:$0xff] }
  0x86   :  { %605 = vmatpush1.msra.mxu0 %v3367_v24  ;;  %581 = vmatprep.subr.mxu1 %v8732_v27  ;;  %v8738_v24 = vld [vmem:[#allocation42_spill] sm:$0xff]  ;;  %v8745_v55 = vld [vmem:[#allocation12_spill] sm:$0xff]  ;;  %v8747_v27 = vld [vmem:[#allocation13_spill] sm:$0xff] }
  0x87   :  { %606 = vmatprep.subr.mxu0 %v3372_v25  ;;  %582 = vmatpush2.msra.mxu1 %v8734_v20  ;;  %v8740_v25 = vld [vmem:[#allocation44_spill] sm:$0xff]  ;;  %v8749_v20 = vld [vmem:[#allocation14_spill] sm:$0xff] }
  0x88   :  { %607 = vmatpush1.msra.mxu0 %v8731_v53  ;;  %583 = vmatprep.subr.mxu1 %v8736_v22  ;;  %v8746_v53 = vld [vmem:[#allocation50_spill] sm:$0xff]  ;;  %v8751_v22 = vld [vmem:[#allocation15_spill] sm:$0xff] }
  0x89   :  { %608 = vmatprep.subr.mxu0 %v8733_v19  ;;  %584 = vmatpush2.msra.mxu1 %v8738_v24  ;;  %v8748_v19 = vld [vmem:[#allocation52_spill] sm:$0xff] }
  0x8a   :  { %609 = vmatpush1.msra.mxu0 %v8735_v51  ;;  %585 = vmatprep.subr.mxu1 %v8740_v25  ;;  %v8750_v51 = vld [vmem:[#allocation54_spill] sm:$0xff]  ;;  %v8753_v24 = vld [vmem:[#allocation16_spill] sm:$0xff]  ;;  %v8755_v25 = vld [vmem:[#allocation17_spill] sm:$0xff] }
  0x8b   :  { %610 = vmatprep.subr.mxu0 %v8737_v49  ;;  %586 = vmatpush2.msra.mxu1 %v8742_v59  ;;  %v8752_v49 = vld [vmem:[#allocation56_spill] sm:$0xff]  ;;  %v8757_v59 = vld [vmem:[#allocation18_spill] sm:$0xff] }
  0x8c   :  { %611 = vmatpush1.msra.mxu0 %v8739_v47  ;;  %587 = vmatprep.subr.mxu1 %v8744_v63  ;;  %v8754_v47 = vld [vmem:[#allocation58_spill] sm:$0xff] }
  0x8d   :  { %612 = vmatprep.subr.mxu0 %v8741_v57  ;;  %588 = vmatpush2.msra.mxu1 %v8746_v53  ;;  %v8756_v57 = vld [vmem:[#allocation60_spill] sm:$0xff] }
  0x8e   :  { %613 = vmatpush1.msra.mxu0 %v8743_v61  ;;  %589 = vmatprep.subr.mxu1 %v8748_v19  ;;  %v8758_v61 = vld [vmem:[#allocation62_spill] sm:$0xff] }
  0x8f   :  { %614 = vmatprep.subr.mxu0 %v8745_v55  ;;  %590 = vmatpush2.msra.mxu1 %v8750_v51  ;;  %v8759_v55 = vld [vmem:[#allocation19_spill] sm:$0xff] }
  0x90   :  { %615 = vmatpush1.msra.mxu0 %v8747_v27  ;;  %591 = vmatprep.subr.mxu1 %v8752_v49  ;;  %v8760_v27 = vld [vmem:[#allocation64_spill] sm:$0xff] }
  0x91   :  { %616 = vmatprep.subr.mxu0 %v8749_v20  ;;  %592 = vmatpush2.msra.mxu1 %v8754_v47  ;;  %v8761_v20 = vld [vmem:[#allocation20_spill] sm:$0xff] }
  0x92   :  { %617 = vmatpush1.msra.mxu0 %v8751_v22  ;;  %593 = vmatprep.subr.mxu1 %v8756_v57  ;;  %v8762_v22 = vld [vmem:[#allocation21_spill] sm:$0xff]  ;;  %v8765_v47 = vld [vmem:[#allocation24_spill] sm:$0xff]  ;;  %v8767_v57 = vld [vmem:[#allocation26_spill] sm:$0xff] }
  0x93   :  { %618 = vmatprep.subr.mxu0 %v8753_v24  ;;  %594 = vmatpush2.msra.mxu1 %v8758_v61  ;;  %v8764_v24 = vld [vmem:[#allocation23_spill] sm:$0xff]  ;;  %v8769_v61 = vld [vmem:[#allocation28_spill] sm:$0xff] }
  0x94   :  { %619 = vmatpush1.msra.mxu0 %v8755_v25  ;;  %673 = vmatprep.subr.mxu1 %v8760_v27  ;;  %v8766_v25 = vld [vmem:[#allocation25_spill] sm:$0xff]  ;;  %v8771_v27 = vld [vmem:[#allocation30_spill] sm:$0xff] }
  0x95   :  { %620 = vmatprep.subr.mxu0 %v8757_v59  ;;  %v8768_v59 = vld [vmem:[#allocation27_spill] sm:$0xff] }
  0x96   :  { %621 = vmatpush1.msra.mxu0 %v8759_v55  ;;  %v8770_v55 = vld [vmem:[#allocation29_spill] sm:$0xff] }
  0x97   :  { %622 = vmatprep.subr.mxu0 %v8761_v20  ;;  %v8772_v20 = vld [vmem:[#allocation31_spill] sm:$0xff] }
  0x98   :  { %623 = vmatpush1.msra.mxu0 %v8762_v22  ;;  %v8773_v22 = vld [vmem:[#allocation32_spill] sm:$0xff] }
  0x99   :  { %624 = vmatprep.subr.mxu0 %v8763_v4  ;;  %v8774_v4 = vld [vmem:[#allocation33_spill] sm:$0xff] }
  0x9a   :  { %625 = vmatpush1.msra.mxu0 %v8764_v24  ;;  %v8775_v24 = vld [vmem:[#allocation35_spill] sm:$0xff] }
  0x9b   :  { %626 = vmatprep.subr.mxu0 %v8765_v47  ;;  %v8776_v47 = vld [vmem:[#allocation37_spill] sm:$0xff] }
  0x9c   :  { %627 = vmatpush1.msra.mxu0 %v8766_v25  ;;  %v8777_v25 = vld [vmem:[#allocation39_spill] sm:$0xff] }
  0x9d   :  { %628 = vmatprep.subr.mxu0 %v8767_v57  ;;  %v8778_v57 = vld [vmem:[#allocation41_spill] sm:$0xff] }
  0x9e   :  { %629 = vmatpush1.msra.mxu0 %v8768_v59  ;;  %v8779_v59 = vld [vmem:[#allocation43_spill] sm:$0xff] }
  0x9f   :  { %630 = vmatprep.subr.mxu0 %v8769_v61  ;;  %v8780_v61 = vld [vmem:[#allocation45_spill] sm:$0xff] }
  0xa0   :  { %631 = vmatpush1.msra.mxu0 %v8770_v55  ;;  %v8781_v55 = vld [vmem:[#allocation47_spill] sm:$0xff] }
  0xa1   :  { %632 = vmatprep.subr.mxu0 %v8771_v27  ;;  %v8782_v27 = vld [vmem:[#allocation49_spill] sm:$0xff] }
  0xa2   :  { %633 = vmatpush1.msra.mxu0 %v8772_v20  ;;  %v8783_v20 = vld [vmem:[#allocation51_spill] sm:$0xff] }
  0xa3   :  { %634 = vmatprep.subr.mxu0 %v8773_v22  ;;  %v8784_v22 = vld [vmem:[#allocation53_spill] sm:$0xff] }
  0xa4   :  { %635 = vmatpush2.msra.mxu0 %v8774_v4  ;;  %v8785_v4 = vld [vmem:[#allocation55_spill] sm:$0xff] }
  0xa5   :  { %636 = vmatprep.subr.mxu0 %v8775_v24  ;;  %v8786_v24 = vld [vmem:[#allocation57_spill] sm:$0xff] }
  0xa6   :  { %637 = vmatpush2.msra.mxu0 %v8776_v47  ;;  %v8787_v47 = vld [vmem:[#allocation59_spill] sm:$0xff] }
  0xa7   :  { %638 = vmatprep.subr.mxu0 %v8777_v25  ;;  %v8788_v25 = vld [vmem:[#allocation61_spill] sm:$0xff] }
  0xa8   :  { %639 = vmatpush2.msra.mxu0 %v8778_v57  ;;  %v8789_v57 = vld [vmem:[#allocation63_spill] sm:$0xff] }
  0xa9   :  { %640 = vmatprep.subr.mxu0 %v8779_v59  ;;  %v8790_v59 = vld [vmem:[#allocation66_spill] sm:$0xff] }
  0xaa   :  { %641 = vmatpush2.msra.mxu0 %v8780_v61  ;;  %v8791_v61 = vld [vmem:[#allocation68_spill] sm:$0xff] }
  0xab   :  { %642 = vmatprep.subr.mxu0 %v8781_v55  ;;  %v8792_v55 = vld [vmem:[#allocation70_spill] sm:$0xff] }
  0xac   :  { %643 = vmatpush2.msra.mxu0 %v8782_v27  ;;  %v8793_v27 = vld [vmem:[#allocation72_spill] sm:$0xff] }
  0xad   :  { %644 = vmatprep.subr.mxu0 %v8783_v20  ;;  %v8794_v20 = vld [vmem:[#allocation74_spill] sm:$0xff] }
  0xae   :  { %645 = vmatpush2.msra.mxu0 %v8784_v22  ;;  %v8795_v22 = vld [vmem:[#allocation76_spill] sm:$0xff] }
  0xaf   :  { %646 = vmatprep.subr.mxu0 %v8785_v4  ;;  %v8796_v4 = vld [vmem:[#allocation78_spill] sm:$0xff] }
  0xb0   :  { %647 = vmatpush2.msra.mxu0 %v8786_v24  ;;  %v8797_v24 = vld [vmem:[#allocation80_spill] sm:$0xff] }
  0xb1   :  { %648 = vmatprep.subr.mxu0 %v8787_v47  ;;  %v8798_v47 = vld [vmem:[#allocation82_spill] sm:$0xff] }
  0xb2   :  { %649 = vmatpush2.msra.mxu0 %v8788_v25  ;;  %v8799_v25 = vld [vmem:[#allocation84_spill] sm:$0xff] }
  0xb3   :  { %650 = vmatprep.subr.mxu0 %v8789_v57  ;;  %v8800_v57 = vld [vmem:[#allocation86_spill] sm:$0xff] }
  0xb4   :  { %651 = vmatpush2.msra.mxu0 %v8790_v59  ;;  %v4518_v59 = vld [vmem:[%s7975_s1 + $0x2d8] sm:$0xff] }
  0xb5   :  { %652 = vmatprep.subr.mxu0 %v8791_v61  ;;  %8801 = vst [vmem:[#allocation34_spill] sm:$0xff] %v4518_v59  ;;  %v215_v61 = vlaneseq }
  0xb6   :  { %653 = vmatpush2.msra.mxu0 %v8792_v55 }
  0xb7   :  { %654 = vmatprep.subr.mxu0 %v8793_v27  ;;  %v216_v55 = vshrl.u32 %v215_v61, 7 }
  0xb8   :  { %655 = vmatpush2.msra.mxu0 %v8794_v20 }
  0xb9   :  { %656 = vmatprep.subr.mxu0 %v8795_v22  ;;  %v217_v27 = vsub.s32 0, %v216_v55  ;;  %v221_v20 = vsub.s32 1, %v216_v55  ;;  %v213_v22 = vld [vmem:[%s7976_s2] sm:$0x3f]  ;;  %v225_v62 = vsub.s32 2, %v216_v55  ;;  %v229_v49 = vsub.s32 3, %v216_v55 }
  0xba   :  { %657 = vmatpush2.msra.mxu0 %v8796_v4  ;;  %v237_v56 = vsub.s32 5, %v216_v55 }
  0xbb   :  { %658 = vmatprep.subr.mxu0 %v8797_v24  ;;  %v4524_v24 = vrot.slane %v213_v22, %v217_v27  ;;  %v245_v27 = vld [vmem:[%s7974_s0] sm:$0xff] }
  0xbc   :  { %659 = vmatpush2.msra.mxu0 %v8798_v47  ;;  %v3196_v47 = vmov 1983009808  }
  0xbd   :  { %660 = vmatprep.subr.mxu0 %v8799_v25  ;;  %8802 = vst [vmem:[#allocation5_spill] sm:$0xff] %v4524_v24 }
  0xbe   :  { %661 = vmatpush2.msra.mxu0 %v8800_v57 }
  0xbf   :  { %662 = vmatprep.subr.mxu0 %v4051_v41 }
  0xc0   :  { %663 = vmatpush2.msra.mxu0 %v4063_v33 }
  0xc1   :  { %664 = vmatprep.subr.mxu0 %v4075_v31  ;;  %v4526_v31 = vrot.slane %v213_v22, %v221_v20  ;;  %v4536_v20 = vrot.slane %v213_v22, %v225_v62 }
  0xc2   :  { %665 = vmatpush2.msra.mxu0 %v4087_v29  ;;  %v464_v29 = vunpack.c.l.s4 %v3196_v47  ;;  %v4538_v47 = vrot.slane %v213_v22, %v229_v49  ;;  %v233_v49 = vsub.s32 4, %v216_v55 }
  0xc3   :  { %815 = vmatprep.subr.mxu0 %v4518_v59  ;;  %8803 = vst [vmem:[#allocation36_spill] sm:$0xff] %v4526_v31 }
  0xc4   :  { %v465_v57 = vunpack.c.0.s8 %v464_v29  ;;  %v4543_v53 = vrot.slane %v213_v22, %v233_v49 }
  0xc6   :  { %v4530_v61 = vsub.s32 %v465_v57, %v216_v55 }
 0x103   :  { %v313_v4 = vpop.f32.mrf.mxu0 }
 0x104   :  { %v314_v41 = vadd.f32 %v313_v4, %v4524_v24  ;;  %v479_v24 = vrot.slane %v245_v27, 4 }
 0x105   :  { %v315_v33 = vpop.f32.mrf.mxu0 }
 0x106   :  { %v316_v59 = vadd.f32 %v315_v33, %v4526_v31 }
 0x108   :  { %v462_v25 = vcombine.low %v314_v41, %v316_v59 }
 0x10a   :  { %v469_v51 = vrot.slane %v462_v25, %v4530_v61 }
 0x10c   :  { %v471_v29 = vadd.f32 %v469_v51, %v245_v27  ;;  %v4545_v51 = vrot.slane %v213_v22, %v237_v56 }
 0x10e   :  { %v2640_v41 = vmul.f32 -1.442695, %v471_v29 }
 0x110   :  { %2709 = vpow2.f32 %v2640_v41 }
 0x111   :  { %v384_v60 = vpop.f32.mrf.mxu1 }
 0x112   :  { %v385_v33 = vadd.f32 %v384_v60, %v4536_v20 }
 0x113   :  { %v386_v4 = vpop.f32.mrf.mxu1 }
 0x114   :  { %v387_v57 = vadd.f32 %v386_v4, %v4538_v47 }
 0x116   :  { %v483_v59 = vcombine.low %v385_v33, %v387_v57 }
 0x118   :  { %v490_v25 = vrot.slane %v483_v59, %v4530_v61 }
 0x11a   :  { %v492_v31 = vadd.f32 %v490_v25, %v479_v24 }
 0x11c   :  { %v2641_v58 = vmul.f32 -1.442695, %v492_v31 }
 0x11d   :  { %v2710_v19 = vpop.eup %2709 }
 0x11e   :  { %2711 = vpow2.f32 %v2641_v58  ;;  %v475_v62 = vadd.f32 1.0, %v2710_v19  ;;  %v246_v19 = vld [vmem:[%s7974_s0 + $0x8] sm:$0xf] }
 0x120   :  { %2713 = vrcp.f32 %v475_v62 }
 0x12b   :  { %v2712_v4 = vpop.eup %2711 }
 0x12c   :  { %v496_v57 = vadd.f32 1.0, %v2712_v4 }
 0x12d   :  { %v2714_v58 = vpop.eup %2713 }
 0x12e   :  { %2715 = vrcp.f32 %v496_v57  ;;  %v8806_v57 = vld [vmem:[#allocation69_spill] sm:$0xff] }
 0x13b   :  { %v2716_v22 = vpop.eup %2715 }
 0x13c   :  { %v513_v41 = vsub.f32 1.0, %v2716_v22  ;;  %v515_v62 = vmul.f32 0.0, %v2716_v22  ;;  %v4596_v22 = vld [vmem:[%s7975_s1 + $0x270] sm:$0xff] }
 0x143   :  { %v455_v60 = vpop.f32.mrf.mxu0 }
 0x144   :  { %v456_v33 = vadd.f32 %v455_v60, %v4543_v53 }
 0x145   :  { %v457_v29 = vpop.f32.mrf.mxu0 }
 0x146   :  { %v458_v27 = vadd.f32 %v457_v29, %v4545_v51  ;;  %v8804_v29 = vld [vmem:[#allocation65_spill] sm:$0xff] }
 0x148   :  { %v501_v24 = vcombine.low %v456_v33, %v458_v27  ;;  %v8805_v33 = vld [vmem:[#allocation67_spill] sm:$0xff] }
 0x149   :  { %v4568_v27 = vld [vmem:[%s7975_s1 + $0x2d0] sm:$0xff] }
 0x14a   :  { %v508_v31 = vrot.slane %v501_v24, %v4530_v61  ;;  %v4575_v24 = vld [vmem:[%s7975_s1 + $0x2a8] sm:$0xff] }
 0x14c   :  { %v510_v55 = vmul.f32 %v2714_v58, %v508_v31  ;;  %v8807_v31 = vld [vmem:[#allocation71_spill] sm:$0xff]  ;;  %v4582_v58 = vld [vmem:[%s7975_s1 + $0x2a0] sm:$0xff] }
 0x14e   :  { %v511_v56 = vadd.f32 %v510_v55, %v246_v19  ;;  %v8808_v19 = vld [vmem:[#allocation73_spill] sm:$0xff]  ;;  %v4589_v55 = vld [vmem:[%s7975_s1 + $0x278] sm:$0xff] }
 0x150   :  { %2717 = vtanh.f32 %v511_v56  ;;  %v8809_v56 = vld [vmem:[#allocation75_spill] sm:$0xff] }
 0x15d   :  { %v2718_v59 = vpop.eup %2717 }
 0x15e   :  { %v514_v25 = vmul.f32 %v2718_v59, %v513_v41  ;;  %v8810_v41 = vld [vmem:[#allocation77_spill] sm:$0xff] }
 0x15f   :  { %v4603_v59 = vld [vmem:[%s7975_s1 + $0x248] sm:$0xff] }
 0x160   :  { %v4553_v49 = vadd.f32 %v515_v62, %v514_v25  ;;  %v8811_v25 = vld [vmem:[#allocation79_spill] sm:$0xff]  ;;  %v4610_v62 = vld [vmem:[%s7975_s1 + $0x240] sm:$0xff] }
 0x162   :  { %v4557_v60 = vrot.slane %v4553_v49, %v4530_v61 }
 0x164   :  { %v528_v4 = vcombine.high %v4557_v60, %v4557_v60 }
 0x166   :  { %595 = vmatprep.mubr.f32.mxu1 %v528_v4  ;;  %666 = vmatprep.mubr.f32.mxu0 %v528_v4 }
 0x167   :  { %596 = vmatmul.mubr.f32.vlgmr.msra.gmra.mxu1 %v4557_v60  ;;  %667 = vmatmul.mubr.f32.vlgmr.msra.gmra.mxu0 %v4557_v60 }
 0x168   :  { %674 = vmatpush1.msra.mxu1 %v8804_v29  ;;  %737 = vmatprep.mubr.f32.mxu1 %v528_v4  ;;  %v8812_v4 = vld [vmem:[#allocation81_spill] sm:$0xff]  ;;  %v4617_v29 = vld [vmem:[%s7975_s1 + $0x218] sm:$0xff] }
 0x169   :  { %675 = vmatprep.subr.mxu1 %v8805_v33  ;;  %816 = vmatpush1.msra.mxu0 %v4568_v27  ;;  %v8813_v33 = vld [vmem:[#allocation83_spill] sm:$0xff] }
 0x16a   :  { %676 = vmatpush1.msra.mxu1 %v8806_v57  ;;  %817 = vmatprep.subr.mxu0 %v4575_v24  ;;  %v4624_v57 = vld [vmem:[%s7975_s1 + $0x210] sm:$0xff] }
 0x16b   :  { %677 = vmatprep.subr.mxu1 %v8807_v31  ;;  %818 = vmatpush1.msra.mxu0 %v4582_v58  ;;  %v8814_v31 = vld [vmem:[#allocation85_spill] sm:$0xff] }
 0x16c   :  { %678 = vmatpush1.msra.mxu1 %v8808_v19  ;;  %819 = vmatprep.subr.mxu0 %v4589_v55  ;;  %v4631_v19 = vld [vmem:[%s7975_s1 + $0x1e8] sm:$0xff] }
 0x16d   :  { %679 = vmatprep.subr.mxu1 %v8809_v56  ;;  %820 = vmatpush1.msra.mxu0 %v4596_v22  ;;  %v8815_v56 = vld [vmem:[#allocation87_spill] sm:$0xff] }
 0x16e   :  { %680 = vmatpush1.msra.mxu1 %v8810_v41  ;;  %821 = vmatprep.subr.mxu0 %v4603_v59  ;;  %v4638_v41 = vld [vmem:[%s7975_s1 + $0x1e0] sm:$0xff] }
 0x16f   :  { %681 = vmatprep.subr.mxu1 %v8811_v25  ;;  %822 = vmatpush1.msra.mxu0 %v4610_v62  ;;  %8816 = vst [vmem:[#allocation6_spill] sm:$0xff] %v4638_v41  ;;  %v8817_v25 = vld [vmem:[#allocation89_spill] sm:$0xff] }
 0x170   :  { %682 = vmatpush1.msra.mxu1 %v8812_v4  ;;  %823 = vmatprep.subr.mxu0 %v4617_v29  ;;  %v4645_v4 = vld [vmem:[%s7975_s1 + $0x1b8] sm:$0xff] }
 0x171   :  { %683 = vmatprep.subr.mxu1 %v8813_v33  ;;  %824 = vmatpush1.msra.mxu0 %v4624_v57  ;;  %8818 = vst [vmem:[#allocation38_spill] sm:$0xff] %v4645_v4  ;;  %v8819_v33 = vld [vmem:[#allocation91_spill] sm:$0xff] }
 0x172   :  { %684 = vmatpush1.msra.mxu1 %v8814_v31  ;;  %825 = vmatprep.subr.mxu0 %v4631_v19  ;;  %v4652_v31 = vld [vmem:[%s7975_s1 + $0x1b0] sm:$0xff] }
 0x173   :  { %685 = vmatprep.subr.mxu1 %v8815_v56  ;;  %826 = vmatpush1.msra.mxu0 %v4638_v41  ;;  %8820 = vst [vmem:[#allocation7_spill] sm:$0xff] %v4652_v31  ;;  %v8821_v56 = vld [vmem:[#allocation93_spill] sm:$0xff]  ;;  %v8823_v41 = vld [vmem:[#allocation95_spill] sm:$0xff] }
 0x174   :  { %686 = vmatpush1.msra.mxu1 %v8817_v25  ;;  %827 = vmatprep.subr.mxu0 %v4645_v4  ;;  %v4659_v25 = vld [vmem:[%s7975_s1 + $0x188] sm:$0xff]  ;;  %v8825_v4 = vld [vmem:[#allocation96_spill] sm:$0xff] }
 0x175   :  { %687 = vmatprep.subr.mxu1 %v8819_v33  ;;  %828 = vmatpush1.msra.mxu0 %v4652_v31  ;;  %8822 = vst [vmem:[#allocation40_spill] sm:$0xff] %v4659_v25  ;;  %v4666_v33 = vld [vmem:[%s7975_s1 + $0x180] sm:$0xff] }
 0x176   :  { %688 = vmatpush1.msra.mxu1 %v8821_v56  ;;  %829 = vmatprep.subr.mxu0 %v4659_v25  ;;  %8824 = vst [vmem:[#allocation8_spill] sm:$0xff] %v4666_v33  ;;  %v4673_v56 = vld [vmem:[%s7975_s1 + $0x158] sm:$0xff]  ;;  %v8827_v31 = vld [vmem:[#allocation97_spill] sm:$0xff] }
 0x177   :  { %689 = vmatprep.subr.mxu1 %v8823_v41  ;;  %830 = vmatpush1.msra.mxu0 %v4666_v33  ;;  %8826 = vst [vmem:[#allocation42_spill] sm:$0xff] %v4673_v56  ;;  %v4680_v41 = vld [vmem:[%s7975_s1 + $0x150] sm:$0xff] }
 0x178   :  { %690 = vmatpush1.msra.mxu1 %v8825_v4  ;;  %831 = vmatprep.subr.mxu0 %v4673_v56  ;;  %8828 = vst [vmem:[#allocation9_spill] sm:$0xff] %v4680_v41  ;;  %v4687_v4 = vld [vmem:[%s7975_s1 + $0x128] sm:$0xff] }
 0x179   :  { %691 = vmatprep.subr.mxu1 %v8827_v31  ;;  %832 = vmatpush1.msra.mxu0 %v4680_v41  ;;  %8829 = vst [vmem:[#allocation44_spill] sm:$0xff] %v4687_v4  ;;  %v4694_v31 = vld [vmem:[%s7975_s1 + $0x120] sm:$0xff] }
 0x17a   :  { %692 = vmatpush1.msra.mxu1 %v4114_v45  ;;  %833 = vmatprep.subr.mxu0 %v4687_v4  ;;  %8830 = vst [vmem:[#allocation10_spill] sm:$0xff] %v4694_v31  ;;  %v4701_v45 = vld [vmem:[%s7975_s1 + $0xf8] sm:$0xff] }
 0x17b   :  { %693 = vmatprep.subr.mxu1 %v4121_v39  ;;  %834 = vmatpush1.msra.mxu0 %v4694_v31  ;;  %8831 = vst [vmem:[#allocation46_spill] sm:$0xff] %v4701_v45  ;;  %v4708_v39 = vld [vmem:[%s7975_s1 + $0xf0] sm:$0xff] }
 0x17c   :  { %694 = vmatpush1.msra.mxu1 %v4128_v37  ;;  %835 = vmatprep.subr.mxu0 %v4701_v45  ;;  %8832 = vst [vmem:[#allocation11_spill] sm:$0xff] %v4708_v39  ;;  %v4715_v37 = vld [vmem:[%s7975_s1 + $0xc8] sm:$0xff] }
 0x17d   :  { %695 = vmatprep.subr.mxu1 %v4135_v35  ;;  %836 = vmatpush1.msra.mxu0 %v4708_v39  ;;  %8833 = vst [vmem:[#allocation48_spill] sm:$0xff] %v4715_v37  ;;  %v4722_v35 = vld [vmem:[%s7975_s1 + $0xc0] sm:$0xff] }
 0x17e   :  { %696 = vmatpush1.msra.mxu1 %v4142_v43  ;;  %837 = vmatprep.subr.mxu0 %v4715_v37  ;;  %8834 = vst [vmem:[#allocation12_spill] sm:$0xff] %v4722_v35  ;;  %v4729_v43 = vld [vmem:[%s7975_s1 + $0x98] sm:$0xff] }
 0x17f   :  { %697 = vmatprep.subr.mxu1 %v4149_v0  ;;  %838 = vmatpush1.msra.mxu0 %v4722_v35  ;;  %8835 = vst [vmem:[#allocation13_spill] sm:$0xff] %v4729_v43  ;;  %v4736_v0 = vld [vmem:[%s7975_s1 + $0x90] sm:$0xff] }
 0x180   :  { %698 = vmatpush1.msra.mxu1 %v4156_v1  ;;  %839 = vmatprep.subr.mxu0 %v4729_v43  ;;  %8836 = vst [vmem:[#allocation14_spill] sm:$0xff] %v4736_v0  ;;  %v4743_v1 = vld [vmem:[%s7975_s1 + $0x68] sm:$0xff] }
 0x181   :  { %699 = vmatprep.subr.mxu1 %v4163_v2  ;;  %840 = vmatpush1.msra.mxu0 %v4736_v0  ;;  %8837 = vst [vmem:[#allocation15_spill] sm:$0xff] %v4743_v1  ;;  %v4750_v2 = vld [vmem:[%s7975_s1 + $0x60] sm:$0xff] }
 0x182   :  { %700 = vmatpush1.msra.mxu1 %v4170_v3  ;;  %841 = vmatprep.subr.mxu0 %v4743_v1  ;;  %8838 = vst [vmem:[#allocation16_spill] sm:$0xff] %v4750_v2  ;;  %v4757_v3 = vld [vmem:[%s7975_s1 + $0x38] sm:$0xff] }
 0x183   :  { %701 = vmatprep.subr.mxu1 %v4177_v5  ;;  %842 = vmatpush1.msra.mxu0 %v4750_v2  ;;  %8839 = vst [vmem:[#allocation17_spill] sm:$0xff] %v4757_v3  ;;  %v4764_v5 = vld [vmem:[%s7975_s1 + $0x30] sm:$0xff] }
 0x184   :  { %702 = vmatpush1.msra.mxu1 %v4184_v6  ;;  %843 = vmatprep.subr.mxu0 %v4757_v3  ;;  %8840 = vst [vmem:[#allocation18_spill] sm:$0xff] %v4764_v5  ;;  %v4771_v6 = vld [vmem:[%s7975_s1 + $0x8] sm:$0xff] }
 0x185   :  { %703 = vmatprep.subr.mxu1 %v4191_v7  ;;  %844 = vmatpush1.msra.mxu0 %v4764_v5  ;;  %8841 = vst [vmem:[#allocation19_spill] sm:$0xff] %v4771_v6  ;;  %v4778_v7 = vld [vmem:[%s7975_s1] sm:$0xff] }
 0x186   :  { %704 = vmatpush1.msra.mxu1 %v4198_v8  ;;  %845 = vmatprep.subr.mxu0 %v4771_v6  ;;  %8842 = vst [vmem:[#allocation20_spill] sm:$0xff] %v4778_v7  ;;  %v4785_v8 = vld [vmem:[%s7975_s1 + $0x5d8] sm:$0xff] }
 0x187   :  { %705 = vmatprep.subr.mxu1 %v4205_v9  ;;  %846 = vmatpush1.msra.mxu0 %v4778_v7  ;;  %8843 = vst [vmem:[#allocation21_spill] sm:$0xff] %v4785_v8  ;;  %v4792_v9 = vld [vmem:[%s7975_s1 + $0x5d0] sm:$0xff] }
 0x188   :  { %706 = vmatpush2.msra.mxu1 %v4212_v10  ;;  %847 = vmatprep.subr.mxu0 %v4785_v8  ;;  %8844 = vst [vmem:[#allocation22_spill] sm:$0xff] %v4792_v9  ;;  %v4799_v10 = vld [vmem:[%s7975_s1 + $0x5a8] sm:$0xff] }
 0x189   :  { %707 = vmatprep.subr.mxu1 %v4219_v11  ;;  %848 = vmatpush2.msra.mxu0 %v4792_v9  ;;  %8845 = vst [vmem:[#allocation23_spill] sm:$0xff] %v4799_v10  ;;  %v4806_v11 = vld [vmem:[%s7975_s1 + $0x5a0] sm:$0xff] }
 0x18a   :  { %708 = vmatpush2.msra.mxu1 %v4226_v12  ;;  %849 = vmatprep.subr.mxu0 %v4799_v10  ;;  %8846 = vst [vmem:[#allocation24_spill] sm:$0xff] %v4806_v11  ;;  %v4813_v12 = vld [vmem:[%s7975_s1 + $0x578] sm:$0xff] }
 0x18b   :  { %709 = vmatprep.subr.mxu1 %v4233_v13  ;;  %850 = vmatpush2.msra.mxu0 %v4806_v11  ;;  %8847 = vst [vmem:[#allocation25_spill] sm:$0xff] %v4813_v12  ;;  %v4820_v13 = vld [vmem:[%s7975_s1 + $0x570] sm:$0xff] }
 0x18c   :  { %710 = vmatpush2.msra.mxu1 %v4240_v14  ;;  %851 = vmatprep.subr.mxu0 %v4813_v12  ;;  %8848 = vst [vmem:[#allocation26_spill] sm:$0xff] %v4820_v13  ;;  %v4827_v14 = vld [vmem:[%s7975_s1 + $0x548] sm:$0xff] }
 0x18d   :  { %711 = vmatprep.subr.mxu1 %v4247_v15  ;;  %852 = vmatpush2.msra.mxu0 %v4820_v13  ;;  %8849 = vst [vmem:[#allocation27_spill] sm:$0xff] %v4827_v14  ;;  %v4834_v15 = vld [vmem:[%s7975_s1 + $0x540] sm:$0xff] }
 0x18e   :  { %712 = vmatpush2.msra.mxu1 %v4254_v16  ;;  %853 = vmatprep.subr.mxu0 %v4827_v14  ;;  %8850 = vst [vmem:[#allocation28_spill] sm:$0xff] %v4834_v15  ;;  %v4841_v16 = vld [vmem:[%s7975_s1 + $0x518] sm:$0xff] }
 0x18f   :  { %713 = vmatprep.subr.mxu1 %v4261_v17  ;;  %854 = vmatpush2.msra.mxu0 %v4834_v15  ;;  %8851 = vst [vmem:[#allocation29_spill] sm:$0xff] %v4841_v16  ;;  %v4848_v17 = vld [vmem:[%s7975_s1 + $0x510] sm:$0xff] }
 0x190   :  { %714 = vmatpush2.msra.mxu1 %v4268_v18  ;;  %855 = vmatprep.subr.mxu0 %v4841_v16  ;;  %8852 = vst [vmem:[#allocation30_spill] sm:$0xff] %v4848_v17  ;;  %v4855_v18 = vld [vmem:[%s7975_s1 + $0x4e8] sm:$0xff] }
 0x191   :  { %715 = vmatprep.subr.mxu1 %v4275_v21  ;;  %856 = vmatpush2.msra.mxu0 %v4848_v17  ;;  %8853 = vst [vmem:[#allocation31_spill] sm:$0xff] %v4855_v18  ;;  %v4862_v21 = vld [vmem:[%s7975_s1 + $0x4e0] sm:$0xff] }
 0x192   :  { %716 = vmatpush2.msra.mxu1 %v4282_v23  ;;  %857 = vmatprep.subr.mxu0 %v4855_v18  ;;  %8854 = vst [vmem:[#allocation32_spill] sm:$0xff] %v4862_v21  ;;  %v4869_v23 = vld [vmem:[%s7975_s1 + $0x4b8] sm:$0xff] }
 0x193   :  { %717 = vmatprep.subr.mxu1 %v4289_v26  ;;  %858 = vmatpush2.msra.mxu0 %v4862_v21  ;;  %8855 = vst [vmem:[#allocation33_spill] sm:$0xff] %v4869_v23  ;;  %v4876_v26 = vld [vmem:[%s7975_s1 + $0x4b0] sm:$0xff] }
 0x194   :  { %718 = vmatpush2.msra.mxu1 %v4296_v28  ;;  %859 = vmatprep.subr.mxu0 %v4869_v23  ;;  %8856 = vst [vmem:[#allocation35_spill] sm:$0xff] %v4876_v26  ;;  %v4883_v28 = vld [vmem:[%s7975_s1 + $0x488] sm:$0xff] }
 0x195   :  { %719 = vmatprep.subr.mxu1 %v4303_v30  ;;  %860 = vmatpush2.msra.mxu0 %v4876_v26  ;;  %8857 = vst [vmem:[#allocation37_spill] sm:$0xff] %v4883_v28  ;;  %v4890_v30 = vld [vmem:[%s7975_s1 + $0x480] sm:$0xff] }
 0x196   :  { %720 = vmatpush2.msra.mxu1 %v4310_v32  ;;  %861 = vmatprep.subr.mxu0 %v4883_v28  ;;  %8858 = vst [vmem:[#allocation39_spill] sm:$0xff] %v4890_v30  ;;  %v4897_v32 = vld [vmem:[%s7975_s1 + $0x458] sm:$0xff] }
 0x197   :  { %721 = vmatprep.subr.mxu1 %v4317_v34  ;;  %862 = vmatpush2.msra.mxu0 %v4890_v30  ;;  %8859 = vst [vmem:[#allocation41_spill] sm:$0xff] %v4897_v32  ;;  %v4904_v34 = vld [vmem:[%s7975_s1 + $0x450] sm:$0xff] }
 0x198   :  { %722 = vmatpush2.msra.mxu1 %v4324_v36  ;;  %863 = vmatprep.subr.mxu0 %v4897_v32  ;;  %8860 = vst [vmem:[#allocation43_spill] sm:$0xff] %v4904_v34  ;;  %v4911_v36 = vld [vmem:[%s7975_s1 + $0x428] sm:$0xff] }
 0x199   :  { %723 = vmatprep.subr.mxu1 %v4331_v38  ;;  %864 = vmatpush2.msra.mxu0 %v4904_v34  ;;  %8861 = vst [vmem:[#allocation45_spill] sm:$0xff] %v4911_v36  ;;  %v4918_v38 = vld [vmem:[%s7975_s1 + $0x420] sm:$0xff] }
 0x19a   :  { %724 = vmatpush2.msra.mxu1 %v4338_v40  ;;  %865 = vmatprep.subr.mxu0 %v4911_v36  ;;  %8862 = vst [vmem:[#allocation47_spill] sm:$0xff] %v4918_v38  ;;  %v4925_v40 = vld [vmem:[%s7975_s1 + $0x3f8] sm:$0xff]  ;;  %v8946_v34 = vld [vmem:[#allocation5_spill] sm:$0xff] }
 0x19b   :  { %725 = vmatprep.subr.mxu1 %v4345_v42  ;;  %866 = vmatpush2.msra.mxu0 %v4918_v38  ;;  %8863 = vst [vmem:[#allocation49_spill] sm:$0xff] %v4925_v40  ;;  %v4932_v42 = vld [vmem:[%s7975_s1 + $0x3f0] sm:$0xff]  ;;  %v8872_v38 = vld [vmem:[#allocation100_spill] sm:$0xff] }
 0x19c   :  { %726 = vmatpush2.msra.mxu1 %v4352_v44  ;;  %867 = vmatprep.subr.mxu0 %v4925_v40  ;;  %8864 = vst [vmem:[#allocation51_spill] sm:$0xff] %v4932_v42  ;;  %v4939_v44 = vld [vmem:[%s7975_s1 + $0x3c8] sm:$0xff]  ;;  %v8873_v36 = vld [vmem:[#allocation56_spill] sm:$0xff] }
 0x19d   :  { %727 = vmatprep.subr.mxu1 %v4359_v46  ;;  %868 = vmatpush2.msra.mxu0 %v4932_v42  ;;  %8865 = vst [vmem:[#allocation53_spill] sm:$0xff] %v4939_v44  ;;  %v4946_v46 = vld [vmem:[%s7975_s1 + $0x3c0] sm:$0xff]  ;;  %v8868_v42 = vld [vmem:[#allocation98_spill] sm:$0xff] }
 0x19e   :  { %728 = vmatpush2.msra.mxu1 %v4366_v48  ;;  %869 = vmatprep.subr.mxu0 %v4939_v44  ;;  %8866 = vst [vmem:[#allocation55_spill] sm:$0xff] %v4946_v46  ;;  %v8867_v48 = vld [vmem:[#allocation50_spill] sm:$0xff]  ;;  %v8869_v44 = vld [vmem:[#allocation52_spill] sm:$0xff] }
 0x19f   :  { %729 = vmatprep.subr.mxu1 %v4373_v50  ;;  %870 = vmatpush2.msra.mxu0 %v4946_v46  ;;  %v8870_v50 = vld [vmem:[#allocation99_spill] sm:$0xff]  ;;  %v8871_v40 = vld [vmem:[#allocation54_spill] sm:$0xff]  ;;  %v8874_v46 = vld [vmem:[#allocation101_spill] sm:$0xff] }
 0x1a0   :  { %730 = vmatpush2.msra.mxu1 %v4380_v52  ;;  %871 = vmatprep.subr.mxu0 %v8744_v63  ;;  %v8875_v52 = vld [vmem:[#allocation58_spill] sm:$0xff] }
 0x1a1   :  { %731 = vmatprep.subr.mxu1 %v4387_v54  ;;  %872 = vmatpush2.msra.mxu0 %v8867_v48  ;;  %v8876_v63 = vld [vmem:[#allocation102_spill] sm:$0xff]  ;;  %v8877_v54 = vld [vmem:[#allocation60_spill] sm:$0xff] }
 0x1a2   :  { %732 = vmatpush2.msra.mxu1 %v8868_v42  ;;  %873 = vmatprep.subr.mxu0 %v8869_v44  ;;  %v4967_v42 = vld [vmem:[%s7975_s1 + $0x2e8] sm:$0xff]  ;;  %v4987_v44 = vld [vmem:[%s7975_s1 + $0x2b0] sm:$0xff]  ;;  %v4999_v48 = vld [vmem:[%s7975_s1 + $0x280] sm:$0xff] }
 0x1a3   :  { %733 = vmatprep.subr.mxu1 %v8870_v50  ;;  %874 = vmatpush2.msra.mxu0 %v8871_v40  ;;  %8878 = vst [vmem:[#allocation57_spill] sm:$0xff] %v4967_v42  ;;  %v8882_v40 = vld [vmem:[#allocation64_spill] sm:$0xff]  ;;  %8883 = vst [vmem:[#allocation63_spill] sm:$0xff] %v4987_v44 }
 0x1a4   :  { %734 = vmatpush2.msra.mxu1 %v8872_v38  ;;  %875 = vmatprep.subr.mxu0 %v8873_v36  ;;  %v4973_v36 = vld [vmem:[%s7975_s1 + $0x2e0] sm:$0xff]  ;;  %v8880_v38 = vld [vmem:[#allocation62_spill] sm:$0xff]  ;;  %8885 = vst [vmem:[#allocation68_spill] sm:$0xff] %v4999_v48  ;;  %v5005_v50 = vld [vmem:[%s7975_s1 + $0x258] sm:$0xff] }
 0x1a5   :  { %735 = vmatprep.subr.mxu1 %v8874_v46  ;;  %876 = vmatpush2.msra.mxu0 %v8875_v52  ;;  %8879 = vst [vmem:[#allocation59_spill] sm:$0xff] %v4973_v36  ;;  %v4993_v46 = vld [vmem:[%s7975_s1 + $0x288] sm:$0xff]  ;;  %8886 = vst [vmem:[#allocation70_spill] sm:$0xff] %v5005_v50  ;;  %v5011_v52 = vld [vmem:[%s7975_s1 + $0x250] sm:$0xff] }
 0x1a6   :  { %736 = vmatpush2.msra.mxu1 %v8876_v63  ;;  %877 = vmatprep.subr.mxu0 %v8877_v54  ;;  %8884 = vst [vmem:[#allocation66_spill] sm:$0xff] %v4993_v46  ;;  %8887 = vst [vmem:[#allocation72_spill] sm:$0xff] %v5011_v52  ;;  %v5017_v63 = vld [vmem:[%s7975_s1 + $0x228] sm:$0xff]  ;;  %v5023_v54 = vld [vmem:[%s7975_s1 + $0x220] sm:$0xff] }
 0x1a7   :  { %738 = vmatmul.mubr.f32.vlgmr.msra.gmra.mxu1 %v4557_v60  ;;  %886 = vmatprep.subr.mxu1 %v4967_v42  ;;  %v4980_v60 = vld [vmem:[%s7975_s1 + $0x2b8] sm:$0xff]  ;;  %8888 = vst [vmem:[#allocation74_spill] sm:$0xff] %v5017_v63  ;;  %8889 = vst [vmem:[#allocation76_spill] sm:$0xff] %v5023_v54 }
 0x1a8   :  { %887 = vmatpush1.msra.mxu1 %v4973_v36  ;;  %878 = vmatpush2.msra.mxu0 %v8880_v38  ;;  %8881 = vst [vmem:[#allocation61_spill] sm:$0xff] %v4980_v60  ;;  %v5029_v38 = vld [vmem:[%s7975_s1 + $0x1f8] sm:$0xff] }
 0x1a9   :  { %888 = vmatprep.subr.mxu1 %v4980_v60  ;;  %957 = vmatprep.subr.mxu0 %v8882_v40  ;;  %8890 = vst [vmem:[#allocation78_spill] sm:$0xff] %v5029_v38  ;;  %v5035_v40 = vld [vmem:[%s7975_s1 + $0x1f0] sm:$0xff]  ;;  %v8945_v36 = vld [vmem:[#allocation36_spill] sm:$0xff] }
 0x1aa   :  { %889 = vmatpush1.msra.mxu1 %v4987_v44  ;;  %8891 = vst [vmem:[#allocation80_spill] sm:$0xff] %v5035_v40 }
 0x1ab   :  { %890 = vmatprep.subr.mxu1 %v4993_v46  ;;  %v8943_v46 = vld [vmem:[#allocation94_spill] sm:$0xff] }
 0x1ac   :  { %891 = vmatpush1.msra.mxu1 %v4999_v48  ;;  %v8942_v48 = vld [vmem:[#allocation92_spill] sm:$0xff] }
 0x1ad   :  { %892 = vmatprep.subr.mxu1 %v5005_v50  ;;  %v8940_v50 = vld [vmem:[#allocation88_spill] sm:$0xff] }
 0x1ae   :  { %893 = vmatpush1.msra.mxu1 %v5011_v52  ;;  %v8939_v52 = vld [vmem:[#allocation86_spill] sm:$0xff] }
 0x1af   :  { %894 = vmatprep.subr.mxu1 %v5017_v63  ;;  %v5041_v63 = vld [vmem:[%s7975_s1 + $0x1c8] sm:$0xff] }
 0x1b0   :  { %895 = vmatpush1.msra.mxu1 %v5023_v54  ;;  %8892 = vst [vmem:[#allocation82_spill] sm:$0xff] %v5041_v63  ;;  %v5047_v54 = vld [vmem:[%s7975_s1 + $0x1c0] sm:$0xff] }
 0x1b1   :  { %896 = vmatprep.subr.mxu1 %v5029_v38  ;;  %8893 = vst [vmem:[#allocation65_spill] sm:$0xff] %v5047_v54  ;;  %v5053_v38 = vld [vmem:[%s7975_s1 + $0x198] sm:$0xff] }
 0x1b2   :  { %897 = vmatpush1.msra.mxu1 %v5035_v40  ;;  %8894 = vst [vmem:[#allocation67_spill] sm:$0xff] %v5053_v38  ;;  %v5059_v40 = vld [vmem:[%s7975_s1 + $0x190] sm:$0xff] }
 0x1b3   :  { %898 = vmatprep.subr.mxu1 %v5041_v63  ;;  %8895 = vst [vmem:[#allocation69_spill] sm:$0xff] %v5059_v40  ;;  %v5065_v63 = vld [vmem:[%s7975_s1 + $0x168] sm:$0xff] }
 0x1b4   :  { %899 = vmatpush1.msra.mxu1 %v5047_v54  ;;  %8896 = vst [vmem:[#allocation71_spill] sm:$0xff] %v5065_v63  ;;  %v5071_v54 = vld [vmem:[%s7975_s1 + $0x160] sm:$0xff] }
 0x1b5   :  { %900 = vmatprep.subr.mxu1 %v5053_v38  ;;  %8897 = vst [vmem:[#allocation73_spill] sm:$0xff] %v5071_v54  ;;  %v5077_v38 = vld [vmem:[%s7975_s1 + $0x138] sm:$0xff] }
 0x1b6   :  { %901 = vmatpush1.msra.mxu1 %v5059_v40  ;;  %8898 = vst [vmem:[#allocation75_spill] sm:$0xff] %v5077_v38  ;;  %v5083_v40 = vld [vmem:[%s7975_s1 + $0x130] sm:$0xff] }
 0x1b7   :  { %902 = vmatprep.subr.mxu1 %v5065_v63  ;;  %8899 = vst [vmem:[#allocation77_spill] sm:$0xff] %v5083_v40  ;;  %v5089_v63 = vld [vmem:[%s7975_s1 + $0x108] sm:$0xff] }
 0x1b8   :  { %903 = vmatpush1.msra.mxu1 %v5071_v54  ;;  %8900 = vst [vmem:[#allocation79_spill] sm:$0xff] %v5089_v63  ;;  %v5095_v54 = vld [vmem:[%s7975_s1 + $0x100] sm:$0xff] }
 0x1b9   :  { %904 = vmatprep.subr.mxu1 %v5077_v38  ;;  %8901 = vst [vmem:[#allocation81_spill] sm:$0xff] %v5095_v54  ;;  %v5101_v38 = vld [vmem:[%s7975_s1 + $0xd8] sm:$0xff] }
 0x1ba   :  { %905 = vmatpush1.msra.mxu1 %v5083_v40  ;;  %8902 = vst [vmem:[#allocation83_spill] sm:$0xff] %v5101_v38  ;;  %v5107_v40 = vld [vmem:[%s7975_s1 + $0xd0] sm:$0xff] }
 0x1bb   :  { %906 = vmatprep.subr.mxu1 %v5089_v63  ;;  %8903 = vst [vmem:[#allocation85_spill] sm:$0xff] %v5107_v40  ;;  %v5113_v63 = vld [vmem:[%s7975_s1 + $0xa8] sm:$0xff] }
 0x1bc   :  { %907 = vmatpush1.msra.mxu1 %v5095_v54  ;;  %8904 = vst [vmem:[#allocation87_spill] sm:$0xff] %v5113_v63  ;;  %v5119_v54 = vld [vmem:[%s7975_s1 + $0xa0] sm:$0xff] }
 0x1bd   :  { %908 = vmatprep.subr.mxu1 %v5101_v38  ;;  %8905 = vst [vmem:[#allocation89_spill] sm:$0xff] %v5119_v54  ;;  %v5125_v38 = vld [vmem:[%s7975_s1 + $0x78] sm:$0xff] }
 0x1be   :  { %909 = vmatpush1.msra.mxu1 %v5107_v40  ;;  %8906 = vst [vmem:[#allocation91_spill] sm:$0xff] %v5125_v38  ;;  %v5131_v40 = vld [vmem:[%s7975_s1 + $0x70] sm:$0xff] }
 0x1bf   :  { %910 = vmatprep.subr.mxu1 %v5113_v63  ;;  %8907 = vst [vmem:[#allocation93_spill] sm:$0xff] %v5131_v40  ;;  %v5137_v63 = vld [vmem:[%s7975_s1 + $0x48] sm:$0xff] }
 0x1c0   :  { %911 = vmatpush1.msra.mxu1 %v5119_v54  ;;  %8908 = vst [vmem:[#allocation95_spill] sm:$0xff] %v5137_v63  ;;  %v5143_v54 = vld [vmem:[%s7975_s1 + $0x40] sm:$0xff] }
 0x1c1   :  { %912 = vmatprep.subr.mxu1 %v5125_v38  ;;  %8909 = vst [vmem:[#allocation96_spill] sm:$0xff] %v5143_v54  ;;  %v5149_v38 = vld [vmem:[%s7975_s1 + $0x18] sm:$0xff] }
 0x1c2   :  { %913 = vmatpush1.msra.mxu1 %v5131_v40  ;;  %8910 = vst [vmem:[#allocation97_spill] sm:$0xff] %v5149_v38  ;;  %v5155_v40 = vld [vmem:[%s7975_s1 + $0x10] sm:$0xff] }
 0x1c3   :  { %914 = vmatprep.subr.mxu1 %v5137_v63  ;;  %8911 = vst [vmem:[#allocation50_spill] sm:$0xff] %v5155_v40  ;;  %v5161_v63 = vld [vmem:[%s7975_s1 + $0x5e8] sm:$0xff] }
 0x1c4   :  { %915 = vmatpush1.msra.mxu1 %v5143_v54  ;;  %8912 = vst [vmem:[#allocation98_spill] sm:$0xff] %v5161_v63  ;;  %v5167_v54 = vld [vmem:[%s7975_s1 + $0x5e0] sm:$0xff] }
 0x1c5   :  { %916 = vmatprep.subr.mxu1 %v5149_v38  ;;  %8913 = vst [vmem:[#allocation52_spill] sm:$0xff] %v5167_v54  ;;  %v5173_v38 = vld [vmem:[%s7975_s1 + $0x5b8] sm:$0xff] }
 0x1c6   :  { %917 = vmatpush1.msra.mxu1 %v5155_v40  ;;  %8914 = vst [vmem:[#allocation99_spill] sm:$0xff] %v5173_v38  ;;  %v5179_v40 = vld [vmem:[%s7975_s1 + $0x5b0] sm:$0xff] }
 0x1c7   :  { %918 = vmatprep.subr.mxu1 %v5161_v63  ;;  %8915 = vst [vmem:[#allocation54_spill] sm:$0xff] %v5179_v40  ;;  %v5185_v63 = vld [vmem:[%s7975_s1 + $0x588] sm:$0xff] }
 0x1c8   :  { %919 = vmatpush2.msra.mxu1 %v5167_v54  ;;  %8916 = vst [vmem:[#allocation100_spill] sm:$0xff] %v5185_v63  ;;  %v5191_v54 = vld [vmem:[%s7975_s1 + $0x580] sm:$0xff] }
 0x1c9   :  { %920 = vmatprep.subr.mxu1 %v5173_v38  ;;  %8917 = vst [vmem:[#allocation56_spill] sm:$0xff] %v5191_v54  ;;  %v5197_v38 = vld [vmem:[%s7975_s1 + $0x558] sm:$0xff] }
 0x1ca   :  { %921 = vmatpush2.msra.mxu1 %v5179_v40  ;;  %8918 = vst [vmem:[#allocation101_spill] sm:$0xff] %v5197_v38  ;;  %v5203_v40 = vld [vmem:[%s7975_s1 + $0x550] sm:$0xff] }
 0x1cb   :  { %922 = vmatprep.subr.mxu1 %v5185_v63  ;;  %8919 = vst [vmem:[#allocation58_spill] sm:$0xff] %v5203_v40  ;;  %v5209_v63 = vld [vmem:[%s7975_s1 + $0x528] sm:$0xff] }
 0x1cc   :  { %923 = vmatpush2.msra.mxu1 %v5191_v54  ;;  %8920 = vst [vmem:[#allocation102_spill] sm:$0xff] %v5209_v63  ;;  %v5215_v54 = vld [vmem:[%s7975_s1 + $0x520] sm:$0xff] }
 0x1cd   :  { %924 = vmatprep.subr.mxu1 %v5197_v38  ;;  %8921 = vst [vmem:[#allocation60_spill] sm:$0xff] %v5215_v54  ;;  %v5221_v38 = vld [vmem:[%s7975_s1 + $0x4f8] sm:$0xff] }
 0x1ce   :  { %925 = vmatpush2.msra.mxu1 %v5203_v40  ;;  %8922 = vst [vmem:[#allocation62_spill] sm:$0xff] %v5221_v38  ;;  %v5227_v40 = vld [vmem:[%s7975_s1 + $0x4f0] sm:$0xff] }
 0x1cf   :  { %926 = vmatprep.subr.mxu1 %v5209_v63  ;;  %8923 = vst [vmem:[#allocation64_spill] sm:$0xff] %v5227_v40  ;;  %v5233_v63 = vld [vmem:[%s7975_s1 + $0x4c8] sm:$0xff] }
 0x1d0   :  { %927 = vmatpush2.msra.mxu1 %v5215_v54  ;;  %8924 = vst [vmem:[#allocation103_spill] sm:$0xff] %v5233_v63  ;;  %v5239_v54 = vld [vmem:[%s7975_s1 + $0x4c0] sm:$0xff] }
 0x1d1   :  { %928 = vmatprep.subr.mxu1 %v5221_v38  ;;  %8925 = vst [vmem:[#allocation104_spill] sm:$0xff] %v5239_v54  ;;  %v5245_v38 = vld [vmem:[%s7975_s1 + $0x498] sm:$0xff] }
 0x1d2   :  { %929 = vmatpush2.msra.mxu1 %v5227_v40  ;;  %8926 = vst [vmem:[#allocation105_spill] sm:$0xff] %v5245_v38  ;;  %v5251_v40 = vld [vmem:[%s7975_s1 + $0x490] sm:$0xff] }
 0x1d3   :  { %930 = vmatprep.subr.mxu1 %v5233_v63  ;;  %8927 = vst [vmem:[#allocation106_spill] sm:$0xff] %v5251_v40  ;;  %v5257_v63 = vld [vmem:[%s7975_s1 + $0x468] sm:$0xff] }
 0x1d4   :  { %931 = vmatpush2.msra.mxu1 %v5239_v54  ;;  %8928 = vst [vmem:[#allocation107_spill] sm:$0xff] %v5257_v63  ;;  %v5263_v54 = vld [vmem:[%s7975_s1 + $0x460] sm:$0xff] }
 0x1d5   :  { %932 = vmatprep.subr.mxu1 %v5245_v38  ;;  %8929 = vst [vmem:[#allocation108_spill] sm:$0xff] %v5263_v54  ;;  %v5269_v38 = vld [vmem:[%s7975_s1 + $0x438] sm:$0xff] }
 0x1d6   :  { %933 = vmatpush2.msra.mxu1 %v5251_v40  ;;  %8930 = vst [vmem:[#allocation109_spill] sm:$0xff] %v5269_v38  ;;  %v5275_v40 = vld [vmem:[%s7975_s1 + $0x430] sm:$0xff] }
 0x1d7   :  { %934 = vmatprep.subr.mxu1 %v5257_v63  ;;  %8931 = vst [vmem:[#allocation110_spill] sm:$0xff] %v5275_v40  ;;  %v5281_v63 = vld [vmem:[%s7975_s1 + $0x408] sm:$0xff] }
 0x1d8   :  { %935 = vmatpush2.msra.mxu1 %v5263_v54  ;;  %8932 = vst [vmem:[#allocation111_spill] sm:$0xff] %v5281_v63  ;;  %v5287_v54 = vld [vmem:[%s7975_s1 + $0x400] sm:$0xff] }
 0x1d9   :  { %936 = vmatprep.subr.mxu1 %v5269_v38  ;;  %8933 = vst [vmem:[#allocation112_spill] sm:$0xff] %v5287_v54  ;;  %v5293_v38 = vld [vmem:[%s7975_s1 + $0x3d8] sm:$0xff] }
 0x1da   :  { %937 = vmatpush2.msra.mxu1 %v5275_v40  ;;  %8934 = vst [vmem:[#allocation113_spill] sm:$0xff] %v5293_v38  ;;  %v5299_v40 = vld [vmem:[%s7975_s1 + $0x3d0] sm:$0xff] }
 0x1db   :  { %938 = vmatprep.subr.mxu1 %v5281_v63  ;;  %8935 = vst [vmem:[#allocation114_spill] sm:$0xff] %v5299_v40  ;;  %v5305_v63 = vld [vmem:[%s7975_s1 + $0x3a8] sm:$0xff] }
 0x1dc   :  { %939 = vmatpush2.msra.mxu1 %v5287_v54  ;;  %8936 = vst [vmem:[#allocation115_spill] sm:$0xff] %v5305_v63  ;;  %v5311_v54 = vld [vmem:[%s7975_s1 + $0x3a0] sm:$0xff] }
 0x1dd   :  { %940 = vmatprep.subr.mxu1 %v5293_v38  ;;  %8937 = vst [vmem:[#allocation116_spill] sm:$0xff] %v5311_v54  ;;  %v8938_v38 = vld [vmem:[#allocation84_spill] sm:$0xff] }
 0x1de   :  { %941 = vmatpush2.msra.mxu1 %v5299_v40  ;;  %v8941_v40 = vld [vmem:[#allocation90_spill] sm:$0xff] }
 0x1df   :  { %942 = vmatprep.subr.mxu1 %v5305_v63  ;;  %v8944_v63 = vld [vmem:[#allocation34_spill] sm:$0xff] }
 0x1e0   :  { %943 = vmatpush2.msra.mxu1 %v5311_v54 }
 0x1e1   :  { %944 = vmatprep.subr.mxu1 %v8938_v38 }
 0x1e2   :  { %945 = vmatpush2.msra.mxu1 %v8939_v52 }
 0x1e3   :  { %946 = vmatprep.subr.mxu1 %v8940_v50  ;;  %v2642_v50 = vld [vmem:[%s7974_s0 + $0xc] sm:$0xff] }
 0x1e4   :  { %947 = vmatpush2.msra.mxu1 %v8941_v40 }
 0x1e5   :  { %948 = vmatprep.subr.mxu1 %v8942_v48 }
 0x1e6   :  { %949 = vmatpush2.msra.mxu1 %v8943_v46 }
 0x1e7   :  { %1099 = vmatprep.subr.mxu1 %v8944_v63 }
 0x227   :  { %v597_v44 = vpop.f32.mrf.mxu1  ;;  %v668_v38 = vpop.f32.mrf.mxu0 }
 0x228   :  { %v598_v54 = vadd.f32 %v597_v44, %v8946_v34  ;;  %v669_v63 = vadd.f32 %v668_v38, %v4536_v20 }
 0x229   :  { %v599_v60 = vpop.f32.mrf.mxu1  ;;  %v670_v40 = vpop.f32.mrf.mxu0 }
 0x22a   :  { %v600_v42 = vadd.f32 %v599_v60, %v8945_v36  ;;  %v671_v46 = vadd.f32 %v670_v40, %v4538_v47  ;;  %v763_v60 = vrot.slane %v2642_v50, 4 }
 0x22c   :  { %v746_v32 = vcombine.low %v598_v54, %v600_v42  ;;  %v767_v28 = vcombine.low %v669_v63, %v671_v46 }
 0x22e   :  { %v753_v52 = vrot.slane %v746_v32, %v4530_v61  ;;  %v774_v44 = vrot.slane %v767_v28, %v4530_v61  ;;  %v2643_v28 = vld [vmem:[%s7974_s0 + $0x14] sm:$0xf] }
 0x230   :  { %v755_v48 = vadd.f32 %v2642_v50, %v753_v52  ;;  %v776_v42 = vadd.f32 %v774_v44, %v763_v60 }
 0x232   :  { %v2644_v30 = vmul.f32 -1.442695, %v755_v48  ;;  %v2645_v54 = vmul.f32 -1.442695, %v776_v42 }
 0x234   :  { %2719 = vpow2.f32 %v2644_v30 }
 0x235   :  { %2721 = vpow2.f32 %v2645_v54 }
 0x241   :  { %v2720_v34 = vpop.eup %2719 }
 0x242   :  { %v759_v32 = vadd.f32 1.0, %v2720_v34  ;;  %v2722_v26 = vpop.eup %2721 }
 0x243   :  { %v780_v38 = vadd.f32 1.0, %v2722_v26 }
 0x244   :  { %2723 = vrcp.f32 %v759_v32  ;;  %v5350_v32 = vld [vmem:[%s7975_s1 + $0x2f0] sm:$0xff] }
 0x245   :  { %2725 = vrcp.f32 %v780_v38  ;;  %v5377_v38 = vld [vmem:[%s7975_s1 + $0x290] sm:$0xff] }
 0x251   :  { %v2724_v63 = vpop.eup %2723 }
 0x252   :  { %v2726_v46 = vpop.eup %2725 }
 0x253   :  { %v797_v60 = vsub.f32 1.0, %v2726_v46 }
 0x267   :  { %v739_v36 = vpop.f32.mrf.mxu1 }
 0x268   :  { %v740_v52 = vadd.f32 %v739_v36, %v4543_v53  ;;  %v799_v36 = vmul.f32 %v2726_v46, %v4553_v49  ;;  %v5356_v49 = vld [vmem:[%s7975_s1 + $0x2c8] sm:$0xff]  ;;  %v5426_v46 = vld [vmem:[%s7975_s1 + $0x1d8] sm:$0xff] }
 0x269   :  { %v741_v23 = vpop.f32.mrf.mxu1 }
 0x26a   :  { %v742_v40 = vadd.f32 %v741_v23, %v4545_v51 }
 0x26c   :  { %v785_v48 = vcombine.low %v740_v52, %v742_v40  ;;  %v5363_v52 = vld [vmem:[%s7975_s1 + $0x2c0] sm:$0xff]  ;;  %v5370_v40 = vld [vmem:[%s7975_s1 + $0x298] sm:$0xff] }
 0x26e   :  { %v792_v30 = vrot.slane %v785_v48, %v4530_v61  ;;  %v5384_v48 = vld [vmem:[%s7975_s1 + $0x268] sm:$0xff] }
 0x270   :  { %v794_v50 = vmul.f32 %v2724_v63, %v792_v30  ;;  %v5391_v30 = vld [vmem:[%s7975_s1 + $0x260] sm:$0xff]  ;;  %v5398_v63 = vld [vmem:[%s7975_s1 + $0x238] sm:$0xff] }
 0x272   :  { %v795_v34 = vadd.f32 %v2643_v28, %v794_v50  ;;  %v5405_v28 = vld [vmem:[%s7975_s1 + $0x230] sm:$0xff]  ;;  %v5412_v50 = vld [vmem:[%s7975_s1 + $0x208] sm:$0xff] }
 0x274   :  { %2727 = vtanh.f32 %v795_v34  ;;  %v5419_v34 = vld [vmem:[%s7975_s1 + $0x200] sm:$0xff] }
 0x281   :  { %v2728_v44 = vpop.eup %2727 }
 0x282   :  { %v798_v42 = vmul.f32 %v2728_v44, %v797_v60  ;;  %v8947_v60 = vld [vmem:[#allocation6_spill] sm:$0xff] }
 0x283   :  { %v5433_v44 = vld [vmem:[%s7975_s1 + $0x1d0] sm:$0xff] }
 0x284   :  { %v5337_v23 = vadd.f32 %v799_v36, %v798_v42  ;;  %v8948_v42 = vld [vmem:[#allocation38_spill] sm:$0xff] }
 0x285   :  { %v5440_v36 = vld [vmem:[%s7975_s1 + $0x1a8] sm:$0xff] }
 0x286   :  { %v5341_v26 = vrot.slane %v5337_v23, %v4530_v61 }
 0x288   :  { %v812_v54 = vcombine.high %v5341_v26, %v5341_v26 }
 0x28a   :  { %879 = vmatprep.mubr.f32.mxu0 %v812_v54  ;;  %950 = vmatprep.mubr.f32.mxu1 %v812_v54 }
 0x28b   :  { %880 = vmatmul.mubr.f32.vlgmr.msra.gmra.mxu0 %v5341_v26  ;;  %951 = vmatmul.mubr.f32.vlgmr.msra.gmra.mxu1 %v5341_v26 }
 0x28c   :  { %958 = vmatpush1.msra.mxu0 %v5350_v32  ;;  %1021 = vmatprep.mubr.f32.mxu0 %v812_v54  ;;  %v8949_v54 = vld [vmem:[#allocation7_spill] sm:$0xff] }
 0x28d   :  { %959 = vmatprep.subr.mxu0 %v5356_v49  ;;  %1100 = vmatpush1.msra.mxu1 %v4568_v27 }
 0x28e   :  { %960 = vmatpush1.msra.mxu0 %v5363_v52  ;;  %1101 = vmatprep.subr.mxu1 %v4575_v24 }
 0x28f   :  { %961 = vmatprep.subr.mxu0 %v5370_v40  ;;  %1102 = vmatpush1.msra.mxu1 %v4582_v58 }
 0x290   :  { %962 = vmatpush1.msra.mxu0 %v5377_v38  ;;  %1103 = vmatprep.subr.mxu1 %v4589_v55 }
 0x291   :  { %963 = vmatprep.subr.mxu0 %v5384_v48  ;;  %1104 = vmatpush1.msra.mxu1 %v4596_v22 }
 0x292   :  { %964 = vmatpush1.msra.mxu0 %v5391_v30  ;;  %1105 = vmatprep.subr.mxu1 %v4603_v59 }
 0x293   :  { %965 = vmatprep.subr.mxu0 %v5398_v63  ;;  %1106 = vmatpush1.msra.mxu1 %v4610_v62 }
 0x294   :  { %966 = vmatpush1.msra.mxu0 %v5405_v28  ;;  %1107 = vmatprep.subr.mxu1 %v4617_v29 }
 0x295   :  { %967 = vmatprep.subr.mxu0 %v5412_v50  ;;  %1108 = vmatpush1.msra.mxu1 %v4624_v57 }
 0x296   :  { %968 = vmatpush1.msra.mxu0 %v5419_v34  ;;  %1109 = vmatprep.subr.mxu1 %v4631_v19 }
 0x297   :  { %969 = vmatprep.subr.mxu0 %v5426_v46  ;;  %1110 = vmatpush1.msra.mxu1 %v8947_v60  ;;  %v5447_v60 = vld [vmem:[%s7975_s1 + $0x1a0] sm:$0xff] }
 0x298   :  { %970 = vmatpush1.msra.mxu0 %v5433_v44  ;;  %1111 = vmatprep.subr.mxu1 %v8948_v42  ;;  %v5454_v42 = vld [vmem:[%s7975_s1 + $0x178] sm:$0xff] }
 0x299   :  { %971 = vmatprep.subr.mxu0 %v5440_v36  ;;  %1112 = vmatpush1.msra.mxu1 %v8949_v54  ;;  %v5461_v54 = vld [vmem:[%s7975_s1 + $0x170] sm:$0xff] }
 0x29a   :  { %972 = vmatpush1.msra.mxu0 %v5447_v60  ;;  %1113 = vmatprep.subr.mxu1 %v4659_v25  ;;  %v5468_v25 = vld [vmem:[%s7975_s1 + $0x148] sm:$0xff] }
 0x29b   :  { %973 = vmatprep.subr.mxu0 %v5454_v42  ;;  %1114 = vmatpush1.msra.mxu1 %v4666_v33  ;;  %v5475_v33 = vld [vmem:[%s7975_s1 + $0x140] sm:$0xff] }
 0x29c   :  { %974 = vmatpush1.msra.mxu0 %v5461_v54  ;;  %1115 = vmatprep.subr.mxu1 %v4673_v56  ;;  %v5482_v56 = vld [vmem:[%s7975_s1 + $0x118] sm:$0xff] }
 0x29d   :  { %975 = vmatprep.subr.mxu0 %v5468_v25  ;;  %1116 = vmatpush1.msra.mxu1 %v4680_v41  ;;  %v5489_v41 = vld [vmem:[%s7975_s1 + $0x110] sm:$0xff] }
 0x29e   :  { %976 = vmatpush1.msra.mxu0 %v5475_v33  ;;  %1117 = vmatprep.subr.mxu1 %v4687_v4  ;;  %v5496_v4 = vld [vmem:[%s7975_s1 + $0xe8] sm:$0xff] }
 0x29f   :  { %977 = vmatprep.subr.mxu0 %v5482_v56  ;;  %1118 = vmatpush1.msra.mxu1 %v4694_v31  ;;  %v5503_v31 = vld [vmem:[%s7975_s1 + $0xe0] sm:$0xff] }
 0x2a0   :  { %978 = vmatpush1.msra.mxu0 %v5489_v41  ;;  %1119 = vmatprep.subr.mxu1 %v4701_v45  ;;  %v5510_v45 = vld [vmem:[%s7975_s1 + $0xb8] sm:$0xff] }
 0x2a1   :  { %979 = vmatprep.subr.mxu0 %v5496_v4  ;;  %1120 = vmatpush1.msra.mxu1 %v4708_v39  ;;  %v5517_v39 = vld [vmem:[%s7975_s1 + $0xb0] sm:$0xff] }
 0x2a2   :  { %980 = vmatpush1.msra.mxu0 %v5503_v31  ;;  %1121 = vmatprep.subr.mxu1 %v4715_v37  ;;  %v5524_v37 = vld [vmem:[%s7975_s1 + $0x88] sm:$0xff] }
 0x2a3   :  { %981 = vmatprep.subr.mxu0 %v5510_v45  ;;  %1122 = vmatpush1.msra.mxu1 %v4722_v35  ;;  %v5531_v35 = vld [vmem:[%s7975_s1 + $0x80] sm:$0xff] }
 0x2a4   :  { %982 = vmatpush1.msra.mxu0 %v5517_v39  ;;  %1123 = vmatprep.subr.mxu1 %v4729_v43  ;;  %v5538_v43 = vld [vmem:[%s7975_s1 + $0x58] sm:$0xff] }
 0x2a5   :  { %983 = vmatprep.subr.mxu0 %v5524_v37  ;;  %1124 = vmatpush1.msra.mxu1 %v4736_v0  ;;  %v5545_v0 = vld [vmem:[%s7975_s1 + $0x50] sm:$0xff] }
 0x2a6   :  { %984 = vmatpush1.msra.mxu0 %v5531_v35  ;;  %1125 = vmatprep.subr.mxu1 %v4743_v1  ;;  %v5552_v1 = vld [vmem:[%s7975_s1 + $0x28] sm:$0xff] }
 0x2a7   :  { %985 = vmatprep.subr.mxu0 %v5538_v43  ;;  %1126 = vmatpush1.msra.mxu1 %v4750_v2  ;;  %v5559_v2 = vld [vmem:[%s7975_s1 + $0x20] sm:$0xff] }
 0x2a8   :  { %986 = vmatpush1.msra.mxu0 %v5545_v0  ;;  %1127 = vmatprep.subr.mxu1 %v4757_v3  ;;  %8950 = vst [vmem:[#allocation84_spill] sm:$0xff] %v5559_v2  ;;  %v5566_v3 = vld [vmem:[%s7975_s1 + $0x5f8] sm:$0xff] }
 0x2a9   :  { %987 = vmatprep.subr.mxu0 %v5552_v1  ;;  %1128 = vmatpush1.msra.mxu1 %v4764_v5  ;;  %8951 = vst [vmem:[#allocation86_spill] sm:$0xff] %v5566_v3  ;;  %v5573_v5 = vld [vmem:[%s7975_s1 + $0x5f0] sm:$0xff] }
 0x2aa   :  { %988 = vmatpush1.msra.mxu0 %v5559_v2  ;;  %1129 = vmatprep.subr.mxu1 %v4771_v6  ;;  %8952 = vst [vmem:[#allocation88_spill] sm:$0xff] %v5573_v5  ;;  %v5580_v6 = vld [vmem:[%s7975_s1 + $0x5c8] sm:$0xff] }
 0x2ab   :  { %989 = vmatprep.subr.mxu0 %v5566_v3  ;;  %1130 = vmatpush1.msra.mxu1 %v4778_v7  ;;  %8953 = vst [vmem:[#allocation90_spill] sm:$0xff] %v5580_v6  ;;  %v5587_v7 = vld [vmem:[%s7975_s1 + $0x5c0] sm:$0xff] }
 0x2ac   :  { %990 = vmatpush2.msra.mxu0 %v5573_v5  ;;  %1131 = vmatprep.subr.mxu1 %v4785_v8  ;;  %8954 = vst [vmem:[#allocation92_spill] sm:$0xff] %v5587_v7  ;;  %v5594_v8 = vld [vmem:[%s7975_s1 + $0x598] sm:$0xff] }
 0x2ad   :  { %991 = vmatprep.subr.mxu0 %v5580_v6  ;;  %1132 = vmatpush2.msra.mxu1 %v4792_v9  ;;  %8955 = vst [vmem:[#allocation94_spill] sm:$0xff] %v5594_v8  ;;  %v5601_v9 = vld [vmem:[%s7975_s1 + $0x590] sm:$0xff] }
 0x2ae   :  { %992 = vmatpush2.msra.mxu0 %v5587_v7  ;;  %1133 = vmatprep.subr.mxu1 %v4799_v10  ;;  %8956 = vst [vmem:[#allocation117_spill] sm:$0xff] %v5601_v9  ;;  %v5608_v10 = vld [vmem:[%s7975_s1 + $0x568] sm:$0xff] }
 0x2af   :  { %993 = vmatprep.subr.mxu0 %v5594_v8  ;;  %1134 = vmatpush2.msra.mxu1 %v4806_v11  ;;  %8957 = vst [vmem:[#allocation118_spill] sm:$0xff] %v5608_v10  ;;  %v5615_v11 = vld [vmem:[%s7975_s1 + $0x560] sm:$0xff] }
 0x2b0   :  { %994 = vmatpush2.msra.mxu0 %v5601_v9  ;;  %1135 = vmatprep.subr.mxu1 %v4813_v12  ;;  %8958 = vst [vmem:[#allocation119_spill] sm:$0xff] %v5615_v11  ;;  %v5622_v12 = vld [vmem:[%s7975_s1 + $0x538] sm:$0xff] }
 0x2b1   :  { %995 = vmatprep.subr.mxu0 %v5608_v10  ;;  %1136 = vmatpush2.msra.mxu1 %v4820_v13  ;;  %8959 = vst [vmem:[#allocation120_spill] sm:$0xff] %v5622_v12  ;;  %v5629_v13 = vld [vmem:[%s7975_s1 + $0x530] sm:$0xff] }
 0x2b2   :  { %996 = vmatpush2.msra.mxu0 %v5615_v11  ;;  %1137 = vmatprep.subr.mxu1 %v4827_v14  ;;  %8960 = vst [vmem:[#allocation121_spill] sm:$0xff] %v5629_v13  ;;  %v5636_v14 = vld [vmem:[%s7975_s1 + $0x508] sm:$0xff]  ;;  %v9015_v11 = vld [vmem:[#allocation80_spill] sm:$0xff] }
 0x2b3   :  { %997 = vmatprep.subr.mxu0 %v5622_v12  ;;  %1138 = vmatpush2.msra.mxu1 %v4834_v15  ;;  %8961 = vst [vmem:[#allocation122_spill] sm:$0xff] %v5636_v14  ;;  %v5643_v15 = vld [vmem:[%s7975_s1 + $0x500] sm:$0xff]  ;;  %v9014_v12 = vld [vmem:[#allocation78_spill] sm:$0xff] }
 0x2b4   :  { %998 = vmatpush2.msra.mxu0 %v5629_v13  ;;  %1139 = vmatprep.subr.mxu1 %v4841_v16  ;;  %8962 = vst [vmem:[#allocation123_spill] sm:$0xff] %v5643_v15  ;;  %v5650_v16 = vld [vmem:[%s7975_s1 + $0x4d8] sm:$0xff]  ;;  %v9016_v10 = vld [vmem:[#allocation82_spill] sm:$0xff] }
 0x2b5   :  { %999 = vmatprep.subr.mxu0 %v5636_v14  ;;  %1140 = vmatpush2.msra.mxu1 %v4848_v17  ;;  %8963 = vst [vmem:[#allocation124_spill] sm:$0xff] %v5650_v16  ;;  %v5657_v17 = vld [vmem:[%s7975_s1 + $0x4d0] sm:$0xff]  ;;  %v8965_v14 = vld [vmem:[#allocation33_spill] sm:$0xff]  ;;  %v9011_v13 = vld [vmem:[#allocation72_spill] sm:$0xff] }
 0x2b6   :  { %1000 = vmatpush2.msra.mxu0 %v5643_v15  ;;  %1141 = vmatprep.subr.mxu1 %v4855_v18  ;;  %8964 = vst [vmem:[#allocation125_spill] sm:$0xff] %v5657_v17  ;;  %v5664_v18 = vld [vmem:[%s7975_s1 + $0x4a8] sm:$0xff]  ;;  %v8967_v15 = vld [vmem:[#allocation35_spill] sm:$0xff] }
 0x2b7   :  { %1001 = vmatprep.subr.mxu0 %v5650_v16  ;;  %1142 = vmatpush2.msra.mxu1 %v4862_v21  ;;  %8966 = vst [vmem:[#allocation126_spill] sm:$0xff] %v5664_v18  ;;  %v5671_v21 = vld [vmem:[%s7975_s1 + $0x4a0] sm:$0xff] }
 0x2b8   :  { %1002 = vmatpush2.msra.mxu0 %v5657_v17  ;;  %1143 = vmatprep.subr.mxu1 %v8965_v14  ;;  %8968 = vst [vmem:[#allocation127_spill] sm:$0xff] %v5671_v21  ;;  %v8969_v16 = vld [vmem:[#allocation37_spill] sm:$0xff]  ;;  %v5678_v14 = vld [vmem:[%s7975_s1 + $0x478] sm:$0xff] }
 0x2b9   :  { %1003 = vmatprep.subr.mxu0 %v5664_v18  ;;  %1144 = vmatpush2.msra.mxu1 %v8967_v15  ;;  %8970 = vst [vmem:[#allocation128_spill] sm:$0xff] %v5678_v14  ;;  %v8971_v17 = vld [vmem:[#allocation39_spill] sm:$0xff]  ;;  %v8973_v18 = vld [vmem:[#allocation41_spill] sm:$0xff] }
 0x2ba   :  { %1004 = vmatpush2.msra.mxu0 %v5671_v21  ;;  %1145 = vmatprep.subr.mxu1 %v8969_v16  ;;  %v5685_v15 = vld [vmem:[%s7975_s1 + $0x470] sm:$0xff]  ;;  %v5692_v16 = vld [vmem:[%s7975_s1 + $0x448] sm:$0xff] }
 0x2bb   :  { %1005 = vmatprep.subr.mxu0 %v5678_v14  ;;  %1146 = vmatpush2.msra.mxu1 %v8971_v17  ;;  %8972 = vst [vmem:[#allocation129_spill] sm:$0xff] %v5685_v15  ;;  %8974 = vst [vmem:[#allocation130_spill] sm:$0xff] %v5692_v16  ;;  %v8975_v21 = vld [vmem:[#allocation43_spill] sm:$0xff]  ;;  %v5699_v17 = vld [vmem:[%s7975_s1 + $0x440] sm:$0xff] }
 0x2bc   :  { %1006 = vmatpush2.msra.mxu0 %v5685_v15  ;;  %1147 = vmatprep.subr.mxu1 %v8973_v18  ;;  %8976 = vst [vmem:[#allocation131_spill] sm:$0xff] %v5699_v17  ;;  %v8977_v14 = vld [vmem:[#allocation45_spill] sm:$0xff]  ;;  %v5706_v18 = vld [vmem:[%s7975_s1 + $0x418] sm:$0xff] }
 0x2bd   :  { %1007 = vmatprep.subr.mxu0 %v5692_v16  ;;  %1148 = vmatpush2.msra.mxu1 %v8975_v21  ;;  %8978 = vst [vmem:[#allocation132_spill] sm:$0xff] %v5706_v18  ;;  %v8979_v15 = vld [vmem:[#allocation47_spill] sm:$0xff]  ;;  %v8981_v16 = vld [vmem:[#allocation49_spill] sm:$0xff] }
 0x2be   :  { %1008 = vmatpush2.msra.mxu0 %v5699_v17  ;;  %1149 = vmatprep.subr.mxu1 %v8977_v14  ;;  %v5713_v21 = vld [vmem:[%s7975_s1 + $0x410] sm:$0xff]  ;;  %v5720_v14 = vld [vmem:[%s7975_s1 + $0x3e8] sm:$0xff] }
 0x2bf   :  { %1009 = vmatprep.subr.mxu0 %v5706_v18  ;;  %1150 = vmatpush2.msra.mxu1 %v8979_v15  ;;  %8980 = vst [vmem:[#allocation133_spill] sm:$0xff] %v5713_v21  ;;  %8982 = vst [vmem:[#allocation134_spill] sm:$0xff] %v5720_v14  ;;  %v8983_v17 = vld [vmem:[#allocation51_spill] sm:$0xff]  ;;  %v5727_v15 = vld [vmem:[%s7975_s1 + $0x3e0] sm:$0xff] }
 0x2c0   :  { %1010 = vmatpush2.msra.mxu0 %v5713_v21  ;;  %1151 = vmatprep.subr.mxu1 %v8981_v16  ;;  %8984 = vst [vmem:[#allocation135_spill] sm:$0xff] %v5727_v15  ;;  %v8985_v18 = vld [vmem:[#allocation53_spill] sm:$0xff]  ;;  %v5734_v16 = vld [vmem:[%s7975_s1 + $0x3b8] sm:$0xff] }
 0x2c1   :  { %1011 = vmatprep.subr.mxu0 %v5720_v14  ;;  %1152 = vmatpush2.msra.mxu1 %v8983_v17  ;;  %8986 = vst [vmem:[#allocation136_spill] sm:$0xff] %v5734_v16  ;;  %v8987_v21 = vld [vmem:[#allocation55_spill] sm:$0xff] }
 0x2c2   :  { %1012 = vmatpush2.msra.mxu0 %v5727_v15  ;;  %1153 = vmatprep.subr.mxu1 %v8985_v18  ;;  %v5741_v17 = vld [vmem:[%s7975_s1 + $0x3b0] sm:$0xff]  ;;  %v5747_v18 = vld [vmem:[%s7975_s1 + $0x398] sm:$0xff] }
 0x2c3   :  { %1013 = vmatprep.subr.mxu0 %v5734_v16  ;;  %1154 = vmatpush2.msra.mxu1 %v8987_v21  ;;  %8988 = vst [vmem:[#allocation137_spill] sm:$0xff] %v5741_v17  ;;  %8989 = vst [vmem:[#allocation138_spill] sm:$0xff] %v5747_v18  ;;  %v5753_v16 = vld [vmem:[%s7975_s1 + $0x388] sm:$0xff]  ;;  %v5759_v21 = vld [vmem:[%s7975_s1 + $0x390] sm:$0xff] }
 0x2c4   :  { %1014 = vmatpush2.msra.mxu0 %v5741_v17  ;;  %1155 = vmatprep.subr.mxu1 %v5747_v18  ;;  %8990 = vst [vmem:[#allocation139_spill] sm:$0xff] %v5753_v16  ;;  %8991 = vst [vmem:[#allocation140_spill] sm:$0xff] %v5759_v21  ;;  %v5765_v17 = vld [vmem:[%s7975_s1 + $0x380] sm:$0xff]  ;;  %v5771_v18 = vld [vmem:[%s7975_s1 + $0x368] sm:$0xff] }
 0x2c5   :  { %1015 = vmatprep.subr.mxu0 %v5753_v16  ;;  %1156 = vmatpush2.msra.mxu1 %v5759_v21  ;;  %8992 = vst [vmem:[#allocation141_spill] sm:$0xff] %v5765_v17  ;;  %8993 = vst [vmem:[#allocation142_spill] sm:$0xff] %v5771_v18  ;;  %v5777_v16 = vld [vmem:[%s7975_s1 + $0x358] sm:$0xff]  ;;  %v5783_v21 = vld [vmem:[%s7975_s1 + $0x360] sm:$0xff] }
 0x2c6   :  { %1016 = vmatpush2.msra.mxu0 %v5765_v17  ;;  %1157 = vmatprep.subr.mxu1 %v5771_v18  ;;  %8994 = vst [vmem:[#allocation143_spill] sm:$0xff] %v5777_v16  ;;  %8995 = vst [vmem:[#allocation144_spill] sm:$0xff] %v5783_v21  ;;  %v5789_v17 = vld [vmem:[%s7975_s1 + $0x350] sm:$0xff]  ;;  %v5795_v18 = vld [vmem:[%s7975_s1 + $0x338] sm:$0xff] }
 0x2c7   :  { %1017 = vmatprep.subr.mxu0 %v5777_v16  ;;  %1158 = vmatpush2.msra.mxu1 %v5783_v21  ;;  %8996 = vst [vmem:[#allocation145_spill] sm:$0xff] %v5789_v17  ;;  %8997 = vst [vmem:[#allocation146_spill] sm:$0xff] %v5795_v18  ;;  %v5801_v16 = vld [vmem:[%s7975_s1 + $0x328] sm:$0xff]  ;;  %v5807_v21 = vld [vmem:[%s7975_s1 + $0x330] sm:$0xff] }
 0x2c8   :  { %1018 = vmatpush2.msra.mxu0 %v5789_v17  ;;  %1159 = vmatprep.subr.mxu1 %v5795_v18  ;;  %8998 = vst [vmem:[#allocation147_spill] sm:$0xff] %v5801_v16  ;;  %8999 = vst [vmem:[#allocation148_spill] sm:$0xff] %v5807_v21  ;;  %v5813_v17 = vld [vmem:[%s7975_s1 + $0x320] sm:$0xff]  ;;  %v5819_v18 = vld [vmem:[%s7975_s1 + $0x308] sm:$0xff] }
 0x2c9   :  { %1019 = vmatprep.subr.mxu0 %v5801_v16  ;;  %1160 = vmatpush2.msra.mxu1 %v5807_v21  ;;  %9000 = vst [vmem:[#allocation149_spill] sm:$0xff] %v5813_v17  ;;  %9001 = vst [vmem:[#allocation150_spill] sm:$0xff] %v5819_v18  ;;  %v9002_v16 = vld [vmem:[#allocation57_spill] sm:$0xff]  ;;  %v9003_v15 = vld [vmem:[#allocation59_spill] sm:$0xff] }
 0x2ca   :  { %1020 = vmatpush2.msra.mxu0 %v5813_v17  ;;  %1161 = vmatprep.subr.mxu1 %v5819_v18  ;;  %v5828_v21 = vld [vmem:[%s7975_s1 + $0x300] sm:$0xff]  ;;  %v5835_v14 = vld [vmem:[%s7975_s1 + $0x2f8] sm:$0xff]  ;;  %v9010_v18 = vld [vmem:[#allocation70_spill] sm:$0xff] }
 0x2cb   :  { %1022 = vmatmul.mubr.f32.vlgmr.msra.gmra.mxu0 %v5341_v26  ;;  %1170 = vmatprep.subr.mxu0 %v9002_v16  ;;  %9004 = vst [vmem:[#allocation151_spill] sm:$0xff] %v5828_v21  ;;  %v9005_v17 = vld [vmem:[#allocation61_spill] sm:$0xff]  ;;  %9006 = vst [vmem:[#allocation152_spill] sm:$0xff] %v5835_v14  ;;  %v9007_v26 = vld [vmem:[#allocation63_spill] sm:$0xff] }
 0x2cc   :  { %1171 = vmatpush1.msra.mxu0 %v9003_v15  ;;  %1162 = vmatpush2.msra.mxu1 %v5828_v21  ;;  %v9008_v16 = vld [vmem:[#allocation66_spill] sm:$0xff]  ;;  %v9009_v15 = vld [vmem:[#allocation68_spill] sm:$0xff] }
 0x2cd   :  { %1172 = vmatprep.subr.mxu0 %v9005_v17  ;;  %1241 = vmatprep.subr.mxu1 %v5835_v14  ;;  %v9012_v21 = vld [vmem:[#allocation74_spill] sm:$0xff]  ;;  %v9013_v17 = vld [vmem:[#allocation76_spill] sm:$0xff]  ;;  %v9017_v14 = vld [vmem:[#allocation65_spill] sm:$0xff] }
 0x2ce   :  { %1173 = vmatpush1.msra.mxu0 %v9007_v26  ;;  %v9018_v26 = vld [vmem:[#allocation67_spill] sm:$0xff] }
 0x2cf   :  { %1174 = vmatprep.subr.mxu0 %v9008_v16  ;;  %v9019_v16 = vld [vmem:[#allocation69_spill] sm:$0xff] }
 0x2d0   :  { %1175 = vmatpush1.msra.mxu0 %v9009_v15  ;;  %v9020_v15 = vld [vmem:[#allocation71_spill] sm:$0xff] }
 0x2d1   :  { %1176 = vmatprep.subr.mxu0 %v9010_v18  ;;  %v9021_v18 = vld [vmem:[#allocation73_spill] sm:$0xff] }
 0x2d2   :  { %1177 = vmatpush1.msra.mxu0 %v9011_v13  ;;  %v9022_v13 = vld [vmem:[#allocation75_spill] sm:$0xff] }
 0x2d3   :  { %1178 = vmatprep.subr.mxu0 %v9012_v21  ;;  %v9023_v21 = vld [vmem:[#allocation77_spill] sm:$0xff] }
 0x2d4   :  { %1179 = vmatpush1.msra.mxu0 %v9013_v17  ;;  %v9024_v17 = vld [vmem:[#allocation79_spill] sm:$0xff] }
 0x2d5   :  { %1180 = vmatprep.subr.mxu0 %v9014_v12  ;;  %v9025_v12 = vld [vmem:[#allocation81_spill] sm:$0xff] }
 0x2d6   :  { %1181 = vmatpush1.msra.mxu0 %v9015_v11  ;;  %v9026_v11 = vld [vmem:[#allocation83_spill] sm:$0xff] }
 0x2d7   :  { %1182 = vmatprep.subr.mxu0 %v9016_v10  ;;  %v9027_v10 = vld [vmem:[#allocation85_spill] sm:$0xff] }
 0x2d8   :  { %1183 = vmatpush1.msra.mxu0 %v9017_v14  ;;  %v9028_v14 = vld [vmem:[#allocation87_spill] sm:$0xff] }
 0x2d9   :  { %1184 = vmatprep.subr.mxu0 %v9018_v26  ;;  %v9029_v26 = vld [vmem:[#allocation89_spill] sm:$0xff] }
 0x2da   :  { %1185 = vmatpush1.msra.mxu0 %v9019_v16  ;;  %v9030_v16 = vld [vmem:[#allocation91_spill] sm:$0xff] }
 0x2db   :  { %1186 = vmatprep.subr.mxu0 %v9020_v15  ;;  %v9031_v15 = vld [vmem:[#allocation93_spill] sm:$0xff] }
 0x2dc   :  { %1187 = vmatpush1.msra.mxu0 %v9021_v18  ;;  %v9032_v18 = vld [vmem:[#allocation95_spill] sm:$0xff] }
 0x2dd   :  { %1188 = vmatprep.subr.mxu0 %v9022_v13  ;;  %v9033_v13 = vld [vmem:[#allocation96_spill] sm:$0xff] }
 0x2de   :  { %1189 = vmatpush1.msra.mxu0 %v9023_v21  ;;  %v9034_v21 = vld [vmem:[#allocation97_spill] sm:$0xff] }
 0x2df   :  { %1190 = vmatprep.subr.mxu0 %v9024_v17  ;;  %v9035_v17 = vld [vmem:[#allocation50_spill] sm:$0xff] }
 0x2e0   :  { %1191 = vmatpush1.msra.mxu0 %v9025_v12  ;;  %v9036_v12 = vld [vmem:[#allocation98_spill] sm:$0xff] }
 0x2e1   :  { %1192 = vmatprep.subr.mxu0 %v9026_v11  ;;  %v9037_v11 = vld [vmem:[#allocation52_spill] sm:$0xff] }
 0x2e2   :  { %1193 = vmatpush1.msra.mxu0 %v9027_v10  ;;  %v9038_v10 = vld [vmem:[#allocation99_spill] sm:$0xff] }
 0x2e3   :  { %1194 = vmatprep.subr.mxu0 %v9028_v14  ;;  %v9039_v14 = vld [vmem:[#allocation54_spill] sm:$0xff] }
 0x2e4   :  { %1195 = vmatpush1.msra.mxu0 %v9029_v26  ;;  %v9040_v26 = vld [vmem:[#allocation100_spill] sm:$0xff] }
 0x2e5   :  { %1196 = vmatprep.subr.mxu0 %v9030_v16  ;;  %v9041_v16 = vld [vmem:[#allocation56_spill] sm:$0xff] }
 0x2e6   :  { %1197 = vmatpush1.msra.mxu0 %v9031_v15  ;;  %v9042_v15 = vld [vmem:[#allocation101_spill] sm:$0xff] }
 0x2e7   :  { %1198 = vmatprep.subr.mxu0 %v9032_v18  ;;  %v9043_v18 = vld [vmem:[#allocation58_spill] sm:$0xff] }
 0x2e8   :  { %1199 = vmatpush1.msra.mxu0 %v9033_v13  ;;  %v9044_v13 = vld [vmem:[#allocation102_spill] sm:$0xff] }
 0x2e9   :  { %1200 = vmatprep.subr.mxu0 %v9034_v21  ;;  %v9045_v21 = vld [vmem:[#allocation60_spill] sm:$0xff] }
 0x2ea   :  { %1201 = vmatpush1.msra.mxu0 %v9035_v17  ;;  %v9046_v17 = vld [vmem:[#allocation62_spill] sm:$0xff] }
 0x2eb   :  { %1202 = vmatprep.subr.mxu0 %v9036_v12  ;;  %v9047_v12 = vld [vmem:[#allocation64_spill] sm:$0xff] }
 0x2ec   :  { %1203 = vmatpush2.msra.mxu0 %v9037_v11  ;;  %v9048_v11 = vld [vmem:[#allocation103_spill] sm:$0xff] }
 0x2ed   :  { %1204 = vmatprep.subr.mxu0 %v9038_v10  ;;  %v9049_v10 = vld [vmem:[#allocation104_spill] sm:$0xff] }
 0x2ee   :  { %1205 = vmatpush2.msra.mxu0 %v9039_v14  ;;  %v9050_v14 = vld [vmem:[#allocation105_spill] sm:$0xff] }
 0x2ef   :  { %1206 = vmatprep.subr.mxu0 %v9040_v26  ;;  %v9051_v26 = vld [vmem:[#allocation106_spill] sm:$0xff] }
 0x2f0   :  { %1207 = vmatpush2.msra.mxu0 %v9041_v16  ;;  %v9052_v16 = vld [vmem:[#allocation107_spill] sm:$0xff] }
 0x2f1   :  { %1208 = vmatprep.subr.mxu0 %v9042_v15  ;;  %v9053_v15 = vld [vmem:[#allocation108_spill] sm:$0xff] }
 0x2f2   :  { %1209 = vmatpush2.msra.mxu0 %v9043_v18  ;;  %v9054_v18 = vld [vmem:[#allocation109_spill] sm:$0xff] }
 0x2f3   :  { %1210 = vmatprep.subr.mxu0 %v9044_v13  ;;  %v9055_v13 = vld [vmem:[#allocation110_spill] sm:$0xff] }
 0x2f4   :  { %1211 = vmatpush2.msra.mxu0 %v9045_v21  ;;  %v9056_v21 = vld [vmem:[#allocation111_spill] sm:$0xff] }
 0x2f5   :  { %1212 = vmatprep.subr.mxu0 %v9046_v17  ;;  %v9057_v17 = vld [vmem:[#allocation112_spill] sm:$0xff] }
 0x2f6   :  { %1213 = vmatpush2.msra.mxu0 %v9047_v12  ;;  %v9058_v12 = vld [vmem:[#allocation113_spill] sm:$0xff] }
 0x2f7   :  { %1214 = vmatprep.subr.mxu0 %v9048_v11  ;;  %v9059_v11 = vld [vmem:[#allocation114_spill] sm:$0xff] }
 0x2f8   :  { %1215 = vmatpush2.msra.mxu0 %v9049_v10  ;;  %v9060_v10 = vld [vmem:[#allocation115_spill] sm:$0xff] }
 0x2f9   :  { %1216 = vmatprep.subr.mxu0 %v9050_v14  ;;  %v9061_v14 = vld [vmem:[#allocation116_spill] sm:$0xff] }
 0x2fa   :  { %1217 = vmatpush2.msra.mxu0 %v9051_v26 }
 0x2fb   :  { %1218 = vmatprep.subr.mxu0 %v9052_v16 }
 0x2fc   :  { %1219 = vmatpush2.msra.mxu0 %v9053_v15  ;;  %v5896_v15 = vld [vmem:[%s7975_s1 + $0x378] sm:$0xff] }
 0x2fd   :  { %1220 = vmatprep.subr.mxu0 %v9054_v18  ;;  %9062 = vst [vmem:[#allocation153_spill] sm:$0xff] %v5896_v15 }
 0x2fe   :  { %1221 = vmatpush2.msra.mxu0 %v9055_v13  ;;  %v9070_v13 = vld [vmem:[#allocation5_spill] sm:$0xff] }
 0x2ff   :  { %1222 = vmatprep.subr.mxu0 %v9056_v21  ;;  %v5902_v21 = vld [vmem:[%s7975_s1 + $0x370] sm:$0xff] }
 0x300   :  { %1223 = vmatpush2.msra.mxu0 %v9057_v17  ;;  %9063 = vst [vmem:[#allocation154_spill] sm:$0xff] %v5902_v21  ;;  %v9069_v17 = vld [vmem:[#allocation36_spill] sm:$0xff] }
 0x301   :  { %1224 = vmatprep.subr.mxu0 %v9058_v12 }
 0x302   :  { %1225 = vmatpush2.msra.mxu0 %v9059_v11 }
 0x303   :  { %1226 = vmatprep.subr.mxu0 %v9060_v10  ;;  %v5908_v10 = vld [vmem:[%s7975_s1 + $0x348] sm:$0xff] }
 0x304   :  { %1227 = vmatpush2.msra.mxu0 %v9061_v14  ;;  %9064 = vst [vmem:[#allocation155_spill] sm:$0xff] %v5908_v10  ;;  %v5914_v14 = vld [vmem:[%s7975_s1 + $0x340] sm:$0xff] }
 0x305   :  { %1228 = vmatprep.subr.mxu0 %v5896_v15  ;;  %9065 = vst [vmem:[#allocation156_spill] sm:$0xff] %v5914_v14  ;;  %v5920_v15 = vld [vmem:[%s7975_s1 + $0x318] sm:$0xff] }
 0x306   :  { %1229 = vmatpush2.msra.mxu0 %v5902_v21  ;;  %9066 = vst [vmem:[#allocation157_spill] sm:$0xff] %v5920_v15  ;;  %v5926_v21 = vld [vmem:[%s7975_s1 + $0x310] sm:$0xff] }
 0x307   :  { %1230 = vmatprep.subr.mxu0 %v5908_v10  ;;  %9067 = vst [vmem:[#allocation158_spill] sm:$0xff] %v5926_v21  ;;  %v9068_v10 = vld [vmem:[#allocation34_spill] sm:$0xff] }
 0x308   :  { %1231 = vmatpush2.msra.mxu0 %v5914_v14 }
 0x309   :  { %1232 = vmatprep.subr.mxu0 %v5920_v15  ;;  %v2646_v15 = vld [vmem:[%s7974_s0 + $0x18] sm:$0xff] }
 0x30a   :  { %1233 = vmatpush2.msra.mxu0 %v5926_v21 }
 0x30b   :  { %1383 = vmatprep.subr.mxu0 %v9068_v10 }
 0x34b   :  { %v881_v11 = vpop.f32.mrf.mxu0  ;;  %v952_v26 = vpop.f32.mrf.mxu1 }
 0x34c   :  { %v882_v18 = vadd.f32 %v881_v11, %v9070_v13  ;;  %v953_v10 = vadd.f32 %v952_v26, %v4536_v20 }
 0x34d   :  { %v883_v12 = vpop.f32.mrf.mxu0  ;;  %v954_v8 = vpop.f32.mrf.mxu1 }
 0x34e   :  { %v884_v14 = vadd.f32 %v883_v12, %v9069_v17  ;;  %v955_v21 = vadd.f32 %v954_v8, %v4538_v47  ;;  %v1047_v12 = vrot.slane %v2646_v15, 4 }
 0x350   :  { %v1030_v16 = vcombine.low %v882_v18, %v884_v14  ;;  %v1051_v5 = vcombine.low %v953_v10, %v955_v21 }
 0x352   :  { %v1037_v9 = vrot.slane %v1030_v16, %v4530_v61  ;;  %v1058_v11 = vrot.slane %v1051_v5, %v4530_v61  ;;  %v2647_v5 = vld [vmem:[%s7974_s0 + $0x20] sm:$0xf] }
 0x354   :  { %v1039_v7 = vadd.f32 %v2646_v15, %v1037_v9  ;;  %v1060_v14 = vadd.f32 %v1058_v11, %v1047_v12 }
 0x356   :  { %v2648_v6 = vmul.f32 -1.442695, %v1039_v7  ;;  %v2649_v18 = vmul.f32 -1.442695, %v1060_v14 }
 0x358   :  { %2729 = vpow2.f32 %v2648_v6 }
 0x359   :  { %2731 = vpow2.f32 %v2649_v18 }
 0x365   :  { %v2730_v13 = vpop.eup %2729 }
 0x366   :  { %v1043_v16 = vadd.f32 1.0, %v2730_v13  ;;  %v2732_v3 = vpop.eup %2731 }
 0x367   :  { %v1064_v26 = vadd.f32 1.0, %v2732_v3 }
 0x368   :  { %2733 = vrcp.f32 %v1043_v16  ;;  %v9082_v16 = vld [vmem:[#allocation48_spill] sm:$0xff] }
 0x369   :  { %2735 = vrcp.f32 %v1064_v26  ;;  %v9085_v26 = vld [vmem:[#allocation14_spill] sm:$0xff] }
 0x375   :  { %v2734_v15 = vpop.eup %2733 }
 0x376   :  { %v2736_v10 = vpop.eup %2735 }
 0x377   :  { %v1081_v12 = vsub.f32 1.0, %v2736_v10 }
 0x38b   :  { %v1023_v17 = vpop.f32.mrf.mxu0 }
 0x38c   :  { %v1024_v9 = vadd.f32 %v1023_v17, %v4543_v53  ;;  %v1083_v17 = vmul.f32 %v2736_v10, %v5337_v23  ;;  %v9081_v23 = vld [vmem:[#allocation11_spill] sm:$0xff]  ;;  %v9092_v10 = vld [vmem:[#allocation86_spill] sm:$0xff] }
 0x38d   :  { %v1025_v2 = vpop.f32.mrf.mxu0 }
 0x38e   :  { %v1026_v8 = vadd.f32 %v1025_v2, %v4545_v51 }
 0x390   :  { %v1069_v7 = vcombine.low %v1024_v9, %v1026_v8  ;;  %v9083_v9 = vld [vmem:[#allocation12_spill] sm:$0xff]  ;;  %v9084_v8 = vld [vmem:[#allocation13_spill] sm:$0xff] }
 0x392   :  { %v1076_v6 = vrot.slane %v1069_v7, %v4530_v61  ;;  %v9086_v7 = vld [vmem:[#allocation15_spill] sm:$0xff] }
 0x394   :  { %v1078_v21 = vmul.f32 %v2734_v15, %v1076_v6  ;;  %v9087_v6 = vld [vmem:[#allocation16_spill] sm:$0xff]  ;;  %v9088_v15 = vld [vmem:[#allocation17_spill] sm:$0xff] }
 0x396   :  { %v1079_v13 = vadd.f32 %v2647_v5, %v1078_v21  ;;  %v9089_v5 = vld [vmem:[#allocation18_spill] sm:$0xff]  ;;  %v9090_v21 = vld [vmem:[#allocation84_spill] sm:$0xff] }
 0x398   :  { %2737 = vtanh.f32 %v1079_v13  ;;  %v9091_v13 = vld [vmem:[#allocation19_spill] sm:$0xff] }
 0x3a5   :  { %v2738_v11 = vpop.eup %2737 }
 0x3a6   :  { %v1082_v14 = vmul.f32 %v2738_v11, %v1081_v12  ;;  %v9093_v12 = vld [vmem:[#allocation20_spill] sm:$0xff] }
 0x3a7   :  { %v9094_v11 = vld [vmem:[#allocation88_spill] sm:$0xff] }
 0x3a8   :  { %v5946_v2 = vadd.f32 %v1083_v17, %v1082_v14  ;;  %v9095_v14 = vld [vmem:[#allocation21_spill] sm:$0xff]  ;;  %v9096_v17 = vld [vmem:[#allocation90_spill] sm:$0xff] }
 0x3aa   :  { %v5950_v3 = vrot.slane %v5946_v2, %v4530_v61 }
 0x3ac   :  { %v1096_v18 = vcombine.high %v5950_v3, %v5950_v3 }
 0x3ae   :  { %1163 = vmatprep.mubr.f32.mxu1 %v1096_v18  ;;  %1234 = vmatprep.mubr.f32.mxu0 %v1096_v18 }
 0x3af   :  { %1164 = vmatmul.mubr.f32.vlgmr.msra.gmra.mxu1 %v5950_v3  ;;  %1235 = vmatmul.mubr.f32.vlgmr.msra.gmra.mxu0 %v5950_v3 }
 0x3b0   :  { %1242 = vmatpush1.msra.mxu1 %v5350_v32  ;;  %1305 = vmatprep.mubr.f32.mxu1 %v1096_v18  ;;  %v9097_v18 = vld [vmem:[#allocation22_spill] sm:$0xff] }
 0x3b1   :  { %1243 = vmatprep.subr.mxu1 %v5356_v49  ;;  %1384 = vmatpush1.msra.mxu0 %v4568_v27  ;;  %v9071_v27 = vld [vmem:[#allocation6_spill] sm:$0xff] }
 0x3b2   :  { %1244 = vmatpush1.msra.mxu1 %v5363_v52  ;;  %1385 = vmatprep.subr.mxu0 %v4575_v24  ;;  %v9072_v24 = vld [vmem:[#allocation38_spill] sm:$0xff] }
 0x3b3   :  { %1245 = vmatprep.subr.mxu1 %v5370_v40  ;;  %1386 = vmatpush1.msra.mxu0 %v4582_v58  ;;  %v9073_v58 = vld [vmem:[#allocation7_spill] sm:$0xff] }
 0x3b4   :  { %1246 = vmatpush1.msra.mxu1 %v5377_v38  ;;  %1387 = vmatprep.subr.mxu0 %v4589_v55  ;;  %v9074_v55 = vld [vmem:[#allocation40_spill] sm:$0xff] }
 0x3b5   :  { %1247 = vmatprep.subr.mxu1 %v5384_v48  ;;  %1388 = vmatpush1.msra.mxu0 %v4596_v22  ;;  %v9075_v22 = vld [vmem:[#allocation8_spill] sm:$0xff] }
 0x3b6   :  { %1248 = vmatpush1.msra.mxu1 %v5391_v30  ;;  %1389 = vmatprep.subr.mxu0 %v4603_v59  ;;  %v9076_v59 = vld [vmem:[#allocation42_spill] sm:$0xff] }
 0x3b7   :  { %1249 = vmatprep.subr.mxu1 %v5398_v63  ;;  %1390 = vmatpush1.msra.mxu0 %v4610_v62  ;;  %v9077_v62 = vld [vmem:[#allocation9_spill] sm:$0xff] }
 0x3b8   :  { %1250 = vmatpush1.msra.mxu1 %v5405_v28  ;;  %1391 = vmatprep.subr.mxu0 %v4617_v29  ;;  %v9078_v29 = vld [vmem:[#allocation44_spill] sm:$0xff] }
 0x3b9   :  { %1251 = vmatprep.subr.mxu1 %v5412_v50  ;;  %1392 = vmatpush1.msra.mxu0 %v4624_v57  ;;  %v9079_v57 = vld [vmem:[#allocation10_spill] sm:$0xff] }
 0x3ba   :  { %1252 = vmatpush1.msra.mxu1 %v5419_v34  ;;  %1393 = vmatprep.subr.mxu0 %v4631_v19  ;;  %v9080_v19 = vld [vmem:[#allocation46_spill] sm:$0xff] }
 0x3bb   :  { %1253 = vmatprep.subr.mxu1 %v5426_v46  ;;  %1394 = vmatpush1.msra.mxu0 %v9071_v27  ;;  %v9098_v27 = vld [vmem:[#allocation92_spill] sm:$0xff] }
 0x3bc   :  { %1254 = vmatpush1.msra.mxu1 %v5433_v44  ;;  %1395 = vmatprep.subr.mxu0 %v9072_v24  ;;  %v9099_v24 = vld [vmem:[#allocation23_spill] sm:$0xff] }
 0x3bd   :  { %1255 = vmatprep.subr.mxu1 %v5440_v36  ;;  %1396 = vmatpush1.msra.mxu0 %v9073_v58  ;;  %v9100_v58 = vld [vmem:[#allocation94_spill] sm:$0xff] }
 0x3be   :  { %1256 = vmatpush1.msra.mxu1 %v5447_v60  ;;  %1397 = vmatprep.subr.mxu0 %v9074_v55  ;;  %v9101_v55 = vld [vmem:[#allocation24_spill] sm:$0xff] }
 0x3bf   :  { %1257 = vmatprep.subr.mxu1 %v5454_v42  ;;  %1398 = vmatpush1.msra.mxu0 %v9075_v22  ;;  %v9102_v22 = vld [vmem:[#allocation117_spill] sm:$0xff] }
 0x3c0   :  { %1258 = vmatpush1.msra.mxu1 %v5461_v54  ;;  %1399 = vmatprep.subr.mxu0 %v9076_v59  ;;  %v9103_v59 = vld [vmem:[#allocation25_spill] sm:$0xff] }
 0x3c1   :  { %1259 = vmatprep.subr.mxu1 %v5468_v25  ;;  %1400 = vmatpush1.msra.mxu0 %v9077_v62  ;;  %v9104_v62 = vld [vmem:[#allocation118_spill] sm:$0xff] }
 0x3c2   :  { %1260 = vmatpush1.msra.mxu1 %v5475_v33  ;;  %1401 = vmatprep.subr.mxu0 %v9078_v29  ;;  %v9105_v29 = vld [vmem:[#allocation26_spill] sm:$0xff] }
 0x3c3   :  { %1261 = vmatprep.subr.mxu1 %v5482_v56  ;;  %1402 = vmatpush1.msra.mxu0 %v9079_v57  ;;  %v9106_v57 = vld [vmem:[#allocation119_spill] sm:$0xff] }
 0x3c4   :  { %1262 = vmatpush1.msra.mxu1 %v5489_v41  ;;  %1403 = vmatprep.subr.mxu0 %v9080_v19  ;;  %v9107_v19 = vld [vmem:[#allocation27_spill] sm:$0xff] }
 0x3c5   :  { %1263 = vmatprep.subr.mxu1 %v5496_v4  ;;  %1404 = vmatpush1.msra.mxu0 %v9081_v23  ;;  %v9108_v23 = vld [vmem:[#allocation120_spill] sm:$0xff] }
 0x3c6   :  { %1264 = vmatpush1.msra.mxu1 %v5503_v31  ;;  %1405 = vmatprep.subr.mxu0 %v9082_v16  ;;  %v9109_v16 = vld [vmem:[#allocation28_spill] sm:$0xff] }
 0x3c7   :  { %1265 = vmatprep.subr.mxu1 %v5510_v45  ;;  %1406 = vmatpush1.msra.mxu0 %v9083_v9  ;;  %v9110_v9 = vld [vmem:[#allocation121_spill] sm:$0xff] }
 0x3c8   :  { %1266 = vmatpush1.msra.mxu1 %v5517_v39  ;;  %1407 = vmatprep.subr.mxu0 %v9084_v8  ;;  %v9111_v8 = vld [vmem:[#allocation29_spill] sm:$0xff] }
 0x3c9   :  { %1267 = vmatprep.subr.mxu1 %v5524_v37  ;;  %1408 = vmatpush1.msra.mxu0 %v9085_v26  ;;  %v9112_v26 = vld [vmem:[#allocation122_spill] sm:$0xff] }
 0x3ca   :  { %1268 = vmatpush1.msra.mxu1 %v5531_v35  ;;  %1409 = vmatprep.subr.mxu0 %v9086_v7  ;;  %v9113_v7 = vld [vmem:[#allocation30_spill] sm:$0xff] }
 0x3cb   :  { %1269 = vmatprep.subr.mxu1 %v5538_v43  ;;  %1410 = vmatpush1.msra.mxu0 %v9087_v6  ;;  %v9114_v6 = vld [vmem:[#allocation123_spill] sm:$0xff] }
 0x3cc   :  { %1270 = vmatpush1.msra.mxu1 %v5545_v0  ;;  %1411 = vmatprep.subr.mxu0 %v9088_v15  ;;  %v9115_v15 = vld [vmem:[#allocation31_spill] sm:$0xff] }
 0x3cd   :  { %1271 = vmatprep.subr.mxu1 %v5552_v1  ;;  %1412 = vmatpush1.msra.mxu0 %v9089_v5  ;;  %v9116_v5 = vld [vmem:[#allocation124_spill] sm:$0xff] }
 0x3ce   :  { %1272 = vmatpush1.msra.mxu1 %v9090_v21  ;;  %1413 = vmatprep.subr.mxu0 %v9091_v13  ;;  %v9117_v13 = vld [vmem:[#allocation32_spill] sm:$0xff] }
 0x3cf   :  { %1273 = vmatprep.subr.mxu1 %v9092_v10  ;;  %1414 = vmatpush1.msra.mxu0 %v9093_v12  ;;  %v9118_v12 = vld [vmem:[#allocation125_spill] sm:$0xff] }
 0x3d0   :  { %1274 = vmatpush2.msra.mxu1 %v9094_v11  ;;  %1415 = vmatprep.subr.mxu0 %v9095_v14  ;;  %v9119_v14 = vld [vmem:[#allocation33_spill] sm:$0xff] }
 0x3d1   :  { %1275 = vmatprep.subr.mxu1 %v9096_v17  ;;  %1416 = vmatpush2.msra.mxu0 %v9097_v18  ;;  %v9120_v18 = vld [vmem:[#allocation126_spill] sm:$0xff] }
 0x3d2   :  { %1276 = vmatpush2.msra.mxu1 %v9098_v27  ;;  %1417 = vmatprep.subr.mxu0 %v9099_v24  ;;  %v9121_v24 = vld [vmem:[#allocation35_spill] sm:$0xff] }
 0x3d3   :  { %1277 = vmatprep.subr.mxu1 %v9100_v58  ;;  %1418 = vmatpush2.msra.mxu0 %v9101_v55  ;;  %v9122_v55 = vld [vmem:[#allocation127_spill] sm:$0xff] }
 0x3d4   :  { %1278 = vmatpush2.msra.mxu1 %v9102_v22  ;;  %1419 = vmatprep.subr.mxu0 %v9103_v59  ;;  %v9123_v59 = vld [vmem:[#allocation37_spill] sm:$0xff] }
 0x3d5   :  { %1279 = vmatprep.subr.mxu1 %v9104_v62  ;;  %1420 = vmatpush2.msra.mxu0 %v9105_v29  ;;  %v9124_v29 = vld [vmem:[#allocation128_spill] sm:$0xff] }
 0x3d6   :  { %1280 = vmatpush2.msra.mxu1 %v9106_v57  ;;  %1421 = vmatprep.subr.mxu0 %v9107_v19  ;;  %v9125_v19 = vld [vmem:[#allocation39_spill] sm:$0xff] }
 0x3d7   :  { %1281 = vmatprep.subr.mxu1 %v9108_v23  ;;  %1422 = vmatpush2.msra.mxu0 %v9109_v16  ;;  %v9126_v16 = vld [vmem:[#allocation129_spill] sm:$0xff] }
 0x3d8   :  { %1282 = vmatpush2.msra.mxu1 %v9110_v9  ;;  %1423 = vmatprep.subr.mxu0 %v9111_v8  ;;  %v9127_v8 = vld [vmem:[#allocation41_spill] sm:$0xff] }
 0x3d9   :  { %1283 = vmatprep.subr.mxu1 %v9112_v26  ;;  %1424 = vmatpush2.msra.mxu0 %v9113_v7  ;;  %v9128_v7 = vld [vmem:[#allocation130_spill] sm:$0xff] }
 0x3da   :  { %1284 = vmatpush2.msra.mxu1 %v9114_v6  ;;  %1425 = vmatprep.subr.mxu0 %v9115_v15  ;;  %v9129_v15 = vld [vmem:[#allocation43_spill] sm:$0xff] }
 0x3db   :  { %1285 = vmatprep.subr.mxu1 %v9116_v5  ;;  %1426 = vmatpush2.msra.mxu0 %v9117_v13  ;;  %v9130_v13 = vld [vmem:[#allocation131_spill] sm:$0xff] }
 0x3dc   :  { %1286 = vmatpush2.msra.mxu1 %v9118_v12  ;;  %1427 = vmatprep.subr.mxu0 %v9119_v14  ;;  %v9131_v14 = vld [vmem:[#allocation45_spill] sm:$0xff] }
 0x3dd   :  { %1287 = vmatprep.subr.mxu1 %v9120_v18  ;;  %1428 = vmatpush2.msra.mxu0 %v9121_v24  ;;  %v9132_v24 = vld [vmem:[#allocation132_spill] sm:$0xff] }
 0x3de   :  { %1288 = vmatpush2.msra.mxu1 %v9122_v55  ;;  %1429 = vmatprep.subr.mxu0 %v9123_v59  ;;  %v9133_v55 = vld [vmem:[#allocation47_spill] sm:$0xff]  ;;  %v9134_v59 = vld [vmem:[#allocation133_spill] sm:$0xff] }
 0x3df   :  { %1289 = vmatprep.subr.mxu1 %v9124_v29  ;;  %1430 = vmatpush2.msra.mxu0 %v9125_v19  ;;  %v9135_v29 = vld [vmem:[#allocation49_spill] sm:$0xff]  ;;  %v9136_v19 = vld [vmem:[#allocation134_spill] sm:$0xff] }
 0x3e0   :  { %1290 = vmatpush2.msra.mxu1 %v9126_v16  ;;  %1431 = vmatprep.subr.mxu0 %v9127_v8  ;;  %v9137_v16 = vld [vmem:[#allocation51_spill] sm:$0xff] }
 0x3e1   :  { %1291 = vmatprep.subr.mxu1 %v9128_v7  ;;  %1432 = vmatpush2.msra.mxu0 %v9129_v15  ;;  %v9138_v8 = vld [vmem:[#allocation135_spill] sm:$0xff]  ;;  %v9139_v7 = vld [vmem:[#allocation53_spill] sm:$0xff]  ;;  %v9140_v15 = vld [vmem:[#allocation136_spill] sm:$0xff] }
 0x3e2   :  { %1292 = vmatpush2.msra.mxu1 %v9130_v13  ;;  %1433 = vmatprep.subr.mxu0 %v9131_v14  ;;  %v9141_v13 = vld [vmem:[#allocation55_spill] sm:$0xff]  ;;  %v9142_v14 = vld [vmem:[#allocation137_spill] sm:$0xff] }
 0x3e3   :  { %1293 = vmatprep.subr.mxu1 %v9132_v24  ;;  %1434 = vmatpush2.msra.mxu0 %v9133_v55  ;;  %v9143_v24 = vld [vmem:[#allocation138_spill] sm:$0xff]  ;;  %v9144_v55 = vld [vmem:[#allocation139_spill] sm:$0xff] }
 0x3e4   :  { %1294 = vmatpush2.msra.mxu1 %v9134_v59  ;;  %1435 = vmatprep.subr.mxu0 %v9135_v29  ;;  %v9145_v59 = vld [vmem:[#allocation140_spill] sm:$0xff]  ;;  %v9146_v29 = vld [vmem:[#allocation141_spill] sm:$0xff] }
 0x3e5   :  { %1295 = vmatprep.subr.mxu1 %v9136_v19  ;;  %1436 = vmatpush2.msra.mxu0 %v9137_v16  ;;  %v9147_v19 = vld [vmem:[#allocation142_spill] sm:$0xff]  ;;  %v9148_v16 = vld [vmem:[#allocation143_spill] sm:$0xff] }
 0x3e6   :  { %1296 = vmatpush2.msra.mxu1 %v9138_v8  ;;  %1437 = vmatprep.subr.mxu0 %v9139_v7  ;;  %v9149_v8 = vld [vmem:[#allocation144_spill] sm:$0xff]  ;;  %v9150_v7 = vld [vmem:[#allocation145_spill] sm:$0xff] }
 0x3e7   :  { %1297 = vmatprep.subr.mxu1 %v9140_v15  ;;  %1438 = vmatpush2.msra.mxu0 %v9141_v13  ;;  %v9151_v15 = vld [vmem:[#allocation146_spill] sm:$0xff]  ;;  %v9152_v13 = vld [vmem:[#allocation147_spill] sm:$0xff] }
 0x3e8   :  { %1298 = vmatpush2.msra.mxu1 %v9142_v14  ;;  %1439 = vmatprep.subr.mxu0 %v9143_v24  ;;  %v9153_v14 = vld [vmem:[#allocation148_spill] sm:$0xff]  ;;  %v9154_v24 = vld [vmem:[#allocation149_spill] sm:$0xff] }
 0x3e9   :  { %1299 = vmatprep.subr.mxu1 %v9144_v55  ;;  %1440 = vmatpush2.msra.mxu0 %v9145_v59  ;;  %v9155_v55 = vld [vmem:[#allocation150_spill] sm:$0xff] }
 0x3ea   :  { %1300 = vmatpush2.msra.mxu1 %v9146_v29  ;;  %1441 = vmatprep.subr.mxu0 %v9147_v19  ;;  %v9156_v29 = vld [vmem:[#allocation57_spill] sm:$0xff]  ;;  %v9157_v19 = vld [vmem:[#allocation59_spill] sm:$0xff] }
 0x3eb   :  { %1301 = vmatprep.subr.mxu1 %v9148_v16  ;;  %1442 = vmatpush2.msra.mxu0 %v9149_v8  ;;  %v9158_v16 = vld [vmem:[#allocation151_spill] sm:$0xff]  ;;  %v9159_v8 = vld [vmem:[#allocation61_spill] sm:$0xff] }
 0x3ec   :  { %1302 = vmatpush2.msra.mxu1 %v9150_v7  ;;  %1443 = vmatprep.subr.mxu0 %v9151_v15  ;;  %v9160_v7 = vld [vmem:[#allocation152_spill] sm:$0xff]  ;;  %v9161_v15 = vld [vmem:[#allocation63_spill] sm:$0xff] }
 0x3ed   :  { %1303 = vmatprep.subr.mxu1 %v9152_v13  ;;  %1444 = vmatpush2.msra.mxu0 %v9153_v14  ;;  %v9162_v13 = vld [vmem:[#allocation66_spill] sm:$0xff]  ;;  %v9163_v14 = vld [vmem:[#allocation68_spill] sm:$0xff] }
 0x3ee   :  { %1304 = vmatpush2.msra.mxu1 %v9154_v24  ;;  %1445 = vmatprep.subr.mxu0 %v9155_v55  ;;  %v9164_v24 = vld [vmem:[#allocation70_spill] sm:$0xff]  ;;  %v9165_v55 = vld [vmem:[#allocation72_spill] sm:$0xff] }
 0x3ef   :  { %1306 = vmatmul.mubr.f32.vlgmr.msra.gmra.mxu1 %v5950_v3  ;;  %1454 = vmatprep.subr.mxu1 %v9156_v29  ;;  %v9166_v3 = vld [vmem:[#allocation74_spill] sm:$0xff]  ;;  %v9167_v29 = vld [vmem:[#allocation76_spill] sm:$0xff] }
 0x3f0   :  { %1455 = vmatpush1.msra.mxu1 %v9157_v19  ;;  %1446 = vmatpush2.msra.mxu0 %v9158_v16  ;;  %v9168_v19 = vld [vmem:[#allocation78_spill] sm:$0xff]  ;;  %v9169_v16 = vld [vmem:[#allocation80_spill] sm:$0xff] }
 0x3f1   :  { %1456 = vmatprep.subr.mxu1 %v9159_v8  ;;  %1525 = vmatprep.subr.mxu0 %v9160_v7  ;;  %v9170_v8 = vld [vmem:[#allocation82_spill] sm:$0xff]  ;;  %v9171_v7 = vld [vmem:[#allocation65_spill] sm:$0xff] }
 0x3f2   :  { %1457 = vmatpush1.msra.mxu1 %v9161_v15  ;;  %v9172_v15 = vld [vmem:[#allocation67_spill] sm:$0xff] }
 0x3f3   :  { %1458 = vmatprep.subr.mxu1 %v9162_v13  ;;  %v9173_v13 = vld [vmem:[#allocation69_spill] sm:$0xff] }
 0x3f4   :  { %1459 = vmatpush1.msra.mxu1 %v9163_v14  ;;  %v9174_v14 = vld [vmem:[#allocation71_spill] sm:$0xff] }
 0x3f5   :  { %1460 = vmatprep.subr.mxu1 %v9164_v24  ;;  %v9175_v24 = vld [vmem:[#allocation73_spill] sm:$0xff] }
 0x3f6   :  { %1461 = vmatpush1.msra.mxu1 %v9165_v55  ;;  %v9176_v55 = vld [vmem:[#allocation75_spill] sm:$0xff] }
 0x3f7   :  { %1462 = vmatprep.subr.mxu1 %v9166_v3  ;;  %v9177_v3 = vld [vmem:[#allocation77_spill] sm:$0xff] }
 0x3f8   :  { %1463 = vmatpush1.msra.mxu1 %v9167_v29  ;;  %v9178_v29 = vld [vmem:[#allocation79_spill] sm:$0xff] }
 0x3f9   :  { %1464 = vmatprep.subr.mxu1 %v9168_v19  ;;  %v9179_v19 = vld [vmem:[#allocation81_spill] sm:$0xff] }
 0x3fa   :  { %1465 = vmatpush1.msra.mxu1 %v9169_v16  ;;  %v9180_v16 = vld [vmem:[#allocation83_spill] sm:$0xff] }
 0x3fb   :  { %1466 = vmatprep.subr.mxu1 %v9170_v8  ;;  %v9181_v8 = vld [vmem:[#allocation85_spill] sm:$0xff] }
 0x3fc   :  { %1467 = vmatpush1.msra.mxu1 %v9171_v7  ;;  %v9182_v7 = vld [vmem:[#allocation87_spill] sm:$0xff] }
 0x3fd   :  { %1468 = vmatprep.subr.mxu1 %v9172_v15  ;;  %v9183_v15 = vld [vmem:[#allocation89_spill] sm:$0xff] }
 0x3fe   :  { %1469 = vmatpush1.msra.mxu1 %v9173_v13  ;;  %v9184_v13 = vld [vmem:[#allocation91_spill] sm:$0xff] }
 0x3ff   :  { %1470 = vmatprep.subr.mxu1 %v9174_v14  ;;  %v9185_v14 = vld [vmem:[#allocation93_spill] sm:$0xff] }
 0x400   :  { %1471 = vmatpush1.msra.mxu1 %v9175_v24  ;;  %v9186_v24 = vld [vmem:[#allocation95_spill] sm:$0xff] }
 0x401   :  { %1472 = vmatprep.subr.mxu1 %v9176_v55  ;;  %v9187_v55 = vld [vmem:[#allocation96_spill] sm:$0xff] }
 0x402   :  { %1473 = vmatpush1.msra.mxu1 %v9177_v3  ;;  %v9188_v3 = vld [vmem:[#allocation97_spill] sm:$0xff] }
 0x403   :  { %1474 = vmatprep.subr.mxu1 %v9178_v29  ;;  %v9189_v29 = vld [vmem:[#allocation50_spill] sm:$0xff] }
 0x404   :  { %1475 = vmatpush1.msra.mxu1 %v9179_v19  ;;  %v9190_v19 = vld [vmem:[#allocation98_spill] sm:$0xff] }
 0x405   :  { %1476 = vmatprep.subr.mxu1 %v9180_v16  ;;  %v9191_v16 = vld [vmem:[#allocation52_spill] sm:$0xff] }
 0x406   :  { %1477 = vmatpush1.msra.mxu1 %v9181_v8  ;;  %v9192_v8 = vld [vmem:[#allocation99_spill] sm:$0xff] }
 0x407   :  { %1478 = vmatprep.subr.mxu1 %v9182_v7  ;;  %v9193_v7 = vld [vmem:[#allocation54_spill] sm:$0xff] }
 0x408   :  { %1479 = vmatpush1.msra.mxu1 %v9183_v15  ;;  %v9194_v15 = vld [vmem:[#allocation100_spill] sm:$0xff] }
 0x409   :  { %1480 = vmatprep.subr.mxu1 %v9184_v13  ;;  %v9195_v13 = vld [vmem:[#allocation56_spill] sm:$0xff] }
 0x40a   :  { %1481 = vmatpush1.msra.mxu1 %v9185_v14  ;;  %v9196_v14 = vld [vmem:[#allocation101_spill] sm:$0xff] }
 0x40b   :  { %1482 = vmatprep.subr.mxu1 %v9186_v24  ;;  %v9197_v24 = vld [vmem:[#allocation58_spill] sm:$0xff] }
 0x40c   :  { %1483 = vmatpush1.msra.mxu1 %v9187_v55  ;;  %v9198_v55 = vld [vmem:[#allocation102_spill] sm:$0xff] }
 0x40d   :  { %1484 = vmatprep.subr.mxu1 %v9188_v3  ;;  %v9199_v3 = vld [vmem:[#allocation60_spill] sm:$0xff] }
 0x40e   :  { %1485 = vmatpush1.msra.mxu1 %v9189_v29  ;;  %v9200_v29 = vld [vmem:[#allocation62_spill] sm:$0xff] }
 0x40f   :  { %1486 = vmatprep.subr.mxu1 %v9190_v19  ;;  %v9201_v19 = vld [vmem:[#allocation64_spill] sm:$0xff] }
 0x410   :  { %1487 = vmatpush2.msra.mxu1 %v9191_v16  ;;  %v9202_v16 = vld [vmem:[#allocation103_spill] sm:$0xff] }
 0x411   :  { %1488 = vmatprep.subr.mxu1 %v9192_v8  ;;  %v9203_v8 = vld [vmem:[#allocation104_spill] sm:$0xff] }
 0x412   :  { %1489 = vmatpush2.msra.mxu1 %v9193_v7  ;;  %v9204_v7 = vld [vmem:[#allocation105_spill] sm:$0xff] }
 0x413   :  { %1490 = vmatprep.subr.mxu1 %v9194_v15  ;;  %v9205_v15 = vld [vmem:[#allocation106_spill] sm:$0xff] }
 0x414   :  { %1491 = vmatpush2.msra.mxu1 %v9195_v13  ;;  %v9206_v13 = vld [vmem:[#allocation107_spill] sm:$0xff] }
 0x415   :  { %1492 = vmatprep.subr.mxu1 %v9196_v14  ;;  %v9207_v14 = vld [vmem:[#allocation108_spill] sm:$0xff] }
 0x416   :  { %1493 = vmatpush2.msra.mxu1 %v9197_v24  ;;  %v9208_v24 = vld [vmem:[#allocation109_spill] sm:$0xff] }
 0x417   :  { %1494 = vmatprep.subr.mxu1 %v9198_v55  ;;  %v9209_v55 = vld [vmem:[#allocation110_spill] sm:$0xff] }
 0x418   :  { %1495 = vmatpush2.msra.mxu1 %v9199_v3  ;;  %v9210_v3 = vld [vmem:[#allocation111_spill] sm:$0xff] }
 0x419   :  { %1496 = vmatprep.subr.mxu1 %v9200_v29  ;;  %v9211_v29 = vld [vmem:[#allocation112_spill] sm:$0xff] }
 0x41a   :  { %1497 = vmatpush2.msra.mxu1 %v9201_v19  ;;  %v9212_v19 = vld [vmem:[#allocation113_spill] sm:$0xff] }
 0x41b   :  { %1498 = vmatprep.subr.mxu1 %v9202_v16  ;;  %v9213_v16 = vld [vmem:[#allocation114_spill] sm:$0xff] }
 0x41c   :  { %1499 = vmatpush2.msra.mxu1 %v9203_v8  ;;  %v9214_v8 = vld [vmem:[#allocation115_spill] sm:$0xff] }
 0x41d   :  { %1500 = vmatprep.subr.mxu1 %v9204_v7  ;;  %v9215_v7 = vld [vmem:[#allocation116_spill] sm:$0xff] }
 0x41e   :  { %1501 = vmatpush2.msra.mxu1 %v9205_v15  ;;  %v9216_v15 = vld [vmem:[#allocation153_spill] sm:$0xff] }
 0x41f   :  { %1502 = vmatprep.subr.mxu1 %v9206_v13  ;;  %v9217_v13 = vld [vmem:[#allocation154_spill] sm:$0xff] }
 0x420   :  { %1503 = vmatpush2.msra.mxu1 %v9207_v14  ;;  %v9218_v14 = vld [vmem:[#allocation155_spill] sm:$0xff] }
 0x421   :  { %1504 = vmatprep.subr.mxu1 %v9208_v24  ;;  %v9219_v24 = vld [vmem:[#allocation156_spill] sm:$0xff] }
 0x422   :  { %1505 = vmatpush2.msra.mxu1 %v9209_v55  ;;  %v9220_v55 = vld [vmem:[#allocation157_spill] sm:$0xff] }
 0x423   :  { %1506 = vmatprep.subr.mxu1 %v9210_v3  ;;  %v9221_v3 = vld [vmem:[#allocation158_spill] sm:$0xff] }
 0x424   :  { %1507 = vmatpush2.msra.mxu1 %v9211_v29  ;;  %v6151_v29 = vld [vmem:[%s7975_s1 + $0x2d8] sm:$0xff] }
 0x425   :  { %1508 = vmatprep.subr.mxu1 %v9212_v19  ;;  %9222 = vst [vmem:[#allocation34_spill] sm:$0xff] %v6151_v29 }
 0x426   :  { %1509 = vmatpush2.msra.mxu1 %v9213_v16 }
 0x427   :  { %1510 = vmatprep.subr.mxu1 %v9214_v8  ;;  %v9223_v8 = vld [vmem:[#allocation36_spill] sm:$0xff] }
 0x428   :  { %1511 = vmatpush2.msra.mxu1 %v9215_v7 }
 0x429   :  { %1512 = vmatprep.subr.mxu1 %v9216_v15 }
 0x42a   :  { %1513 = vmatpush2.msra.mxu1 %v9217_v13  ;;  %v9224_v13 = vld [vmem:[#allocation5_spill] sm:$0xff] }
 0x42b   :  { %1514 = vmatprep.subr.mxu1 %v9218_v14 }
 0x42c   :  { %1515 = vmatpush2.msra.mxu1 %v9219_v24 }
 0x42d   :  { %1516 = vmatprep.subr.mxu1 %v9220_v55 }
 0x42e   :  { %1517 = vmatpush2.msra.mxu1 %v9221_v3  ;;  %v2650_v3 = vld [vmem:[%s7974_s0 + $0x24] sm:$0xff] }
 0x42f   :  { %1667 = vmatprep.subr.mxu1 %v6151_v29 }
 0x46f   :  { %v1165_v19 = vpop.f32.mrf.mxu1  ;;  %v1236_v59 = vpop.f32.mrf.mxu0 }
 0x470   :  { %v1166_v15 = vadd.f32 %v1165_v19, %v9224_v13  ;;  %v1237_v29 = vadd.f32 %v1236_v59, %v4536_v20 }
 0x471   :  { %v1167_v16 = vpop.f32.mrf.mxu1  ;;  %v1238_v55 = vpop.f32.mrf.mxu0 }
 0x472   :  { %v1168_v7 = vadd.f32 %v1167_v16, %v9223_v8  ;;  %v1239_v12 = vadd.f32 %v1238_v55, %v4538_v47  ;;  %v1331_v16 = vrot.slane %v2650_v3, 4 }
 0x474   :  { %v1314_v14 = vcombine.low %v1166_v15, %v1168_v7  ;;  %v1335_v6 = vcombine.low %v1237_v29, %v1239_v12 }
 0x476   :  { %v1321_v24 = vrot.slane %v1314_v14, %v4530_v61  ;;  %v1342_v19 = vrot.slane %v1335_v6, %v4530_v61  ;;  %v2651_v6 = vld [vmem:[%s7974_s0 + $0x2c] sm:$0xf] }
 0x478   :  { %v1323_v18 = vadd.f32 %v2650_v3, %v1321_v24  ;;  %v1344_v15 = vadd.f32 %v1342_v19, %v1331_v16 }
 0x47a   :  { %v2652_v5 = vmul.f32 -1.442695, %v1323_v18  ;;  %v2653_v7 = vmul.f32 -1.442695, %v1344_v15 }
 0x47c   :  { %2739 = vpow2.f32 %v2652_v5 }
 0x47d   :  { %2741 = vpow2.f32 %v2653_v7 }
 0x489   :  { %v2740_v13 = vpop.eup %2739 }
 0x48a   :  { %v1327_v14 = vadd.f32 1.0, %v2740_v13  ;;  %v2742_v26 = vpop.eup %2741 }
 0x48b   :  { %v1348_v59 = vadd.f32 1.0, %v2742_v26 }
 0x48c   :  { %2743 = vrcp.f32 %v1327_v14  ;;  %v6192_v14 = vld [vmem:[%s7975_s1 + $0x2a8] sm:$0xff] }
 0x48d   :  { %2745 = vrcp.f32 %v1348_v59  ;;  %v6472_v59 = vld [vmem:[%s7975_s1 + $0x4e8] sm:$0xff] }
 0x48e   :  { %9256 = vst [vmem:[#allocation23_spill] sm:$0xff] %v6472_v59 }
 0x499   :  { %v2744_v12 = vpop.eup %2743 }
 0x49a   :  { %v2746_v29 = vpop.eup %2745 }
 0x49b   :  { %v1365_v16 = vsub.f32 1.0, %v2746_v29 }
 0x4af   :  { %v1307_v8 = vpop.f32.mrf.mxu1 }
 0x4b0   :  { %v1308_v24 = vadd.f32 %v1307_v8, %v4543_v53  ;;  %v1367_v8 = vmul.f32 %v2746_v29, %v5946_v2  ;;  %v6185_v2 = vld [vmem:[%s7975_s1 + $0x2d0] sm:$0xff] }
 0x4b1   :  { %v1309_v9 = vpop.f32.mrf.mxu1  ;;  %v9263_v29 = vld [vmem:[#allocation127_spill] sm:$0xff] }
 0x4b2   :  { %v1310_v55 = vadd.f32 %v1309_v9, %v4545_v51 }
 0x4b4   :  { %v1353_v18 = vcombine.low %v1308_v24, %v1310_v55  ;;  %v9253_v24 = vld [vmem:[#allocation122_spill] sm:$0xff]  ;;  %v9255_v55 = vld [vmem:[#allocation123_spill] sm:$0xff] }
 0x4b6   :  { %v1360_v5 = vrot.slane %v1353_v18, %v4530_v61  ;;  %v9257_v18 = vld [vmem:[#allocation124_spill] sm:$0xff] }
 0x4b8   :  { %v1362_v3 = vmul.f32 %v2744_v12, %v1360_v5  ;;  %v6479_v5 = vld [vmem:[%s7975_s1 + $0x4e0] sm:$0xff] }
 0x4b9   :  { %9258 = vst [vmem:[#allocation94_spill] sm:$0xff] %v6479_v5  ;;  %v9259_v12 = vld [vmem:[#allocation125_spill] sm:$0xff] }
 0x4ba   :  { %v1363_v13 = vadd.f32 %v2651_v6, %v1362_v3  ;;  %v6486_v6 = vld [vmem:[%s7975_s1 + $0x4b8] sm:$0xff]  ;;  %v9261_v3 = vld [vmem:[#allocation126_spill] sm:$0xff] }
 0x4bb   :  { %9260 = vst [vmem:[#allocation24_spill] sm:$0xff] %v6486_v6 }
 0x4bc   :  { %2747 = vtanh.f32 %v1363_v13  ;;  %v6493_v13 = vld [vmem:[%s7975_s1 + $0x4b0] sm:$0xff] }
 0x4bd   :  { %9262 = vst [vmem:[#allocation117_spill] sm:$0xff] %v6493_v13 }
 0x4c9   :  { %v2748_v19 = vpop.eup %2747 }
 0x4ca   :  { %v1366_v15 = vmul.f32 %v2748_v19, %v1365_v16  ;;  %v6500_v16 = vld [vmem:[%s7975_s1 + $0x488] sm:$0xff]  ;;  %v9265_v19 = vld [vmem:[#allocation128_spill] sm:$0xff] }
 0x4cb   :  { %9264 = vst [vmem:[#allocation25_spill] sm:$0xff] %v6500_v16 }
 0x4cc   :  { %v6170_v9 = vadd.f32 %v1367_v8, %v1366_v15  ;;  %v6507_v15 = vld [vmem:[%s7975_s1 + $0x480] sm:$0xff] }
 0x4cd   :  { %9266 = vst [vmem:[#allocation118_spill] sm:$0xff] %v6507_v15  ;;  %v9267_v8 = vld [vmem:[#allocation129_spill] sm:$0xff] }
 0x4ce   :  { %v6174_v26 = vrot.slane %v6170_v9, %v4530_v61 }
 0x4d0   :  { %v1380_v7 = vcombine.high %v6174_v26, %v6174_v26 }
 0x4d2   :  { %1447 = vmatprep.mubr.f32.mxu0 %v1380_v7  ;;  %1518 = vmatprep.mubr.f32.mxu1 %v1380_v7 }
 0x4d3   :  { %1448 = vmatmul.mubr.f32.vlgmr.msra.gmra.mxu0 %v6174_v26  ;;  %1519 = vmatmul.mubr.f32.vlgmr.msra.gmra.mxu1 %v6174_v26 }
 0x4d4   :  { %1526 = vmatpush1.msra.mxu0 %v5350_v32  ;;  %1589 = vmatprep.mubr.f32.mxu0 %v1380_v7  ;;  %v6199_v32 = vld [vmem:[%s7975_s1 + $0x2a0] sm:$0xff]  ;;  %v6514_v7 = vld [vmem:[%s7975_s1 + $0x458] sm:$0xff] }
 0x4d5   :  { %1527 = vmatprep.subr.mxu0 %v5356_v49  ;;  %1668 = vmatpush1.msra.mxu1 %v6185_v2  ;;  %v6206_v49 = vld [vmem:[%s7975_s1 + $0x278] sm:$0xff]  ;;  %9268 = vst [vmem:[#allocation26_spill] sm:$0xff] %v6514_v7 }
 0x4d6   :  { %1528 = vmatpush1.msra.mxu0 %v5363_v52  ;;  %1669 = vmatprep.subr.mxu1 %v6192_v14  ;;  %v6213_v52 = vld [vmem:[%s7975_s1 + $0x270] sm:$0xff] }
 0x4d7   :  { %1529 = vmatprep.subr.mxu0 %v5370_v40  ;;  %1670 = vmatpush1.msra.mxu1 %v6199_v32  ;;  %v6220_v40 = vld [vmem:[%s7975_s1 + $0x248] sm:$0xff] }
 0x4d8   :  { %1530 = vmatpush1.msra.mxu0 %v5377_v38  ;;  %1671 = vmatprep.subr.mxu1 %v6206_v49  ;;  %v6227_v38 = vld [vmem:[%s7975_s1 + $0x240] sm:$0xff] }
 0x4d9   :  { %1531 = vmatprep.subr.mxu0 %v5384_v48  ;;  %1672 = vmatpush1.msra.mxu1 %v6213_v52  ;;  %v6234_v48 = vld [vmem:[%s7975_s1 + $0x218] sm:$0xff] }
 0x4da   :  { %1532 = vmatpush1.msra.mxu0 %v5391_v30  ;;  %1673 = vmatprep.subr.mxu1 %v6220_v40  ;;  %v6241_v30 = vld [vmem:[%s7975_s1 + $0x210] sm:$0xff] }
 0x4db   :  { %1533 = vmatprep.subr.mxu0 %v5398_v63  ;;  %1674 = vmatpush1.msra.mxu1 %v6227_v38  ;;  %v6248_v63 = vld [vmem:[%s7975_s1 + $0x1e8] sm:$0xff] }
 0x4dc   :  { %1534 = vmatpush1.msra.mxu0 %v5405_v28  ;;  %1675 = vmatprep.subr.mxu1 %v6234_v48  ;;  %v6255_v28 = vld [vmem:[%s7975_s1 + $0x1e0] sm:$0xff] }
 0x4dd   :  { %1535 = vmatprep.subr.mxu0 %v5412_v50  ;;  %1676 = vmatpush1.msra.mxu1 %v6241_v30  ;;  %v6262_v50 = vld [vmem:[%s7975_s1 + $0x1b8] sm:$0xff] }
 0x4de   :  { %1536 = vmatpush1.msra.mxu0 %v5419_v34  ;;  %1677 = vmatprep.subr.mxu1 %v6248_v63  ;;  %v6269_v34 = vld [vmem:[%s7975_s1 + $0x1b0] sm:$0xff] }
 0x4df   :  { %1537 = vmatprep.subr.mxu0 %v5426_v46  ;;  %1678 = vmatpush1.msra.mxu1 %v6255_v28  ;;  %v6276_v46 = vld [vmem:[%s7975_s1 + $0x188] sm:$0xff] }
 0x4e0   :  { %1538 = vmatpush1.msra.mxu0 %v5433_v44  ;;  %1679 = vmatprep.subr.mxu1 %v6262_v50  ;;  %9225 = vst [vmem:[#allocation6_spill] sm:$0xff] %v6276_v46  ;;  %v6283_v44 = vld [vmem:[%s7975_s1 + $0x180] sm:$0xff] }
 0x4e1   :  { %1539 = vmatprep.subr.mxu0 %v5440_v36  ;;  %1680 = vmatpush1.msra.mxu1 %v6269_v34  ;;  %9226 = vst [vmem:[#allocation38_spill] sm:$0xff] %v6283_v44  ;;  %v6304_v36 = vld [vmem:[%s7975_s1 + $0x128] sm:$0xff] }
 0x4e2   :  { %1540 = vmatpush1.msra.mxu0 %v5447_v60  ;;  %1681 = vmatprep.subr.mxu1 %v6276_v46  ;;  %v6290_v60 = vld [vmem:[%s7975_s1 + $0x158] sm:$0xff]  ;;  %9229 = vst [vmem:[#allocation8_spill] sm:$0xff] %v6304_v36 }
 0x4e3   :  { %1541 = vmatprep.subr.mxu0 %v5454_v42  ;;  %1682 = vmatpush1.msra.mxu1 %v6283_v44  ;;  %9227 = vst [vmem:[#allocation7_spill] sm:$0xff] %v6290_v60  ;;  %v6297_v42 = vld [vmem:[%s7975_s1 + $0x150] sm:$0xff] }
 0x4e4   :  { %1542 = vmatpush1.msra.mxu0 %v5461_v54  ;;  %1683 = vmatprep.subr.mxu1 %v6290_v60  ;;  %9228 = vst [vmem:[#allocation40_spill] sm:$0xff] %v6297_v42  ;;  %v6402_v54 = vld [vmem:[%s7975_s1 + $0x5d8] sm:$0xff] }
 0x4e5   :  { %1543 = vmatprep.subr.mxu0 %v5468_v25  ;;  %1684 = vmatpush1.msra.mxu1 %v6297_v42  ;;  %v6311_v25 = vld [vmem:[%s7975_s1 + $0x120] sm:$0xff]  ;;  %9243 = vst [vmem:[#allocation18_spill] sm:$0xff] %v6402_v54 }
 0x4e6   :  { %1544 = vmatpush1.msra.mxu0 %v5475_v33  ;;  %1685 = vmatprep.subr.mxu1 %v6304_v36  ;;  %9230 = vst [vmem:[#allocation42_spill] sm:$0xff] %v6311_v25  ;;  %v6318_v33 = vld [vmem:[%s7975_s1 + $0xf8] sm:$0xff] }
 0x4e7   :  { %1545 = vmatprep.subr.mxu0 %v5482_v56  ;;  %1686 = vmatpush1.msra.mxu1 %v6311_v25  ;;  %9231 = vst [vmem:[#allocation9_spill] sm:$0xff] %v6318_v33  ;;  %v6325_v56 = vld [vmem:[%s7975_s1 + $0xf0] sm:$0xff] }
 0x4e8   :  { %1546 = vmatpush1.msra.mxu0 %v5489_v41  ;;  %1687 = vmatprep.subr.mxu1 %v6318_v33  ;;  %9232 = vst [vmem:[#allocation44_spill] sm:$0xff] %v6325_v56  ;;  %v6332_v41 = vld [vmem:[%s7975_s1 + $0xc8] sm:$0xff] }
 0x4e9   :  { %1547 = vmatprep.subr.mxu0 %v5496_v4  ;;  %1688 = vmatpush1.msra.mxu1 %v6325_v56  ;;  %9233 = vst [vmem:[#allocation10_spill] sm:$0xff] %v6332_v41  ;;  %v6339_v4 = vld [vmem:[%s7975_s1 + $0xc0] sm:$0xff] }
 0x4ea   :  { %1548 = vmatpush1.msra.mxu0 %v5503_v31  ;;  %1689 = vmatprep.subr.mxu1 %v6332_v41  ;;  %9234 = vst [vmem:[#allocation46_spill] sm:$0xff] %v6339_v4  ;;  %v6346_v31 = vld [vmem:[%s7975_s1 + $0x98] sm:$0xff] }
 0x4eb   :  { %1549 = vmatprep.subr.mxu0 %v5510_v45  ;;  %1690 = vmatpush1.msra.mxu1 %v6339_v4  ;;  %9235 = vst [vmem:[#allocation11_spill] sm:$0xff] %v6346_v31  ;;  %v6353_v45 = vld [vmem:[%s7975_s1 + $0x90] sm:$0xff] }
 0x4ec   :  { %1550 = vmatpush1.msra.mxu0 %v5517_v39  ;;  %1691 = vmatprep.subr.mxu1 %v6346_v31  ;;  %9236 = vst [vmem:[#allocation48_spill] sm:$0xff] %v6353_v45  ;;  %v6360_v39 = vld [vmem:[%s7975_s1 + $0x68] sm:$0xff] }
 0x4ed   :  { %1551 = vmatprep.subr.mxu0 %v5524_v37  ;;  %1692 = vmatpush1.msra.mxu1 %v6353_v45  ;;  %9237 = vst [vmem:[#allocation12_spill] sm:$0xff] %v6360_v39  ;;  %v6367_v37 = vld [vmem:[%s7975_s1 + $0x60] sm:$0xff] }
 0x4ee   :  { %1552 = vmatpush1.msra.mxu0 %v5531_v35  ;;  %1693 = vmatprep.subr.mxu1 %v6360_v39  ;;  %9238 = vst [vmem:[#allocation13_spill] sm:$0xff] %v6367_v37  ;;  %v6374_v35 = vld [vmem:[%s7975_s1 + $0x38] sm:$0xff] }
 0x4ef   :  { %1553 = vmatprep.subr.mxu0 %v5538_v43  ;;  %1694 = vmatpush1.msra.mxu1 %v6367_v37  ;;  %9239 = vst [vmem:[#allocation14_spill] sm:$0xff] %v6374_v35  ;;  %v6381_v43 = vld [vmem:[%s7975_s1 + $0x30] sm:$0xff] }
 0x4f0   :  { %1554 = vmatpush1.msra.mxu0 %v5545_v0  ;;  %1695 = vmatprep.subr.mxu1 %v6374_v35  ;;  %9240 = vst [vmem:[#allocation15_spill] sm:$0xff] %v6381_v43  ;;  %v6388_v0 = vld [vmem:[%s7975_s1 + $0x8] sm:$0xff] }
 0x4f1   :  { %1555 = vmatprep.subr.mxu0 %v5552_v1  ;;  %1696 = vmatpush1.msra.mxu1 %v6381_v43  ;;  %9241 = vst [vmem:[#allocation16_spill] sm:$0xff] %v6388_v0  ;;  %v6395_v1 = vld [vmem:[%s7975_s1] sm:$0xff] }
 0x4f2   :  { %1556 = vmatpush1.msra.mxu0 %v9090_v21  ;;  %1697 = vmatprep.subr.mxu1 %v6388_v0  ;;  %9242 = vst [vmem:[#allocation17_spill] sm:$0xff] %v6395_v1  ;;  %v6409_v21 = vld [vmem:[%s7975_s1 + $0x5d0] sm:$0xff] }
 0x4f3   :  { %1557 = vmatprep.subr.mxu0 %v9092_v10  ;;  %1698 = vmatpush1.msra.mxu1 %v6395_v1  ;;  %9244 = vst [vmem:[#allocation84_spill] sm:$0xff] %v6409_v21  ;;  %v6416_v10 = vld [vmem:[%s7975_s1 + $0x5a8] sm:$0xff] }
 0x4f4   :  { %1558 = vmatpush2.msra.mxu0 %v9094_v11  ;;  %1699 = vmatprep.subr.mxu1 %v6402_v54  ;;  %9245 = vst [vmem:[#allocation19_spill] sm:$0xff] %v6416_v10  ;;  %v6423_v11 = vld [vmem:[%s7975_s1 + $0x5a0] sm:$0xff] }
 0x4f5   :  { %1559 = vmatprep.subr.mxu0 %v9096_v17  ;;  %1700 = vmatpush2.msra.mxu1 %v6409_v21  ;;  %9246 = vst [vmem:[#allocation86_spill] sm:$0xff] %v6423_v11  ;;  %v6430_v17 = vld [vmem:[%s7975_s1 + $0x578] sm:$0xff] }
 0x4f6   :  { %1560 = vmatpush2.msra.mxu0 %v9098_v27  ;;  %1701 = vmatprep.subr.mxu1 %v6416_v10  ;;  %9247 = vst [vmem:[#allocation20_spill] sm:$0xff] %v6430_v17  ;;  %v6437_v27 = vld [vmem:[%s7975_s1 + $0x570] sm:$0xff] }
 0x4f7   :  { %1561 = vmatprep.subr.mxu0 %v9100_v58  ;;  %1702 = vmatpush2.msra.mxu1 %v6423_v11  ;;  %9248 = vst [vmem:[#allocation88_spill] sm:$0xff] %v6437_v27  ;;  %v6444_v58 = vld [vmem:[%s7975_s1 + $0x548] sm:$0xff] }
 0x4f8   :  { %1562 = vmatpush2.msra.mxu0 %v9102_v22  ;;  %1703 = vmatprep.subr.mxu1 %v6430_v17  ;;  %9249 = vst [vmem:[#allocation21_spill] sm:$0xff] %v6444_v58  ;;  %v6451_v22 = vld [vmem:[%s7975_s1 + $0x540] sm:$0xff] }
 0x4f9   :  { %1563 = vmatprep.subr.mxu0 %v9104_v62  ;;  %1704 = vmatpush2.msra.mxu1 %v6437_v27  ;;  %9250 = vst [vmem:[#allocation90_spill] sm:$0xff] %v6451_v22  ;;  %v9251_v62 = vld [vmem:[#allocation121_spill] sm:$0xff] }
 0x4fa   :  { %1564 = vmatpush2.msra.mxu0 %v9106_v57  ;;  %1705 = vmatprep.subr.mxu1 %v6444_v58  ;;  %v6458_v57 = vld [vmem:[%s7975_s1 + $0x518] sm:$0xff] }
 0x4fb   :  { %1565 = vmatprep.subr.mxu0 %v9108_v23  ;;  %1706 = vmatpush2.msra.mxu1 %v6451_v22  ;;  %9252 = vst [vmem:[#allocation22_spill] sm:$0xff] %v6458_v57  ;;  %v6465_v23 = vld [vmem:[%s7975_s1 + $0x510] sm:$0xff] }
 0x4fc   :  { %1566 = vmatpush2.msra.mxu0 %v9251_v62  ;;  %1707 = vmatprep.subr.mxu1 %v6458_v57  ;;  %9254 = vst [vmem:[#allocation92_spill] sm:$0xff] %v6465_v23  ;;  %v9269_v62 = vld [vmem:[#allocation130_spill] sm:$0xff] }
 0x4fd   :  { %1567 = vmatprep.subr.mxu0 %v9253_v24  ;;  %1708 = vmatpush2.msra.mxu1 %v6465_v23  ;;  %v6521_v24 = vld [vmem:[%s7975_s1 + $0x450] sm:$0xff] }
 0x4fe   :  { %1568 = vmatpush2.msra.mxu0 %v9255_v55  ;;  %1709 = vmatprep.subr.mxu1 %v6472_v59  ;;  %9270 = vst [vmem:[#allocation119_spill] sm:$0xff] %v6521_v24  ;;  %v9271_v55 = vld [vmem:[#allocation131_spill] sm:$0xff] }
 0x4ff   :  { %1569 = vmatprep.subr.mxu0 %v9257_v18  ;;  %1710 = vmatpush2.msra.mxu1 %v6479_v5  ;;  %v6528_v18 = vld [vmem:[%s7975_s1 + $0x428] sm:$0xff] }
 0x500   :  { %1570 = vmatpush2.msra.mxu0 %v9259_v12  ;;  %1711 = vmatprep.subr.mxu1 %v6486_v6  ;;  %9272 = vst [vmem:[#allocation27_spill] sm:$0xff] %v6528_v18  ;;  %v9273_v12 = vld [vmem:[#allocation132_spill] sm:$0xff] }
 0x501   :  { %1571 = vmatprep.subr.mxu0 %v9261_v3  ;;  %1712 = vmatpush2.msra.mxu1 %v6493_v13  ;;  %v6535_v3 = vld [vmem:[%s7975_s1 + $0x420] sm:$0xff] }
 0x502   :  { %1572 = vmatpush2.msra.mxu0 %v9263_v29  ;;  %1713 = vmatprep.subr.mxu1 %v6500_v16  ;;  %9274 = vst [vmem:[#allocation120_spill] sm:$0xff] %v6535_v3  ;;  %v9275_v29 = vld [vmem:[#allocation133_spill] sm:$0xff] }
 0x503   :  { %1573 = vmatprep.subr.mxu0 %v9265_v19  ;;  %1714 = vmatpush2.msra.mxu1 %v6507_v15  ;;  %v6542_v19 = vld [vmem:[%s7975_s1 + $0x3f8] sm:$0xff]  ;;  %v9292_v15 = vld [vmem:[#allocation146_spill] sm:$0xff]  ;;  %v9365_v16 = vld [vmem:[#allocation5_spill] sm:$0xff] }
 0x504   :  { %1574 = vmatpush2.msra.mxu0 %v9267_v8  ;;  %1715 = vmatprep.subr.mxu1 %v6514_v7  ;;  %9276 = vst [vmem:[#allocation28_spill] sm:$0xff] %v6542_v19  ;;  %v9277_v8 = vld [vmem:[#allocation134_spill] sm:$0xff]  ;;  %v9291_v7 = vld [vmem:[#allocation145_spill] sm:$0xff] }
 0x505   :  { %1575 = vmatprep.subr.mxu0 %v9269_v62  ;;  %1716 = vmatpush2.msra.mxu1 %v6521_v24  ;;  %v6549_v62 = vld [vmem:[%s7975_s1 + $0x3f0] sm:$0xff]  ;;  %v9290_v24 = vld [vmem:[#allocation144_spill] sm:$0xff] }
 0x506   :  { %1576 = vmatpush2.msra.mxu0 %v9271_v55  ;;  %1717 = vmatprep.subr.mxu1 %v6528_v18  ;;  %9278 = vst [vmem:[#allocation29_spill] sm:$0xff] %v6549_v62  ;;  %v9279_v55 = vld [vmem:[#allocation135_spill] sm:$0xff]  ;;  %v9287_v18 = vld [vmem:[#allocation141_spill] sm:$0xff] }
 0x507   :  { %1577 = vmatprep.subr.mxu0 %v9273_v12  ;;  %1718 = vmatpush2.msra.mxu1 %v6535_v3  ;;  %v6556_v12 = vld [vmem:[%s7975_s1 + $0x3c8] sm:$0xff]  ;;  %v9286_v3 = vld [vmem:[#allocation140_spill] sm:$0xff] }
 0x508   :  { %1578 = vmatpush2.msra.mxu0 %v9275_v29  ;;  %1719 = vmatprep.subr.mxu1 %v6542_v19  ;;  %9280 = vst [vmem:[#allocation30_spill] sm:$0xff] %v6556_v12  ;;  %v9281_v29 = vld [vmem:[#allocation136_spill] sm:$0xff]  ;;  %v9283_v19 = vld [vmem:[#allocation137_spill] sm:$0xff] }
 0x509   :  { %1579 = vmatprep.subr.mxu0 %v9277_v8  ;;  %1720 = vmatpush2.msra.mxu1 %v6549_v62  ;;  %v6563_v8 = vld [vmem:[%s7975_s1 + $0x3c0] sm:$0xff]  ;;  %v9284_v62 = vld [vmem:[#allocation138_spill] sm:$0xff] }
 0x50a   :  { %1580 = vmatpush2.msra.mxu0 %v9279_v55  ;;  %1721 = vmatprep.subr.mxu1 %v6556_v12  ;;  %9282 = vst [vmem:[#allocation31_spill] sm:$0xff] %v6563_v8  ;;  %v9285_v55 = vld [vmem:[#allocation139_spill] sm:$0xff]  ;;  %v9288_v12 = vld [vmem:[#allocation142_spill] sm:$0xff] }
 0x50b   :  { %1581 = vmatprep.subr.mxu0 %v9281_v29  ;;  %1722 = vmatpush2.msra.mxu1 %v6563_v8  ;;  %v9289_v29 = vld [vmem:[#allocation143_spill] sm:$0xff] }
 0x50c   :  { %1582 = vmatpush2.msra.mxu0 %v9283_v19  ;;  %1723 = vmatprep.subr.mxu1 %v9284_v62  ;;  %v9293_v8 = vld [vmem:[#allocation147_spill] sm:$0xff]  ;;  %v9294_v19 = vld [vmem:[#allocation148_spill] sm:$0xff]  ;;  %v9295_v62 = vld [vmem:[#allocation149_spill] sm:$0xff] }
 0x50d   :  { %1583 = vmatprep.subr.mxu0 %v9285_v55  ;;  %1724 = vmatpush2.msra.mxu1 %v9286_v3  ;;  %v9296_v55 = vld [vmem:[#allocation150_spill] sm:$0xff] }
 0x50e   :  { %1584 = vmatpush2.msra.mxu0 %v9287_v18  ;;  %1725 = vmatprep.subr.mxu1 %v9288_v12  ;;  %v6584_v18 = vld [vmem:[%s7975_s1 + $0x2e8] sm:$0xff]  ;;  %v6604_v3 = vld [vmem:[%s7975_s1 + $0x2b0] sm:$0xff] }
 0x50f   :  { %1585 = vmatprep.subr.mxu0 %v9289_v29  ;;  %1726 = vmatpush2.msra.mxu1 %v9290_v24  ;;  %9297 = vst [vmem:[#allocation32_spill] sm:$0xff] %v6584_v18  ;;  %v9301_v24 = vld [vmem:[#allocation152_spill] sm:$0xff]  ;;  %9302 = vst [vmem:[#allocation37_spill] sm:$0xff] %v6604_v3  ;;  %v6610_v12 = vld [vmem:[%s7975_s1 + $0x288] sm:$0xff] }
 0x510   :  { %1586 = vmatpush2.msra.mxu0 %v9291_v7  ;;  %1727 = vmatprep.subr.mxu1 %v9292_v15  ;;  %v6590_v15 = vld [vmem:[%s7975_s1 + $0x2e0] sm:$0xff]  ;;  %v9299_v7 = vld [vmem:[#allocation151_spill] sm:$0xff]  ;;  %9303 = vst [vmem:[#allocation39_spill] sm:$0xff] %v6610_v12 }
 0x511   :  { %1587 = vmatprep.subr.mxu0 %v9293_v8  ;;  %1728 = vmatpush2.msra.mxu1 %v9294_v19  ;;  %9298 = vst [vmem:[#allocation33_spill] sm:$0xff] %v6590_v15  ;;  %v6616_v8 = vld [vmem:[%s7975_s1 + $0x280] sm:$0xff]  ;;  %v6622_v29 = vld [vmem:[%s7975_s1 + $0x258] sm:$0xff]  ;;  %v6628_v19 = vld [vmem:[%s7975_s1 + $0x250] sm:$0xff] }
 0x512   :  { %1588 = vmatpush2.msra.mxu0 %v9295_v62  ;;  %1729 = vmatprep.subr.mxu1 %v9296_v55  ;;  %9304 = vst [vmem:[#allocation41_spill] sm:$0xff] %v6616_v8  ;;  %9305 = vst [vmem:[#allocation43_spill] sm:$0xff] %v6622_v29  ;;  %v6634_v62 = vld [vmem:[%s7975_s1 + $0x228] sm:$0xff]  ;;  %v6640_v55 = vld [vmem:[%s7975_s1 + $0x220] sm:$0xff] }
 0x513   :  { %1590 = vmatmul.mubr.f32.vlgmr.msra.gmra.mxu0 %v6174_v26  ;;  %1738 = vmatprep.subr.mxu0 %v6584_v18  ;;  %v6597_v26 = vld [vmem:[%s7975_s1 + $0x2b8] sm:$0xff]  ;;  %9306 = vst [vmem:[#allocation45_spill] sm:$0xff] %v6628_v19  ;;  %9307 = vst [vmem:[#allocation47_spill] sm:$0xff] %v6634_v62 }
 0x514   :  { %1739 = vmatpush1.msra.mxu0 %v6590_v15  ;;  %1730 = vmatpush2.msra.mxu1 %v9299_v7  ;;  %9300 = vst [vmem:[#allocation35_spill] sm:$0xff] %v6597_v26  ;;  %9308 = vst [vmem:[#allocation49_spill] sm:$0xff] %v6640_v55  ;;  %v6646_v7 = vld [vmem:[%s7975_s1 + $0x1f8] sm:$0xff] }
 0x515   :  { %1740 = vmatprep.subr.mxu0 %v6597_v26  ;;  %1809 = vmatprep.subr.mxu1 %v9301_v24  ;;  %9309 = vst [vmem:[#allocation51_spill] sm:$0xff] %v6646_v7  ;;  %v6652_v24 = vld [vmem:[%s7975_s1 + $0x1f0] sm:$0xff]  ;;  %v9364_v15 = vld [vmem:[#allocation36_spill] sm:$0xff] }
 0x516   :  { %1741 = vmatpush1.msra.mxu0 %v6604_v3  ;;  %9310 = vst [vmem:[#allocation53_spill] sm:$0xff] %v6652_v24 }
 0x517   :  { %1742 = vmatprep.subr.mxu0 %v6610_v12  ;;  %v9362_v12 = vld [vmem:[#allocation158_spill] sm:$0xff] }
 0x518   :  { %1743 = vmatpush1.msra.mxu0 %v6616_v8  ;;  %v9361_v8 = vld [vmem:[#allocation157_spill] sm:$0xff] }
 0x519   :  { %1744 = vmatprep.subr.mxu0 %v6622_v29  ;;  %v9359_v29 = vld [vmem:[#allocation155_spill] sm:$0xff] }
 0x51a   :  { %1745 = vmatpush1.msra.mxu0 %v6628_v19  ;;  %v9358_v19 = vld [vmem:[#allocation154_spill] sm:$0xff] }
 0x51b   :  { %1746 = vmatprep.subr.mxu0 %v6634_v62  ;;  %v6658_v62 = vld [vmem:[%s7975_s1 + $0x1c8] sm:$0xff] }
 0x51c   :  { %1747 = vmatpush1.msra.mxu0 %v6640_v55  ;;  %9311 = vst [vmem:[#allocation55_spill] sm:$0xff] %v6658_v62  ;;  %v6664_v55 = vld [vmem:[%s7975_s1 + $0x1c0] sm:$0xff] }
 0x51d   :  { %1748 = vmatprep.subr.mxu0 %v6646_v7  ;;  %9312 = vst [vmem:[#allocation57_spill] sm:$0xff] %v6664_v55  ;;  %v6670_v7 = vld [vmem:[%s7975_s1 + $0x198] sm:$0xff] }
 0x51e   :  { %1749 = vmatpush1.msra.mxu0 %v6652_v24  ;;  %9313 = vst [vmem:[#allocation59_spill] sm:$0xff] %v6670_v7  ;;  %v6676_v24 = vld [vmem:[%s7975_s1 + $0x190] sm:$0xff] }
 0x51f   :  { %1750 = vmatprep.subr.mxu0 %v6658_v62  ;;  %9314 = vst [vmem:[#allocation61_spill] sm:$0xff] %v6676_v24  ;;  %v6682_v62 = vld [vmem:[%s7975_s1 + $0x168] sm:$0xff] }
 0x520   :  { %1751 = vmatpush1.msra.mxu0 %v6664_v55  ;;  %9315 = vst [vmem:[#allocation63_spill] sm:$0xff] %v6682_v62  ;;  %v6688_v55 = vld [vmem:[%s7975_s1 + $0x160] sm:$0xff] }
 0x521   :  { %1752 = vmatprep.subr.mxu0 %v6670_v7  ;;  %9316 = vst [vmem:[#allocation66_spill] sm:$0xff] %v6688_v55  ;;  %v6694_v7 = vld [vmem:[%s7975_s1 + $0x138] sm:$0xff] }
 0x522   :  { %1753 = vmatpush1.msra.mxu0 %v6676_v24  ;;  %9317 = vst [vmem:[#allocation68_spill] sm:$0xff] %v6694_v7  ;;  %v6700_v24 = vld [vmem:[%s7975_s1 + $0x130] sm:$0xff] }
 0x523   :  { %1754 = vmatprep.subr.mxu0 %v6682_v62  ;;  %9318 = vst [vmem:[#allocation70_spill] sm:$0xff] %v6700_v24  ;;  %v6706_v62 = vld [vmem:[%s7975_s1 + $0x108] sm:$0xff] }
 0x524   :  { %1755 = vmatpush1.msra.mxu0 %v6688_v55  ;;  %9319 = vst [vmem:[#allocation72_spill] sm:$0xff] %v6706_v62  ;;  %v6712_v55 = vld [vmem:[%s7975_s1 + $0x100] sm:$0xff] }
 0x525   :  { %1756 = vmatprep.subr.mxu0 %v6694_v7  ;;  %9320 = vst [vmem:[#allocation74_spill] sm:$0xff] %v6712_v55  ;;  %v6718_v7 = vld [vmem:[%s7975_s1 + $0xd8] sm:$0xff] }
 0x526   :  { %1757 = vmatpush1.msra.mxu0 %v6700_v24  ;;  %9321 = vst [vmem:[#allocation76_spill] sm:$0xff] %v6718_v7  ;;  %v6724_v24 = vld [vmem:[%s7975_s1 + $0xd0] sm:$0xff] }
 0x527   :  { %1758 = vmatprep.subr.mxu0 %v6706_v62  ;;  %9322 = vst [vmem:[#allocation78_spill] sm:$0xff] %v6724_v24  ;;  %v6730_v62 = vld [vmem:[%s7975_s1 + $0xa8] sm:$0xff] }
 0x528   :  { %1759 = vmatpush1.msra.mxu0 %v6712_v55  ;;  %9323 = vst [vmem:[#allocation80_spill] sm:$0xff] %v6730_v62  ;;  %v6736_v55 = vld [vmem:[%s7975_s1 + $0xa0] sm:$0xff] }
 0x529   :  { %1760 = vmatprep.subr.mxu0 %v6718_v7  ;;  %9324 = vst [vmem:[#allocation82_spill] sm:$0xff] %v6736_v55  ;;  %v6742_v7 = vld [vmem:[%s7975_s1 + $0x78] sm:$0xff] }
 0x52a   :  { %1761 = vmatpush1.msra.mxu0 %v6724_v24  ;;  %9325 = vst [vmem:[#allocation65_spill] sm:$0xff] %v6742_v7  ;;  %v6748_v24 = vld [vmem:[%s7975_s1 + $0x70] sm:$0xff] }
 0x52b   :  { %1762 = vmatprep.subr.mxu0 %v6730_v62  ;;  %9326 = vst [vmem:[#allocation67_spill] sm:$0xff] %v6748_v24  ;;  %v6754_v62 = vld [vmem:[%s7975_s1 + $0x48] sm:$0xff] }
 0x52c   :  { %1763 = vmatpush1.msra.mxu0 %v6736_v55  ;;  %9327 = vst [vmem:[#allocation69_spill] sm:$0xff] %v6754_v62  ;;  %v6760_v55 = vld [vmem:[%s7975_s1 + $0x40] sm:$0xff] }
 0x52d   :  { %1764 = vmatprep.subr.mxu0 %v6742_v7  ;;  %9328 = vst [vmem:[#allocation71_spill] sm:$0xff] %v6760_v55  ;;  %v6766_v7 = vld [vmem:[%s7975_s1 + $0x18] sm:$0xff] }
 0x52e   :  { %1765 = vmatpush1.msra.mxu0 %v6748_v24  ;;  %9329 = vst [vmem:[#allocation73_spill] sm:$0xff] %v6766_v7  ;;  %v6772_v24 = vld [vmem:[%s7975_s1 + $0x10] sm:$0xff] }
 0x52f   :  { %1766 = vmatprep.subr.mxu0 %v6754_v62  ;;  %9330 = vst [vmem:[#allocation75_spill] sm:$0xff] %v6772_v24  ;;  %v6778_v62 = vld [vmem:[%s7975_s1 + $0x5e8] sm:$0xff] }
 0x530   :  { %1767 = vmatpush1.msra.mxu0 %v6760_v55  ;;  %9331 = vst [vmem:[#allocation77_spill] sm:$0xff] %v6778_v62  ;;  %v6784_v55 = vld [vmem:[%s7975_s1 + $0x5e0] sm:$0xff] }
 0x531   :  { %1768 = vmatprep.subr.mxu0 %v6766_v7  ;;  %9332 = vst [vmem:[#allocation79_spill] sm:$0xff] %v6784_v55  ;;  %v6790_v7 = vld [vmem:[%s7975_s1 + $0x5b8] sm:$0xff] }
 0x532   :  { %1769 = vmatpush1.msra.mxu0 %v6772_v24  ;;  %9333 = vst [vmem:[#allocation81_spill] sm:$0xff] %v6790_v7  ;;  %v6796_v24 = vld [vmem:[%s7975_s1 + $0x5b0] sm:$0xff] }
 0x533   :  { %1770 = vmatprep.subr.mxu0 %v6778_v62  ;;  %9334 = vst [vmem:[#allocation83_spill] sm:$0xff] %v6796_v24  ;;  %v6802_v62 = vld [vmem:[%s7975_s1 + $0x588] sm:$0xff] }
 0x534   :  { %1771 = vmatpush2.msra.mxu0 %v6784_v55  ;;  %9335 = vst [vmem:[#allocation85_spill] sm:$0xff] %v6802_v62  ;;  %v6808_v55 = vld [vmem:[%s7975_s1 + $0x580] sm:$0xff] }
 0x535   :  { %1772 = vmatprep.subr.mxu0 %v6790_v7  ;;  %9336 = vst [vmem:[#allocation87_spill] sm:$0xff] %v6808_v55  ;;  %v6814_v7 = vld [vmem:[%s7975_s1 + $0x558] sm:$0xff] }
 0x536   :  { %1773 = vmatpush2.msra.mxu0 %v6796_v24  ;;  %9337 = vst [vmem:[#allocation89_spill] sm:$0xff] %v6814_v7  ;;  %v6820_v24 = vld [vmem:[%s7975_s1 + $0x550] sm:$0xff] }
 0x537   :  { %1774 = vmatprep.subr.mxu0 %v6802_v62  ;;  %9338 = vst [vmem:[#allocation91_spill] sm:$0xff] %v6820_v24  ;;  %v6826_v62 = vld [vmem:[%s7975_s1 + $0x528] sm:$0xff] }
 0x538   :  { %1775 = vmatpush2.msra.mxu0 %v6808_v55  ;;  %9339 = vst [vmem:[#allocation93_spill] sm:$0xff] %v6826_v62  ;;  %v6832_v55 = vld [vmem:[%s7975_s1 + $0x520] sm:$0xff] }
 0x539   :  { %1776 = vmatprep.subr.mxu0 %v6814_v7  ;;  %9340 = vst [vmem:[#allocation95_spill] sm:$0xff] %v6832_v55  ;;  %v6838_v7 = vld [vmem:[%s7975_s1 + $0x4f8] sm:$0xff] }
 0x53a   :  { %1777 = vmatpush2.msra.mxu0 %v6820_v24  ;;  %9341 = vst [vmem:[#allocation96_spill] sm:$0xff] %v6838_v7  ;;  %v6844_v24 = vld [vmem:[%s7975_s1 + $0x4f0] sm:$0xff] }
 0x53b   :  { %1778 = vmatprep.subr.mxu0 %v6826_v62  ;;  %9342 = vst [vmem:[#allocation97_spill] sm:$0xff] %v6844_v24  ;;  %v6850_v62 = vld [vmem:[%s7975_s1 + $0x4c8] sm:$0xff] }
 0x53c   :  { %1779 = vmatpush2.msra.mxu0 %v6832_v55  ;;  %9343 = vst [vmem:[#allocation50_spill] sm:$0xff] %v6850_v62  ;;  %v6856_v55 = vld [vmem:[%s7975_s1 + $0x4c0] sm:$0xff] }
 0x53d   :  { %1780 = vmatprep.subr.mxu0 %v6838_v7  ;;  %9344 = vst [vmem:[#allocation98_spill] sm:$0xff] %v6856_v55  ;;  %v6862_v7 = vld [vmem:[%s7975_s1 + $0x498] sm:$0xff] }
 0x53e   :  { %1781 = vmatpush2.msra.mxu0 %v6844_v24  ;;  %9345 = vst [vmem:[#allocation52_spill] sm:$0xff] %v6862_v7  ;;  %v6868_v24 = vld [vmem:[%s7975_s1 + $0x490] sm:$0xff] }
 0x53f   :  { %1782 = vmatprep.subr.mxu0 %v6850_v62  ;;  %9346 = vst [vmem:[#allocation99_spill] sm:$0xff] %v6868_v24  ;;  %v6874_v62 = vld [vmem:[%s7975_s1 + $0x468] sm:$0xff] }
 0x540   :  { %1783 = vmatpush2.msra.mxu0 %v6856_v55  ;;  %9347 = vst [vmem:[#allocation54_spill] sm:$0xff] %v6874_v62  ;;  %v6880_v55 = vld [vmem:[%s7975_s1 + $0x460] sm:$0xff] }
 0x541   :  { %1784 = vmatprep.subr.mxu0 %v6862_v7  ;;  %9348 = vst [vmem:[#allocation100_spill] sm:$0xff] %v6880_v55  ;;  %v6886_v7 = vld [vmem:[%s7975_s1 + $0x438] sm:$0xff] }
 0x542   :  { %1785 = vmatpush2.msra.mxu0 %v6868_v24  ;;  %9349 = vst [vmem:[#allocation56_spill] sm:$0xff] %v6886_v7  ;;  %v6892_v24 = vld [vmem:[%s7975_s1 + $0x430] sm:$0xff] }
 0x543   :  { %1786 = vmatprep.subr.mxu0 %v6874_v62  ;;  %9350 = vst [vmem:[#allocation101_spill] sm:$0xff] %v6892_v24  ;;  %v6898_v62 = vld [vmem:[%s7975_s1 + $0x408] sm:$0xff] }
 0x544   :  { %1787 = vmatpush2.msra.mxu0 %v6880_v55  ;;  %9351 = vst [vmem:[#allocation58_spill] sm:$0xff] %v6898_v62  ;;  %v6904_v55 = vld [vmem:[%s7975_s1 + $0x400] sm:$0xff] }
 0x545   :  { %1788 = vmatprep.subr.mxu0 %v6886_v7  ;;  %9352 = vst [vmem:[#allocation102_spill] sm:$0xff] %v6904_v55  ;;  %v6910_v7 = vld [vmem:[%s7975_s1 + $0x3d8] sm:$0xff] }
 0x546   :  { %1789 = vmatpush2.msra.mxu0 %v6892_v24  ;;  %9353 = vst [vmem:[#allocation60_spill] sm:$0xff] %v6910_v7  ;;  %v6916_v24 = vld [vmem:[%s7975_s1 + $0x3d0] sm:$0xff] }
 0x547   :  { %1790 = vmatprep.subr.mxu0 %v6898_v62  ;;  %9354 = vst [vmem:[#allocation62_spill] sm:$0xff] %v6916_v24  ;;  %v6922_v62 = vld [vmem:[%s7975_s1 + $0x3a8] sm:$0xff] }
 0x548   :  { %1791 = vmatpush2.msra.mxu0 %v6904_v55  ;;  %9355 = vst [vmem:[#allocation64_spill] sm:$0xff] %v6922_v62  ;;  %v6928_v55 = vld [vmem:[%s7975_s1 + $0x3a0] sm:$0xff] }
 0x549   :  { %1792 = vmatprep.subr.mxu0 %v6910_v7  ;;  %9356 = vst [vmem:[#allocation103_spill] sm:$0xff] %v6928_v55  ;;  %v9357_v7 = vld [vmem:[#allocation153_spill] sm:$0xff] }
 0x54a   :  { %1793 = vmatpush2.msra.mxu0 %v6916_v24  ;;  %v9360_v24 = vld [vmem:[#allocation156_spill] sm:$0xff] }
 0x54b   :  { %1794 = vmatprep.subr.mxu0 %v6922_v62  ;;  %v9363_v62 = vld [vmem:[#allocation34_spill] sm:$0xff] }
 0x54c   :  { %1795 = vmatpush2.msra.mxu0 %v6928_v55 }
 0x54d   :  { %1796 = vmatprep.subr.mxu0 %v9357_v7 }
 0x54e   :  { %1797 = vmatpush2.msra.mxu0 %v9358_v19 }
 0x54f   :  { %1798 = vmatprep.subr.mxu0 %v9359_v29  ;;  %v2654_v29 = vld [vmem:[%s7974_s0 + $0x30] sm:$0xff] }
 0x550   :  { %1799 = vmatpush2.msra.mxu0 %v9360_v24 }
 0x551   :  { %1800 = vmatprep.subr.mxu0 %v9361_v8 }
 0x552   :  { %1801 = vmatpush2.msra.mxu0 %v9362_v12 }
 0x553   :  { %1951 = vmatprep.subr.mxu0 %v9363_v62 }
 0x593   :  { %v1449_v3 = vpop.f32.mrf.mxu0  ;;  %v1520_v7 = vpop.f32.mrf.mxu1 }
 0x594   :  { %v1450_v55 = vadd.f32 %v1449_v3, %v9365_v16  ;;  %v1521_v62 = vadd.f32 %v1520_v7, %v4536_v20 }
 0x595   :  { %v1451_v26 = vpop.f32.mrf.mxu0  ;;  %v1522_v24 = vpop.f32.mrf.mxu1 }
 0x596   :  { %v1452_v18 = vadd.f32 %v1451_v26, %v9364_v15  ;;  %v1523_v12 = vadd.f32 %v1522_v24, %v4538_v47  ;;  %v1615_v26 = vrot.slane %v2654_v29, 4 }
 0x598   :  { %v1598_v13 = vcombine.low %v1450_v55, %v1452_v18  ;;  %v1619_v5 = vcombine.low %v1521_v62, %v1523_v12 }
 0x59a   :  { %v1605_v19 = vrot.slane %v1598_v13, %v4530_v61  ;;  %v1626_v3 = vrot.slane %v1619_v5, %v4530_v61  ;;  %v2655_v5 = vld [vmem:[%s7974_s0 + $0x38] sm:$0xf] }
 0x59c   :  { %v1607_v8 = vadd.f32 %v2654_v29, %v1605_v19  ;;  %v1628_v18 = vadd.f32 %v1626_v3, %v1615_v26 }
 0x59e   :  { %v2656_v6 = vmul.f32 -1.442695, %v1607_v8  ;;  %v2657_v55 = vmul.f32 -1.442695, %v1628_v18 }
 0x5a0   :  { %2749 = vpow2.f32 %v2656_v6 }
 0x5a1   :  { %2751 = vpow2.f32 %v2657_v55 }
 0x5ad   :  { %v2750_v16 = vpop.eup %2749 }
 0x5ae   :  { %v1611_v13 = vadd.f32 1.0, %v2750_v16  ;;  %v2752_v59 = vpop.eup %2751 }
 0x5af   :  { %v1632_v7 = vadd.f32 1.0, %v2752_v59 }
 0x5b0   :  { %2753 = vrcp.f32 %v1611_v13  ;;  %v6967_v13 = vld [vmem:[%s7975_s1 + $0x2f0] sm:$0xff] }
 0x5b1   :  { %2755 = vrcp.f32 %v1632_v7  ;;  %v6994_v7 = vld [vmem:[%s7975_s1 + $0x290] sm:$0xff] }
 0x5bd   :  { %v2754_v62 = vpop.eup %2753 }
 0x5be   :  { %v2756_v12 = vpop.eup %2755 }
 0x5bf   :  { %v1649_v26 = vsub.f32 1.0, %v2756_v12 }
 0x5d3   :  { %v1591_v15 = vpop.f32.mrf.mxu0 }
 0x5d4   :  { %v1592_v19 = vadd.f32 %v1591_v15, %v4543_v53  ;;  %v1651_v15 = vmul.f32 %v2756_v12, %v6170_v9  ;;  %v6973_v9 = vld [vmem:[%s7975_s1 + $0x2c8] sm:$0xff]  ;;  %v7043_v12 = vld [vmem:[%s7975_s1 + $0x1d8] sm:$0xff] }
 0x5d5   :  { %v1593_v23 = vpop.f32.mrf.mxu0 }
 0x5d6   :  { %v1594_v24 = vadd.f32 %v1593_v23, %v4545_v51 }
 0x5d8   :  { %v1637_v8 = vcombine.low %v1592_v19, %v1594_v24  ;;  %v6980_v19 = vld [vmem:[%s7975_s1 + $0x2c0] sm:$0xff]  ;;  %v6987_v24 = vld [vmem:[%s7975_s1 + $0x298] sm:$0xff] }
 0x5da   :  { %v1644_v6 = vrot.slane %v1637_v8, %v4530_v61  ;;  %v7001_v8 = vld [vmem:[%s7975_s1 + $0x268] sm:$0xff] }
 0x5dc   :  { %v1646_v29 = vmul.f32 %v2754_v62, %v1644_v6  ;;  %v7008_v6 = vld [vmem:[%s7975_s1 + $0x260] sm:$0xff]  ;;  %v7015_v62 = vld [vmem:[%s7975_s1 + $0x238] sm:$0xff] }
 0x5de   :  { %v1647_v16 = vadd.f32 %v2655_v5, %v1646_v29  ;;  %v7022_v5 = vld [vmem:[%s7975_s1 + $0x230] sm:$0xff]  ;;  %v7029_v29 = vld [vmem:[%s7975_s1 + $0x208] sm:$0xff] }
 0x5e0   :  { %2757 = vtanh.f32 %v1647_v16  ;;  %v7036_v16 = vld [vmem:[%s7975_s1 + $0x200] sm:$0xff] }
 0x5ed   :  { %v2758_v3 = vpop.eup %2757 }
 0x5ee   :  { %v1650_v18 = vmul.f32 %v2758_v3, %v1649_v26  ;;  %v7050_v26 = vld [vmem:[%s7975_s1 + $0x1d0] sm:$0xff]  ;;  %v7057_v3 = vld [vmem:[%s7975_s1 + $0x1a8] sm:$0xff] }
 0x5f0   :  { %v6954_v23 = vadd.f32 %v1651_v15, %v1650_v18  ;;  %v7064_v18 = vld [vmem:[%s7975_s1 + $0x1a0] sm:$0xff]  ;;  %v7071_v15 = vld [vmem:[%s7975_s1 + $0x178] sm:$0xff] }
 0x5f2   :  { %v6958_v59 = vrot.slane %v6954_v23, %v4530_v61 }
 0x5f4   :  { %v1664_v55 = vcombine.high %v6958_v59, %v6958_v59 }
 0x5f6   :  { %1731 = vmatprep.mubr.f32.mxu1 %v1664_v55  ;;  %1802 = vmatprep.mubr.f32.mxu0 %v1664_v55 }
 0x5f7   :  { %1732 = vmatmul.mubr.f32.vlgmr.msra.gmra.mxu1 %v6958_v59  ;;  %1803 = vmatmul.mubr.f32.vlgmr.msra.gmra.mxu0 %v6958_v59 }
 0x5f8   :  { %1810 = vmatpush1.msra.mxu1 %v6967_v13  ;;  %1873 = vmatprep.mubr.f32.mxu1 %v1664_v55  ;;  %v7078_v55 = vld [vmem:[%s7975_s1 + $0x170] sm:$0xff] }
 0x5f9   :  { %1811 = vmatprep.subr.mxu1 %v6973_v9  ;;  %1952 = vmatpush1.msra.mxu0 %v6185_v2 }
 0x5fa   :  { %1812 = vmatpush1.msra.mxu1 %v6980_v19  ;;  %1953 = vmatprep.subr.mxu0 %v6192_v14 }
 0x5fb   :  { %1813 = vmatprep.subr.mxu1 %v6987_v24  ;;  %1954 = vmatpush1.msra.mxu0 %v6199_v32 }
 0x5fc   :  { %1814 = vmatpush1.msra.mxu1 %v6994_v7  ;;  %1955 = vmatprep.subr.mxu0 %v6206_v49 }
 0x5fd   :  { %1815 = vmatprep.subr.mxu1 %v7001_v8  ;;  %1956 = vmatpush1.msra.mxu0 %v6213_v52 }
 0x5fe   :  { %1816 = vmatpush1.msra.mxu1 %v7008_v6  ;;  %1957 = vmatprep.subr.mxu0 %v6220_v40 }
 0x5ff   :  { %1817 = vmatprep.subr.mxu1 %v7015_v62  ;;  %1958 = vmatpush1.msra.mxu0 %v6227_v38 }
 0x600   :  { %1818 = vmatpush1.msra.mxu1 %v7022_v5  ;;  %1959 = vmatprep.subr.mxu0 %v6234_v48 }
 0x601   :  { %1819 = vmatprep.subr.mxu1 %v7029_v29  ;;  %1960 = vmatpush1.msra.mxu0 %v6241_v30 }
 0x602   :  { %1820 = vmatpush1.msra.mxu1 %v7036_v16  ;;  %1961 = vmatprep.subr.mxu0 %v6248_v63 }
 0x603   :  { %1821 = vmatprep.subr.mxu1 %v7043_v12  ;;  %1962 = vmatpush1.msra.mxu0 %v6255_v28 }
 0x604   :  { %1822 = vmatpush1.msra.mxu1 %v7050_v26  ;;  %1963 = vmatprep.subr.mxu0 %v6262_v50 }
 0x605   :  { %1823 = vmatprep.subr.mxu1 %v7057_v3  ;;  %1964 = vmatpush1.msra.mxu0 %v6269_v34 }
 0x606   :  { %1824 = vmatpush1.msra.mxu1 %v7064_v18  ;;  %1965 = vmatprep.subr.mxu0 %v6276_v46  ;;  %v7085_v46 = vld [vmem:[%s7975_s1 + $0x148] sm:$0xff] }
 0x607   :  { %1825 = vmatprep.subr.mxu1 %v7071_v15  ;;  %1966 = vmatpush1.msra.mxu0 %v6283_v44  ;;  %v7092_v44 = vld [vmem:[%s7975_s1 + $0x140] sm:$0xff] }
 0x608   :  { %1826 = vmatpush1.msra.mxu1 %v7078_v55  ;;  %1967 = vmatprep.subr.mxu0 %v6290_v60  ;;  %v7099_v60 = vld [vmem:[%s7975_s1 + $0x118] sm:$0xff] }
 0x609   :  { %1827 = vmatprep.subr.mxu1 %v7085_v46  ;;  %1968 = vmatpush1.msra.mxu0 %v6297_v42  ;;  %v7106_v42 = vld [vmem:[%s7975_s1 + $0x110] sm:$0xff] }
 0x60a   :  { %1828 = vmatpush1.msra.mxu1 %v7092_v44  ;;  %1969 = vmatprep.subr.mxu0 %v6304_v36  ;;  %v7113_v36 = vld [vmem:[%s7975_s1 + $0xe8] sm:$0xff] }
 0x60b   :  { %1829 = vmatprep.subr.mxu1 %v7099_v60  ;;  %1970 = vmatpush1.msra.mxu0 %v6311_v25  ;;  %v7120_v25 = vld [vmem:[%s7975_s1 + $0xe0] sm:$0xff] }
 0x60c   :  { %1830 = vmatpush1.msra.mxu1 %v7106_v42  ;;  %1971 = vmatprep.subr.mxu0 %v6318_v33  ;;  %v7127_v33 = vld [vmem:[%s7975_s1 + $0xb8] sm:$0xff] }
 0x60d   :  { %1831 = vmatprep.subr.mxu1 %v7113_v36  ;;  %1972 = vmatpush1.msra.mxu0 %v6325_v56  ;;  %v7134_v56 = vld [vmem:[%s7975_s1 + $0xb0] sm:$0xff] }
 0x60e   :  { %1832 = vmatpush1.msra.mxu1 %v7120_v25  ;;  %1973 = vmatprep.subr.mxu0 %v6332_v41  ;;  %v7141_v41 = vld [vmem:[%s7975_s1 + $0x88] sm:$0xff] }
 0x60f   :  { %1833 = vmatprep.subr.mxu1 %v7127_v33  ;;  %1974 = vmatpush1.msra.mxu0 %v6339_v4  ;;  %v7148_v4 = vld [vmem:[%s7975_s1 + $0x80] sm:$0xff] }
 0x610   :  { %1834 = vmatpush1.msra.mxu1 %v7134_v56  ;;  %1975 = vmatprep.subr.mxu0 %v6346_v31  ;;  %v7155_v31 = vld [vmem:[%s7975_s1 + $0x58] sm:$0xff] }
 0x611   :  { %1835 = vmatprep.subr.mxu1 %v7141_v41  ;;  %1976 = vmatpush1.msra.mxu0 %v6353_v45  ;;  %9366 = vst [vmem:[#allocation104_spill] sm:$0xff] %v7155_v31  ;;  %v7162_v45 = vld [vmem:[%s7975_s1 + $0x50] sm:$0xff] }
 0x612   :  { %1836 = vmatpush1.msra.mxu1 %v7148_v4  ;;  %1977 = vmatprep.subr.mxu0 %v6360_v39  ;;  %9367 = vst [vmem:[#allocation105_spill] sm:$0xff] %v7162_v45  ;;  %v7169_v39 = vld [vmem:[%s7975_s1 + $0x28] sm:$0xff] }
 0x613   :  { %1837 = vmatprep.subr.mxu1 %v7155_v31  ;;  %1978 = vmatpush1.msra.mxu0 %v6367_v37  ;;  %9368 = vst [vmem:[#allocation106_spill] sm:$0xff] %v7169_v39  ;;  %v7176_v37 = vld [vmem:[%s7975_s1 + $0x20] sm:$0xff] }
 0x614   :  { %1838 = vmatpush1.msra.mxu1 %v7162_v45  ;;  %1979 = vmatprep.subr.mxu0 %v6374_v35  ;;  %9369 = vst [vmem:[#allocation107_spill] sm:$0xff] %v7176_v37  ;;  %v7183_v35 = vld [vmem:[%s7975_s1 + $0x5f8] sm:$0xff] }
 0x615   :  { %1839 = vmatprep.subr.mxu1 %v7169_v39  ;;  %1980 = vmatpush1.msra.mxu0 %v6381_v43  ;;  %9370 = vst [vmem:[#allocation108_spill] sm:$0xff] %v7183_v35  ;;  %v7190_v43 = vld [vmem:[%s7975_s1 + $0x5f0] sm:$0xff] }
 0x616   :  { %1840 = vmatpush1.msra.mxu1 %v7176_v37  ;;  %1981 = vmatprep.subr.mxu0 %v6388_v0  ;;  %9371 = vst [vmem:[#allocation109_spill] sm:$0xff] %v7190_v43  ;;  %v7197_v0 = vld [vmem:[%s7975_s1 + $0x5c8] sm:$0xff] }
 0x617   :  { %1841 = vmatprep.subr.mxu1 %v7183_v35  ;;  %1982 = vmatpush1.msra.mxu0 %v6395_v1  ;;  %9372 = vst [vmem:[#allocation110_spill] sm:$0xff] %v7197_v0  ;;  %v7204_v1 = vld [vmem:[%s7975_s1 + $0x5c0] sm:$0xff] }
 0x618   :  { %1842 = vmatpush2.msra.mxu1 %v7190_v43  ;;  %1983 = vmatprep.subr.mxu0 %v6402_v54  ;;  %9373 = vst [vmem:[#allocation111_spill] sm:$0xff] %v7204_v1  ;;  %v7211_v54 = vld [vmem:[%s7975_s1 + $0x598] sm:$0xff] }
 0x619   :  { %1843 = vmatprep.subr.mxu1 %v7197_v0  ;;  %1984 = vmatpush2.msra.mxu0 %v6409_v21  ;;  %9374 = vst [vmem:[#allocation112_spill] sm:$0xff] %v7211_v54  ;;  %v7218_v21 = vld [vmem:[%s7975_s1 + $0x590] sm:$0xff] }
 0x61a   :  { %1844 = vmatpush2.msra.mxu1 %v7204_v1  ;;  %1985 = vmatprep.subr.mxu0 %v6416_v10  ;;  %9375 = vst [vmem:[#allocation113_spill] sm:$0xff] %v7218_v21  ;;  %v7225_v10 = vld [vmem:[%s7975_s1 + $0x568] sm:$0xff]  ;;  %v9438_v1 = vld [vmem:[#allocation55_spill] sm:$0xff] }
 0x61b   :  { %1845 = vmatprep.subr.mxu1 %v7211_v54  ;;  %1986 = vmatpush2.msra.mxu0 %v6423_v11  ;;  %9376 = vst [vmem:[#allocation114_spill] sm:$0xff] %v7225_v10  ;;  %v7232_v11 = vld [vmem:[%s7975_s1 + $0x560] sm:$0xff] }
 0x61c   :  { %1846 = vmatpush2.msra.mxu1 %v7218_v21  ;;  %1987 = vmatprep.subr.mxu0 %v6430_v17  ;;  %9377 = vst [vmem:[#allocation115_spill] sm:$0xff] %v7232_v11  ;;  %v7239_v17 = vld [vmem:[%s7975_s1 + $0x538] sm:$0xff]  ;;  %v9437_v54 = vld [vmem:[#allocation53_spill] sm:$0xff] }
 0x61d   :  { %1847 = vmatprep.subr.mxu1 %v7225_v10  ;;  %1988 = vmatpush2.msra.mxu0 %v6437_v27  ;;  %9378 = vst [vmem:[#allocation116_spill] sm:$0xff] %v7239_v17  ;;  %v7246_v27 = vld [vmem:[%s7975_s1 + $0x530] sm:$0xff]  ;;  %v9433_v10 = vld [vmem:[#allocation45_spill] sm:$0xff] }
 0x61e   :  { %1848 = vmatpush2.msra.mxu1 %v7232_v11  ;;  %1989 = vmatprep.subr.mxu0 %v6444_v58  ;;  %9379 = vst [vmem:[#allocation121_spill] sm:$0xff] %v7246_v27  ;;  %v7253_v58 = vld [vmem:[%s7975_s1 + $0x508] sm:$0xff]  ;;  %v9381_v11 = vld [vmem:[#allocation92_spill] sm:$0xff]  ;;  %v9436_v21 = vld [vmem:[#allocation51_spill] sm:$0xff] }
 0x61f   :  { %1849 = vmatprep.subr.mxu1 %v7239_v17  ;;  %1990 = vmatpush2.msra.mxu0 %v6451_v22  ;;  %9380 = vst [vmem:[#allocation122_spill] sm:$0xff] %v7253_v58  ;;  %v7260_v22 = vld [vmem:[%s7975_s1 + $0x500] sm:$0xff]  ;;  %v9383_v17 = vld [vmem:[#allocation23_spill] sm:$0xff] }
 0x620   :  { %1850 = vmatpush2.msra.mxu1 %v7246_v27  ;;  %1991 = vmatprep.subr.mxu0 %v6458_v57  ;;  %9382 = vst [vmem:[#allocation123_spill] sm:$0xff] %v7260_v22  ;;  %v7267_v57 = vld [vmem:[%s7975_s1 + $0x4d8] sm:$0xff]  ;;  %v9385_v27 = vld [vmem:[#allocation94_spill] sm:$0xff] }
 0x621   :  { %1851 = vmatprep.subr.mxu1 %v7253_v58  ;;  %1992 = vmatpush2.msra.mxu0 %v9381_v11  ;;  %9384 = vst [vmem:[#allocation124_spill] sm:$0xff] %v7267_v57  ;;  %v7274_v11 = vld [vmem:[%s7975_s1 + $0x4d0] sm:$0xff]  ;;  %v9387_v58 = vld [vmem:[#allocation24_spill] sm:$0xff] }
 0x622   :  { %1852 = vmatpush2.msra.mxu1 %v7260_v22  ;;  %1993 = vmatprep.subr.mxu0 %v9383_v17  ;;  %9386 = vst [vmem:[#allocation125_spill] sm:$0xff] %v7274_v11  ;;  %v7281_v17 = vld [vmem:[%s7975_s1 + $0x4a8] sm:$0xff] }
 0x623   :  { %1853 = vmatprep.subr.mxu1 %v7267_v57  ;;  %1994 = vmatpush2.msra.mxu0 %v9385_v27  ;;  %9388 = vst [vmem:[#allocation126_spill] sm:$0xff] %v7281_v17  ;;  %v9389_v22 = vld [vmem:[#allocation117_spill] sm:$0xff] }
 0x624   :  { %1854 = vmatpush2.msra.mxu1 %v7274_v11  ;;  %1995 = vmatprep.subr.mxu0 %v9387_v58  ;;  %v7288_v27 = vld [vmem:[%s7975_s1 + $0x4a0] sm:$0xff]  ;;  %v7295_v58 = vld [vmem:[%s7975_s1 + $0x478] sm:$0xff]  ;;  %v9393_v11 = vld [vmem:[#allocation118_spill] sm:$0xff] }
 0x625   :  { %1855 = vmatprep.subr.mxu1 %v7281_v17  ;;  %1996 = vmatpush2.msra.mxu0 %v9389_v22  ;;  %9390 = vst [vmem:[#allocation127_spill] sm:$0xff] %v7288_v27  ;;  %v9391_v57 = vld [vmem:[#allocation25_spill] sm:$0xff]  ;;  %9392 = vst [vmem:[#allocation128_spill] sm:$0xff] %v7295_v58  ;;  %v7302_v22 = vld [vmem:[%s7975_s1 + $0x470] sm:$0xff] }
 0x626   :  { %1856 = vmatpush2.msra.mxu1 %v7288_v27  ;;  %1997 = vmatprep.subr.mxu0 %v9391_v57  ;;  %9394 = vst [vmem:[#allocation129_spill] sm:$0xff] %v7302_v22  ;;  %v9395_v17 = vld [vmem:[#allocation26_spill] sm:$0xff]  ;;  %v9397_v27 = vld [vmem:[#allocation119_spill] sm:$0xff] }
 0x627   :  { %1857 = vmatprep.subr.mxu1 %v7295_v58  ;;  %1998 = vmatpush2.msra.mxu0 %v9393_v11  ;;  %v7309_v57 = vld [vmem:[%s7975_s1 + $0x448] sm:$0xff]  ;;  %v7316_v11 = vld [vmem:[%s7975_s1 + $0x440] sm:$0xff]  ;;  %v9399_v58 = vld [vmem:[#allocation27_spill] sm:$0xff] }
 0x628   :  { %1858 = vmatpush2.msra.mxu1 %v7302_v22  ;;  %1999 = vmatprep.subr.mxu0 %v9395_v17  ;;  %9396 = vst [vmem:[#allocation130_spill] sm:$0xff] %v7309_v57  ;;  %9398 = vst [vmem:[#allocation131_spill] sm:$0xff] %v7316_v11  ;;  %v7323_v17 = vld [vmem:[%s7975_s1 + $0x418] sm:$0xff] }
 0x629   :  { %1859 = vmatprep.subr.mxu1 %v7309_v57  ;;  %2000 = vmatpush2.msra.mxu0 %v9397_v27  ;;  %9400 = vst [vmem:[#allocation132_spill] sm:$0xff] %v7323_v17  ;;  %v9401_v22 = vld [vmem:[#allocation120_spill] sm:$0xff]  ;;  %v7330_v27 = vld [vmem:[%s7975_s1 + $0x410] sm:$0xff] }
 0x62a   :  { %1860 = vmatpush2.msra.mxu1 %v7316_v11  ;;  %2001 = vmatprep.subr.mxu0 %v9399_v58  ;;  %9402 = vst [vmem:[#allocation133_spill] sm:$0xff] %v7330_v27  ;;  %v9403_v57 = vld [vmem:[#allocation28_spill] sm:$0xff]  ;;  %v7337_v58 = vld [vmem:[%s7975_s1 + $0x3e8] sm:$0xff] }
 0x62b   :  { %1861 = vmatprep.subr.mxu1 %v7323_v17  ;;  %2002 = vmatpush2.msra.mxu0 %v9401_v22  ;;  %9404 = vst [vmem:[#allocation134_spill] sm:$0xff] %v7337_v58  ;;  %v9405_v11 = vld [vmem:[#allocation29_spill] sm:$0xff]  ;;  %v9407_v17 = vld [vmem:[#allocation30_spill] sm:$0xff] }
 0x62c   :  { %1862 = vmatpush2.msra.mxu1 %v7330_v27  ;;  %2003 = vmatprep.subr.mxu0 %v9403_v57  ;;  %v7344_v22 = vld [vmem:[%s7975_s1 + $0x3e0] sm:$0xff]  ;;  %v7351_v57 = vld [vmem:[%s7975_s1 + $0x3b8] sm:$0xff] }
 0x62d   :  { %1863 = vmatprep.subr.mxu1 %v7337_v58  ;;  %2004 = vmatpush2.msra.mxu0 %v9405_v11  ;;  %9406 = vst [vmem:[#allocation135_spill] sm:$0xff] %v7344_v22  ;;  %9408 = vst [vmem:[#allocation136_spill] sm:$0xff] %v7351_v57  ;;  %v9409_v27 = vld [vmem:[#allocation31_spill] sm:$0xff] }
 0x62e   :  { %1864 = vmatpush2.msra.mxu1 %v7344_v22  ;;  %2005 = vmatprep.subr.mxu0 %v9407_v17  ;;  %v7358_v11 = vld [vmem:[%s7975_s1 + $0x3b0] sm:$0xff]  ;;  %v7364_v17 = vld [vmem:[%s7975_s1 + $0x398] sm:$0xff]  ;;  %v9425_v22 = vld [vmem:[#allocation33_spill] sm:$0xff] }
 0x62f   :  { %1865 = vmatprep.subr.mxu1 %v7351_v57  ;;  %2006 = vmatpush2.msra.mxu0 %v9409_v27  ;;  %9410 = vst [vmem:[#allocation137_spill] sm:$0xff] %v7358_v11  ;;  %9411 = vst [vmem:[#allocation138_spill] sm:$0xff] %v7364_v17  ;;  %v7370_v57 = vld [vmem:[%s7975_s1 + $0x388] sm:$0xff]  ;;  %v7376_v27 = vld [vmem:[%s7975_s1 + $0x390] sm:$0xff] }
 0x630   :  { %1866 = vmatpush2.msra.mxu1 %v7358_v11  ;;  %2007 = vmatprep.subr.mxu0 %v7364_v17  ;;  %9412 = vst [vmem:[#allocation139_spill] sm:$0xff] %v7370_v57  ;;  %9413 = vst [vmem:[#allocation140_spill] sm:$0xff] %v7376_v27  ;;  %v7382_v11 = vld [vmem:[%s7975_s1 + $0x380] sm:$0xff]  ;;  %v7388_v17 = vld [vmem:[%s7975_s1 + $0x368] sm:$0xff] }
 0x631   :  { %1867 = vmatprep.subr.mxu1 %v7370_v57  ;;  %2008 = vmatpush2.msra.mxu0 %v7376_v27  ;;  %9414 = vst [vmem:[#allocation141_spill] sm:$0xff] %v7382_v11  ;;  %9415 = vst [vmem:[#allocation142_spill] sm:$0xff] %v7388_v17  ;;  %v7394_v57 = vld [vmem:[%s7975_s1 + $0x358] sm:$0xff]  ;;  %v7400_v27 = vld [vmem:[%s7975_s1 + $0x360] sm:$0xff] }
 0x632   :  { %1868 = vmatpush2.msra.mxu1 %v7382_v11  ;;  %2009 = vmatprep.subr.mxu0 %v7388_v17  ;;  %9416 = vst [vmem:[#allocation143_spill] sm:$0xff] %v7394_v57  ;;  %9417 = vst [vmem:[#allocation144_spill] sm:$0xff] %v7400_v27  ;;  %v7406_v11 = vld [vmem:[%s7975_s1 + $0x350] sm:$0xff]  ;;  %v7412_v17 = vld [vmem:[%s7975_s1 + $0x338] sm:$0xff] }
 0x633   :  { %1869 = vmatprep.subr.mxu1 %v7394_v57  ;;  %2010 = vmatpush2.msra.mxu0 %v7400_v27  ;;  %9418 = vst [vmem:[#allocation145_spill] sm:$0xff] %v7406_v11  ;;  %9419 = vst [vmem:[#allocation146_spill] sm:$0xff] %v7412_v17  ;;  %v7418_v57 = vld [vmem:[%s7975_s1 + $0x328] sm:$0xff]  ;;  %v7424_v27 = vld [vmem:[%s7975_s1 + $0x330] sm:$0xff] }
 0x634   :  { %1870 = vmatpush2.msra.mxu1 %v7406_v11  ;;  %2011 = vmatprep.subr.mxu0 %v7412_v17  ;;  %9420 = vst [vmem:[#allocation147_spill] sm:$0xff] %v7418_v57  ;;  %9421 = vst [vmem:[#allocation148_spill] sm:$0xff] %v7424_v27  ;;  %v7430_v11 = vld [vmem:[%s7975_s1 + $0x320] sm:$0xff]  ;;  %v7436_v17 = vld [vmem:[%s7975_s1 + $0x308] sm:$0xff] }
 0x635   :  { %1871 = vmatprep.subr.mxu1 %v7418_v57  ;;  %2012 = vmatpush2.msra.mxu0 %v7424_v27  ;;  %9422 = vst [vmem:[#allocation149_spill] sm:$0xff] %v7430_v11  ;;  %9423 = vst [vmem:[#allocation150_spill] sm:$0xff] %v7436_v17  ;;  %v9424_v57 = vld [vmem:[#allocation32_spill] sm:$0xff] }
 0x636   :  { %1872 = vmatpush2.msra.mxu1 %v7430_v11  ;;  %2013 = vmatprep.subr.mxu0 %v7436_v17  ;;  %v7445_v27 = vld [vmem:[%s7975_s1 + $0x300] sm:$0xff]  ;;  %v9427_v11 = vld [vmem:[#allocation35_spill] sm:$0xff] }
 0x637   :  { %1874 = vmatmul.mubr.f32.vlgmr.msra.gmra.mxu1 %v6958_v59  ;;  %2022 = vmatprep.subr.mxu1 %v9424_v57  ;;  %9426 = vst [vmem:[#allocation151_spill] sm:$0xff] %v7445_v27  ;;  %v7452_v58 = vld [vmem:[%s7975_s1 + $0x2f8] sm:$0xff]  ;;  %v9429_v59 = vld [vmem:[#allocation37_spill] sm:$0xff] }
 0x638   :  { %2023 = vmatpush1.msra.mxu1 %v9425_v22  ;;  %2014 = vmatpush2.msra.mxu0 %v7445_v27  ;;  %9428 = vst [vmem:[#allocation152_spill] sm:$0xff] %v7452_v58  ;;  %v9430_v57 = vld [vmem:[#allocation39_spill] sm:$0xff]  ;;  %v9431_v22 = vld [vmem:[#allocation41_spill] sm:$0xff] }
 0x639   :  { %2024 = vmatprep.subr.mxu1 %v9427_v11  ;;  %2093 = vmatprep.subr.mxu0 %v7452_v58  ;;  %v9432_v17 = vld [vmem:[#allocation43_spill] sm:$0xff]  ;;  %v9435_v11 = vld [vmem:[#allocation49_spill] sm:$0xff] }
 0x63a   :  { %2025 = vmatpush1.msra.mxu1 %v9429_v59  ;;  %v9434_v27 = vld [vmem:[#allocation47_spill] sm:$0xff]  ;;  %v9439_v58 = vld [vmem:[#allocation57_spill] sm:$0xff] }
 0x63b   :  { %2026 = vmatprep.subr.mxu1 %v9430_v57  ;;  %v9440_v59 = vld [vmem:[#allocation59_spill] sm:$0xff]  ;;  %v9441_v57 = vld [vmem:[#allocation61_spill] sm:$0xff] }
 0x63c   :  { %2027 = vmatpush1.msra.mxu1 %v9431_v22  ;;  %v9442_v22 = vld [vmem:[#allocation63_spill] sm:$0xff] }
 0x63d   :  { %2028 = vmatprep.subr.mxu1 %v9432_v17  ;;  %v9443_v17 = vld [vmem:[#allocation66_spill] sm:$0xff] }
 0x63e   :  { %2029 = vmatpush1.msra.mxu1 %v9433_v10  ;;  %v9444_v10 = vld [vmem:[#allocation68_spill] sm:$0xff] }
 0x63f   :  { %2030 = vmatprep.subr.mxu1 %v9434_v27  ;;  %v9445_v27 = vld [vmem:[#allocation70_spill] sm:$0xff] }
 0x640   :  { %2031 = vmatpush1.msra.mxu1 %v9435_v11  ;;  %v9446_v11 = vld [vmem:[#allocation72_spill] sm:$0xff] }
 0x641   :  { %2032 = vmatprep.subr.mxu1 %v9436_v21  ;;  %v9447_v21 = vld [vmem:[#allocation74_spill] sm:$0xff] }
 0x642   :  { %2033 = vmatpush1.msra.mxu1 %v9437_v54  ;;  %v9448_v54 = vld [vmem:[#allocation76_spill] sm:$0xff] }
 0x643   :  { %2034 = vmatprep.subr.mxu1 %v9438_v1  ;;  %v9449_v1 = vld [vmem:[#allocation78_spill] sm:$0xff] }
 0x644   :  { %2035 = vmatpush1.msra.mxu1 %v9439_v58  ;;  %v9450_v58 = vld [vmem:[#allocation80_spill] sm:$0xff] }
 0x645   :  { %2036 = vmatprep.subr.mxu1 %v9440_v59  ;;  %v9451_v59 = vld [vmem:[#allocation82_spill] sm:$0xff] }
 0x646   :  { %2037 = vmatpush1.msra.mxu1 %v9441_v57  ;;  %v9452_v57 = vld [vmem:[#allocation65_spill] sm:$0xff] }
 0x647   :  { %2038 = vmatprep.subr.mxu1 %v9442_v22  ;;  %v9453_v22 = vld [vmem:[#allocation67_spill] sm:$0xff] }
 0x648   :  { %2039 = vmatpush1.msra.mxu1 %v9443_v17  ;;  %v9454_v17 = vld [vmem:[#allocation69_spill] sm:$0xff] }
 0x649   :  { %2040 = vmatprep.subr.mxu1 %v9444_v10  ;;  %v9455_v10 = vld [vmem:[#allocation71_spill] sm:$0xff] }
 0x64a   :  { %2041 = vmatpush1.msra.mxu1 %v9445_v27  ;;  %v9456_v27 = vld [vmem:[#allocation73_spill] sm:$0xff] }
 0x64b   :  { %2042 = vmatprep.subr.mxu1 %v9446_v11  ;;  %v9457_v11 = vld [vmem:[#allocation75_spill] sm:$0xff] }
 0x64c   :  { %2043 = vmatpush1.msra.mxu1 %v9447_v21  ;;  %v9458_v21 = vld [vmem:[#allocation77_spill] sm:$0xff] }
 0x64d   :  { %2044 = vmatprep.subr.mxu1 %v9448_v54  ;;  %v9459_v54 = vld [vmem:[#allocation79_spill] sm:$0xff] }
 0x64e   :  { %2045 = vmatpush1.msra.mxu1 %v9449_v1  ;;  %v9460_v1 = vld [vmem:[#allocation81_spill] sm:$0xff] }
 0x64f   :  { %2046 = vmatprep.subr.mxu1 %v9450_v58  ;;  %v9461_v58 = vld [vmem:[#allocation83_spill] sm:$0xff] }
 0x650   :  { %2047 = vmatpush1.msra.mxu1 %v9451_v59  ;;  %v9462_v59 = vld [vmem:[#allocation85_spill] sm:$0xff] }
 0x651   :  { %2048 = vmatprep.subr.mxu1 %v9452_v57  ;;  %v9463_v57 = vld [vmem:[#allocation87_spill] sm:$0xff] }
 0x652   :  { %2049 = vmatpush1.msra.mxu1 %v9453_v22  ;;  %v9464_v22 = vld [vmem:[#allocation89_spill] sm:$0xff] }
 0x653   :  { %2050 = vmatprep.subr.mxu1 %v9454_v17  ;;  %v9465_v17 = vld [vmem:[#allocation91_spill] sm:$0xff] }
 0x654   :  { %2051 = vmatpush1.msra.mxu1 %v9455_v10  ;;  %v9466_v10 = vld [vmem:[#allocation93_spill] sm:$0xff] }
 0x655   :  { %2052 = vmatprep.subr.mxu1 %v9456_v27  ;;  %v9467_v27 = vld [vmem:[#allocation95_spill] sm:$0xff] }
 0x656   :  { %2053 = vmatpush1.msra.mxu1 %v9457_v11  ;;  %v9468_v11 = vld [vmem:[#allocation96_spill] sm:$0xff] }
 0x657   :  { %2054 = vmatprep.subr.mxu1 %v9458_v21  ;;  %v9469_v21 = vld [vmem:[#allocation97_spill] sm:$0xff] }
 0x658   :  { %2055 = vmatpush2.msra.mxu1 %v9459_v54  ;;  %v9470_v54 = vld [vmem:[#allocation50_spill] sm:$0xff] }
 0x659   :  { %2056 = vmatprep.subr.mxu1 %v9460_v1  ;;  %v9471_v1 = vld [vmem:[#allocation98_spill] sm:$0xff] }
 0x65a   :  { %2057 = vmatpush2.msra.mxu1 %v9461_v58  ;;  %v9472_v58 = vld [vmem:[#allocation52_spill] sm:$0xff] }
 0x65b   :  { %2058 = vmatprep.subr.mxu1 %v9462_v59  ;;  %v9473_v59 = vld [vmem:[#allocation99_spill] sm:$0xff] }
 0x65c   :  { %2059 = vmatpush2.msra.mxu1 %v9463_v57  ;;  %v9474_v57 = vld [vmem:[#allocation54_spill] sm:$0xff] }
 0x65d   :  { %2060 = vmatprep.subr.mxu1 %v9464_v22  ;;  %v9475_v22 = vld [vmem:[#allocation100_spill] sm:$0xff] }
 0x65e   :  { %2061 = vmatpush2.msra.mxu1 %v9465_v17  ;;  %v9476_v17 = vld [vmem:[#allocation56_spill] sm:$0xff] }
 0x65f   :  { %2062 = vmatprep.subr.mxu1 %v9466_v10  ;;  %v9477_v10 = vld [vmem:[#allocation101_spill] sm:$0xff] }
 0x660   :  { %2063 = vmatpush2.msra.mxu1 %v9467_v27  ;;  %v9478_v27 = vld [vmem:[#allocation58_spill] sm:$0xff] }
 0x661   :  { %2064 = vmatprep.subr.mxu1 %v9468_v11  ;;  %v9479_v11 = vld [vmem:[#allocation102_spill] sm:$0xff] }
 0x662   :  { %2065 = vmatpush2.msra.mxu1 %v9469_v21  ;;  %v9480_v21 = vld [vmem:[#allocation60_spill] sm:$0xff] }
 0x663   :  { %2066 = vmatprep.subr.mxu1 %v9470_v54  ;;  %v9481_v54 = vld [vmem:[#allocation62_spill] sm:$0xff] }
 0x664   :  { %2067 = vmatpush2.msra.mxu1 %v9471_v1  ;;  %v9482_v1 = vld [vmem:[#allocation64_spill] sm:$0xff] }
 0x665   :  { %2068 = vmatprep.subr.mxu1 %v9472_v58  ;;  %v9483_v58 = vld [vmem:[#allocation103_spill] sm:$0xff] }
 0x666   :  { %2069 = vmatpush2.msra.mxu1 %v9473_v59 }
 0x667   :  { %2070 = vmatprep.subr.mxu1 %v9474_v57 }
 0x668   :  { %2071 = vmatpush2.msra.mxu1 %v9475_v22  ;;  %v7513_v22 = vld [vmem:[%s7975_s1 + $0x378] sm:$0xff] }
 0x669   :  { %2072 = vmatprep.subr.mxu1 %v9476_v17  ;;  %9484 = vst [vmem:[#allocation153_spill] sm:$0xff] %v7513_v22 }
 0x66a   :  { %2073 = vmatpush2.msra.mxu1 %v9477_v10  ;;  %v9492_v10 = vld [vmem:[#allocation5_spill] sm:$0xff] }
 0x66b   :  { %2074 = vmatprep.subr.mxu1 %v9478_v27  ;;  %v7519_v27 = vld [vmem:[%s7975_s1 + $0x370] sm:$0xff] }
 0x66c   :  { %2075 = vmatpush2.msra.mxu1 %v9479_v11  ;;  %9485 = vst [vmem:[#allocation154_spill] sm:$0xff] %v7519_v27  ;;  %v9491_v11 = vld [vmem:[#allocation36_spill] sm:$0xff] }
 0x66d   :  { %2076 = vmatprep.subr.mxu1 %v9480_v21 }
 0x66e   :  { %2077 = vmatpush2.msra.mxu1 %v9481_v54 }
 0x66f   :  { %2078 = vmatprep.subr.mxu1 %v9482_v1  ;;  %v7525_v1 = vld [vmem:[%s7975_s1 + $0x348] sm:$0xff] }
 0x670   :  { %2079 = vmatpush2.msra.mxu1 %v9483_v58  ;;  %9486 = vst [vmem:[#allocation155_spill] sm:$0xff] %v7525_v1  ;;  %v7531_v58 = vld [vmem:[%s7975_s1 + $0x340] sm:$0xff] }
 0x671   :  { %2080 = vmatprep.subr.mxu1 %v7513_v22  ;;  %9487 = vst [vmem:[#allocation156_spill] sm:$0xff] %v7531_v58  ;;  %v7537_v22 = vld [vmem:[%s7975_s1 + $0x318] sm:$0xff] }
 0x672   :  { %2081 = vmatpush2.msra.mxu1 %v7519_v27  ;;  %9488 = vst [vmem:[#allocation157_spill] sm:$0xff] %v7537_v22  ;;  %v7543_v27 = vld [vmem:[%s7975_s1 + $0x310] sm:$0xff] }
 0x673   :  { %2082 = vmatprep.subr.mxu1 %v7525_v1  ;;  %9489 = vst [vmem:[#allocation158_spill] sm:$0xff] %v7543_v27  ;;  %v9490_v1 = vld [vmem:[#allocation34_spill] sm:$0xff] }
 0x674   :  { %2083 = vmatpush2.msra.mxu1 %v7531_v58 }
 0x675   :  { %2084 = vmatprep.subr.mxu1 %v7537_v22  ;;  %v2658_v22 = vld [vmem:[%s7974_s0 + $0x3c] sm:$0xff] }
 0x676   :  { %2085 = vmatpush2.msra.mxu1 %v7543_v27 }
 0x677   :  { %2235 = vmatprep.subr.mxu1 %v9490_v1 }
 0x6b7   :  { %v1733_v54 = vpop.f32.mrf.mxu1  ;;  %v1804_v59 = vpop.f32.mrf.mxu0 }
 0x6b8   :  { %v1734_v17 = vadd.f32 %v1733_v54, %v9492_v10  ;;  %v1805_v1 = vadd.f32 %v1804_v59, %v4536_v20 }
 0x6b9   :  { %v1735_v21 = vpop.f32.mrf.mxu1  ;;  %v1806_v43 = vpop.f32.mrf.mxu0 }
 0x6ba   :  { %v1736_v58 = vadd.f32 %v1735_v21, %v9491_v11  ;;  %v1807_v27 = vadd.f32 %v1806_v43, %v4538_v47  ;;  %v1899_v21 = vrot.slane %v2658_v22, 4 }
 0x6bc   :  { %v1882_v57 = vcombine.low %v1734_v17, %v1736_v58  ;;  %v1903_v39 = vcombine.low %v1805_v1, %v1807_v27 }
 0x6be   :  { %v1889_v0 = vrot.slane %v1882_v57, %v4530_v61  ;;  %v1910_v54 = vrot.slane %v1903_v39, %v4530_v61  ;;  %v2659_v39 = vld [vmem:[%s7974_s0 + $0x44] sm:$0xf] }
 0x6c0   :  { %v1891_v35 = vadd.f32 %v2658_v22, %v1889_v0  ;;  %v1912_v17 = vadd.f32 %v1910_v54, %v1899_v21 }
 0x6c2   :  { %v2660_v37 = vmul.f32 -1.442695, %v1891_v35  ;;  %v2661_v58 = vmul.f32 -1.442695, %v1912_v17 }
 0x6c4   :  { %2759 = vpow2.f32 %v2660_v37 }
 0x6c5   :  { %2761 = vpow2.f32 %v2661_v58 }
 0x6d1   :  { %v2760_v10 = vpop.eup %2759 }
 0x6d2   :  { %v1895_v57 = vadd.f32 1.0, %v2760_v10  ;;  %v2762_v45 = vpop.eup %2761 }
 0x6d3   :  { %v1916_v59 = vadd.f32 1.0, %v2762_v45 }
 0x6d4   :  { %2763 = vrcp.f32 %v1895_v57  ;;  %v9507_v57 = vld [vmem:[#allocation13_spill] sm:$0xff] }
 0x6d5   :  { %2765 = vrcp.f32 %v1916_v59  ;;  %v9510_v59 = vld [vmem:[#allocation106_spill] sm:$0xff] }
 0x6e1   :  { %v2764_v27 = vpop.eup %2763 }
 0x6e2   :  { %v2766_v1 = vpop.eup %2765 }
 0x6e3   :  { %v1933_v21 = vsub.f32 1.0, %v2766_v1 }
 0x6f7   :  { %v1875_v11 = vpop.f32.mrf.mxu1 }
 0x6f8   :  { %v1876_v0 = vadd.f32 %v1875_v11, %v4543_v53  ;;  %v1935_v11 = vmul.f32 %v2766_v1, %v6954_v23  ;;  %v9506_v23 = vld [vmem:[#allocation104_spill] sm:$0xff]  ;;  %v9517_v1 = vld [vmem:[#allocation18_spill] sm:$0xff] }
 0x6f9   :  { %v1877_v31 = vpop.f32.mrf.mxu1 }
 0x6fa   :  { %v1878_v43 = vadd.f32 %v1877_v31, %v4545_v51 }
 0x6fc   :  { %v1921_v35 = vcombine.low %v1876_v0, %v1878_v43  ;;  %v9508_v0 = vld [vmem:[#allocation105_spill] sm:$0xff]  ;;  %v9509_v43 = vld [vmem:[#allocation14_spill] sm:$0xff] }
 0x6fe   :  { %v1928_v37 = vrot.slane %v1921_v35, %v4530_v61  ;;  %v9511_v35 = vld [vmem:[#allocation15_spill] sm:$0xff] }
 0x700   :  { %v1930_v22 = vmul.f32 %v2764_v27, %v1928_v37  ;;  %v9512_v37 = vld [vmem:[#allocation107_spill] sm:$0xff]  ;;  %v9513_v27 = vld [vmem:[#allocation16_spill] sm:$0xff] }
 0x702   :  { %v1931_v10 = vadd.f32 %v2659_v39, %v1930_v22  ;;  %v9514_v39 = vld [vmem:[#allocation108_spill] sm:$0xff]  ;;  %v9515_v22 = vld [vmem:[#allocation17_spill] sm:$0xff] }
 0x704   :  { %2767 = vtanh.f32 %v1931_v10  ;;  %v9516_v10 = vld [vmem:[#allocation109_spill] sm:$0xff] }
 0x711   :  { %v2768_v54 = vpop.eup %2767 }
 0x712   :  { %v1934_v17 = vmul.f32 %v2768_v54, %v1933_v21  ;;  %v9518_v21 = vld [vmem:[#allocation110_spill] sm:$0xff]  ;;  %v9519_v54 = vld [vmem:[#allocation84_spill] sm:$0xff] }
 0x714   :  { %v7563_v31 = vadd.f32 %v1935_v11, %v1934_v17  ;;  %v9520_v17 = vld [vmem:[#allocation111_spill] sm:$0xff] }
 0x715   :  { %v9521_v11 = vld [vmem:[#allocation19_spill] sm:$0xff] }
 0x716   :  { %v7567_v45 = vrot.slane %v7563_v31, %v4530_v61 }
 0x718   :  { %v1948_v58 = vcombine.high %v7567_v45, %v7567_v45 }
 0x71a   :  { %2015 = vmatprep.mubr.f32.mxu0 %v1948_v58  ;;  %2086 = vmatprep.mubr.f32.mxu1 %v1948_v58 }
 0x71b   :  { %2016 = vmatmul.mubr.f32.vlgmr.msra.gmra.mxu0 %v7567_v45  ;;  %2087 = vmatmul.mubr.f32.vlgmr.msra.gmra.mxu1 %v7567_v45 }
 0x71c   :  { %2094 = vmatpush1.msra.mxu0 %v6967_v13  ;;  %2157 = vmatprep.mubr.f32.mxu0 %v1948_v58  ;;  %v9522_v58 = vld [vmem:[#allocation112_spill] sm:$0xff] }
 0x71d   :  { %2095 = vmatprep.subr.mxu0 %v6973_v9  ;;  %2236 = vmatpush1.msra.mxu1 %v6185_v2  ;;  %v9493_v2 = vld [vmem:[#allocation6_spill] sm:$0xff] }
 0x71e   :  { %2096 = vmatpush1.msra.mxu0 %v6980_v19  ;;  %2237 = vmatprep.subr.mxu1 %v6192_v14  ;;  %v9494_v14 = vld [vmem:[#allocation38_spill] sm:$0xff] }
 0x71f   :  { %2097 = vmatprep.subr.mxu0 %v6987_v24  ;;  %2238 = vmatpush1.msra.mxu1 %v6199_v32  ;;  %v9495_v32 = vld [vmem:[#allocation7_spill] sm:$0xff] }
 0x720   :  { %2098 = vmatpush1.msra.mxu0 %v6994_v7  ;;  %2239 = vmatprep.subr.mxu1 %v6206_v49  ;;  %v9496_v49 = vld [vmem:[#allocation40_spill] sm:$0xff] }
 0x721   :  { %2099 = vmatprep.subr.mxu0 %v7001_v8  ;;  %2240 = vmatpush1.msra.mxu1 %v6213_v52  ;;  %v9497_v52 = vld [vmem:[#allocation8_spill] sm:$0xff] }
 0x722   :  { %2100 = vmatpush1.msra.mxu0 %v7008_v6  ;;  %2241 = vmatprep.subr.mxu1 %v6220_v40  ;;  %v9498_v40 = vld [vmem:[#allocation42_spill] sm:$0xff] }
 0x723   :  { %2101 = vmatprep.subr.mxu0 %v7015_v62  ;;  %2242 = vmatpush1.msra.mxu1 %v6227_v38  ;;  %v9499_v38 = vld [vmem:[#allocation9_spill] sm:$0xff] }
 0x724   :  { %2102 = vmatpush1.msra.mxu0 %v7022_v5  ;;  %2243 = vmatprep.subr.mxu1 %v6234_v48  ;;  %v9500_v48 = vld [vmem:[#allocation44_spill] sm:$0xff] }
 0x725   :  { %2103 = vmatprep.subr.mxu0 %v7029_v29  ;;  %2244 = vmatpush1.msra.mxu1 %v6241_v30  ;;  %v9501_v30 = vld [vmem:[#allocation10_spill] sm:$0xff] }
 0x726   :  { %2104 = vmatpush1.msra.mxu0 %v7036_v16  ;;  %2245 = vmatprep.subr.mxu1 %v6248_v63  ;;  %v9502_v63 = vld [vmem:[#allocation46_spill] sm:$0xff] }
 0x727   :  { %2105 = vmatprep.subr.mxu0 %v7043_v12  ;;  %2246 = vmatpush1.msra.mxu1 %v6255_v28  ;;  %v9503_v28 = vld [vmem:[#allocation11_spill] sm:$0xff] }
 0x728   :  { %2106 = vmatpush1.msra.mxu0 %v7050_v26  ;;  %2247 = vmatprep.subr.mxu1 %v6262_v50  ;;  %v9504_v50 = vld [vmem:[#allocation48_spill] sm:$0xff] }
 0x729   :  { %2107 = vmatprep.subr.mxu0 %v7057_v3  ;;  %2248 = vmatpush1.msra.mxu1 %v6269_v34  ;;  %v9505_v34 = vld [vmem:[#allocation12_spill] sm:$0xff] }
 0x72a   :  { %2108 = vmatpush1.msra.mxu0 %v7064_v18  ;;  %2249 = vmatprep.subr.mxu1 %v9493_v2  ;;  %v9523_v2 = vld [vmem:[#allocation86_spill] sm:$0xff] }
 0x72b   :  { %2109 = vmatprep.subr.mxu0 %v7071_v15  ;;  %2250 = vmatpush1.msra.mxu1 %v9494_v14  ;;  %v9524_v14 = vld [vmem:[#allocation113_spill] sm:$0xff] }
 0x72c   :  { %2110 = vmatpush1.msra.mxu0 %v7078_v55  ;;  %2251 = vmatprep.subr.mxu1 %v9495_v32  ;;  %v9525_v32 = vld [vmem:[#allocation20_spill] sm:$0xff] }
 0x72d   :  { %2111 = vmatprep.subr.mxu0 %v7085_v46  ;;  %2252 = vmatpush1.msra.mxu1 %v9496_v49  ;;  %v9526_v49 = vld [vmem:[#allocation114_spill] sm:$0xff] }
 0x72e   :  { %2112 = vmatpush1.msra.mxu0 %v7092_v44  ;;  %2253 = vmatprep.subr.mxu1 %v9497_v52  ;;  %v9527_v52 = vld [vmem:[#allocation88_spill] sm:$0xff] }
 0x72f   :  { %2113 = vmatprep.subr.mxu0 %v7099_v60  ;;  %2254 = vmatpush1.msra.mxu1 %v9498_v40  ;;  %v9528_v40 = vld [vmem:[#allocation115_spill] sm:$0xff] }
 0x730   :  { %2114 = vmatpush1.msra.mxu0 %v7106_v42  ;;  %2255 = vmatprep.subr.mxu1 %v9499_v38  ;;  %v9529_v38 = vld [vmem:[#allocation21_spill] sm:$0xff] }
 0x731   :  { %2115 = vmatprep.subr.mxu0 %v7113_v36  ;;  %2256 = vmatpush1.msra.mxu1 %v9500_v48  ;;  %v9530_v48 = vld [vmem:[#allocation116_spill] sm:$0xff] }
 0x732   :  { %2116 = vmatpush1.msra.mxu0 %v7120_v25  ;;  %2257 = vmatprep.subr.mxu1 %v9501_v30  ;;  %v9531_v30 = vld [vmem:[#allocation90_spill] sm:$0xff] }
 0x733   :  { %2117 = vmatprep.subr.mxu0 %v7127_v33  ;;  %2258 = vmatpush1.msra.mxu1 %v9502_v63  ;;  %v9532_v63 = vld [vmem:[#allocation121_spill] sm:$0xff] }
 0x734   :  { %2118 = vmatpush1.msra.mxu0 %v7134_v56  ;;  %2259 = vmatprep.subr.mxu1 %v9503_v28  ;;  %v9533_v28 = vld [vmem:[#allocation22_spill] sm:$0xff] }
 0x735   :  { %2119 = vmatprep.subr.mxu0 %v7141_v41  ;;  %2260 = vmatpush1.msra.mxu1 %v9504_v50  ;;  %v9534_v50 = vld [vmem:[#allocation122_spill] sm:$0xff] }
 0x736   :  { %2120 = vmatpush1.msra.mxu0 %v7148_v4  ;;  %2261 = vmatprep.subr.mxu1 %v9505_v34  ;;  %v9535_v34 = vld [vmem:[#allocation92_spill] sm:$0xff] }
 0x737   :  { %2121 = vmatprep.subr.mxu0 %v9506_v23  ;;  %2262 = vmatpush1.msra.mxu1 %v9507_v57  ;;  %v9536_v57 = vld [vmem:[#allocation123_spill] sm:$0xff] }
 0x738   :  { %2122 = vmatpush1.msra.mxu0 %v9508_v0  ;;  %2263 = vmatprep.subr.mxu1 %v9509_v43  ;;  %v9537_v43 = vld [vmem:[#allocation23_spill] sm:$0xff] }
 0x739   :  { %2123 = vmatprep.subr.mxu0 %v9510_v59  ;;  %2264 = vmatpush1.msra.mxu1 %v9511_v35  ;;  %v9538_v35 = vld [vmem:[#allocation124_spill] sm:$0xff] }
 0x73a   :  { %2124 = vmatpush1.msra.mxu0 %v9512_v37  ;;  %2265 = vmatprep.subr.mxu1 %v9513_v27  ;;  %v9539_v27 = vld [vmem:[#allocation94_spill] sm:$0xff] }
 0x73b   :  { %2125 = vmatprep.subr.mxu0 %v9514_v39  ;;  %2266 = vmatpush1.msra.mxu1 %v9515_v22  ;;  %v9540_v22 = vld [vmem:[#allocation125_spill] sm:$0xff] }
 0x73c   :  { %2126 = vmatpush2.msra.mxu0 %v9516_v10  ;;  %2267 = vmatprep.subr.mxu1 %v9517_v1  ;;  %v9541_v1 = vld [vmem:[#allocation24_spill] sm:$0xff] }
 0x73d   :  { %2127 = vmatprep.subr.mxu0 %v9518_v21  ;;  %2268 = vmatpush2.msra.mxu1 %v9519_v54  ;;  %v9542_v54 = vld [vmem:[#allocation126_spill] sm:$0xff] }
 0x73e   :  { %2128 = vmatpush2.msra.mxu0 %v9520_v17  ;;  %2269 = vmatprep.subr.mxu1 %v9521_v11  ;;  %v9543_v11 = vld [vmem:[#allocation117_spill] sm:$0xff] }
 0x73f   :  { %2129 = vmatprep.subr.mxu0 %v9522_v58  ;;  %2270 = vmatpush2.msra.mxu1 %v9523_v2  ;;  %v9544_v2 = vld [vmem:[#allocation127_spill] sm:$0xff] }
 0x740   :  { %2130 = vmatpush2.msra.mxu0 %v9524_v14  ;;  %2271 = vmatprep.subr.mxu1 %v9525_v32  ;;  %v9545_v32 = vld [vmem:[#allocation25_spill] sm:$0xff] }
 0x741   :  { %2131 = vmatprep.subr.mxu0 %v9526_v49  ;;  %2272 = vmatpush2.msra.mxu1 %v9527_v52  ;;  %v9546_v52 = vld [vmem:[#allocation128_spill] sm:$0xff] }
 0x742   :  { %2132 = vmatpush2.msra.mxu0 %v9528_v40  ;;  %2273 = vmatprep.subr.mxu1 %v9529_v38  ;;  %v9547_v38 = vld [vmem:[#allocation118_spill] sm:$0xff] }
 0x743   :  { %2133 = vmatprep.subr.mxu0 %v9530_v48  ;;  %2274 = vmatpush2.msra.mxu1 %v9531_v30  ;;  %v9548_v30 = vld [vmem:[#allocation129_spill] sm:$0xff] }
 0x744   :  { %2134 = vmatpush2.msra.mxu0 %v9532_v63  ;;  %2275 = vmatprep.subr.mxu1 %v9533_v28  ;;  %v9549_v28 = vld [vmem:[#allocation26_spill] sm:$0xff] }
 0x745   :  { %2135 = vmatprep.subr.mxu0 %v9534_v50  ;;  %2276 = vmatpush2.msra.mxu1 %v9535_v34  ;;  %v9550_v34 = vld [vmem:[#allocation130_spill] sm:$0xff] }
 0x746   :  { %2136 = vmatpush2.msra.mxu0 %v9536_v57  ;;  %2277 = vmatprep.subr.mxu1 %v9537_v43  ;;  %v9551_v43 = vld [vmem:[#allocation119_spill] sm:$0xff] }
 0x747   :  { %2137 = vmatprep.subr.mxu0 %v9538_v35  ;;  %2278 = vmatpush2.msra.mxu1 %v9539_v27  ;;  %v9552_v27 = vld [vmem:[#allocation131_spill] sm:$0xff] }
 0x748   :  { %2138 = vmatpush2.msra.mxu0 %v9540_v22  ;;  %2279 = vmatprep.subr.mxu1 %v9541_v1  ;;  %v9553_v1 = vld [vmem:[#allocation27_spill] sm:$0xff] }
 0x749   :  { %2139 = vmatprep.subr.mxu0 %v9542_v54  ;;  %2280 = vmatpush2.msra.mxu1 %v9543_v11  ;;  %v9554_v11 = vld [vmem:[#allocation132_spill] sm:$0xff]  ;;  %v9645_v54 = vld [vmem:[#allocation5_spill] sm:$0xff] }
 0x74a   :  { %2140 = vmatpush2.msra.mxu0 %v9544_v2  ;;  %2281 = vmatprep.subr.mxu1 %v9545_v32  ;;  %v9555_v2 = vld [vmem:[#allocation120_spill] sm:$0xff]  ;;  %v9556_v32 = vld [vmem:[#allocation133_spill] sm:$0xff] }
 0x74b   :  { %2141 = vmatprep.subr.mxu0 %v9546_v52  ;;  %2282 = vmatpush2.msra.mxu1 %v9547_v38  ;;  %v9557_v52 = vld [vmem:[#allocation28_spill] sm:$0xff]  ;;  %v9558_v38 = vld [vmem:[#allocation134_spill] sm:$0xff] }
 0x74c   :  { %2142 = vmatpush2.msra.mxu0 %v9548_v30  ;;  %2283 = vmatprep.subr.mxu1 %v9549_v28  ;;  %v9559_v30 = vld [vmem:[#allocation29_spill] sm:$0xff]  ;;  %v9560_v28 = vld [vmem:[#allocation135_spill] sm:$0xff] }
 0x74d   :  { %2143 = vmatprep.subr.mxu0 %v9550_v34  ;;  %2284 = vmatpush2.msra.mxu1 %v9551_v43  ;;  %v9561_v34 = vld [vmem:[#allocation30_spill] sm:$0xff]  ;;  %v9562_v43 = vld [vmem:[#allocation136_spill] sm:$0xff] }
 0x74e   :  { %2144 = vmatpush2.msra.mxu0 %v9552_v27  ;;  %2285 = vmatprep.subr.mxu1 %v9553_v1  ;;  %v9563_v27 = vld [vmem:[#allocation31_spill] sm:$0xff]  ;;  %v9564_v1 = vld [vmem:[#allocation137_spill] sm:$0xff] }
 0x74f   :  { %2145 = vmatprep.subr.mxu0 %v9554_v11  ;;  %2286 = vmatpush2.msra.mxu1 %v9555_v2  ;;  %v9565_v11 = vld [vmem:[#allocation138_spill] sm:$0xff]  ;;  %v9566_v2 = vld [vmem:[#allocation139_spill] sm:$0xff] }
 0x750   :  { %2146 = vmatpush2.msra.mxu0 %v9556_v32  ;;  %2287 = vmatprep.subr.mxu1 %v9557_v52  ;;  %v9567_v32 = vld [vmem:[#allocation140_spill] sm:$0xff]  ;;  %v9568_v52 = vld [vmem:[#allocation141_spill] sm:$0xff] }
 0x751   :  { %2147 = vmatprep.subr.mxu0 %v9558_v38  ;;  %2288 = vmatpush2.msra.mxu1 %v9559_v30  ;;  %v9569_v38 = vld [vmem:[#allocation142_spill] sm:$0xff]  ;;  %v9570_v30 = vld [vmem:[#allocation143_spill] sm:$0xff] }
 0x752   :  { %2148 = vmatpush2.msra.mxu0 %v9560_v28  ;;  %2289 = vmatprep.subr.mxu1 %v9561_v34  ;;  %v9571_v28 = vld [vmem:[#allocation144_spill] sm:$0xff]  ;;  %v9572_v34 = vld [vmem:[#allocation145_spill] sm:$0xff] }
 0x753   :  { %2149 = vmatprep.subr.mxu0 %v9562_v43  ;;  %2290 = vmatpush2.msra.mxu1 %v9563_v27  ;;  %v9573_v43 = vld [vmem:[#allocation146_spill] sm:$0xff]  ;;  %v9574_v27 = vld [vmem:[#allocation147_spill] sm:$0xff] }
 0x754   :  { %2150 = vmatpush2.msra.mxu0 %v9564_v1  ;;  %2291 = vmatprep.subr.mxu1 %v9565_v11  ;;  %v9575_v1 = vld [vmem:[#allocation148_spill] sm:$0xff]  ;;  %v9576_v11 = vld [vmem:[#allocation149_spill] sm:$0xff] }
 0x755   :  { %2151 = vmatprep.subr.mxu0 %v9566_v2  ;;  %2292 = vmatpush2.msra.mxu1 %v9567_v32  ;;  %v9577_v2 = vld [vmem:[#allocation150_spill] sm:$0xff]  ;;  %v9578_v32 = vld [vmem:[#allocation32_spill] sm:$0xff] }
 0x756   :  { %2152 = vmatpush2.msra.mxu0 %v9568_v52  ;;  %2293 = vmatprep.subr.mxu1 %v9569_v38  ;;  %v9579_v38 = vld [vmem:[#allocation33_spill] sm:$0xff]  ;;  %v9644_v52 = vld [vmem:[#allocation36_spill] sm:$0xff] }
 0x757   :  { %2153 = vmatprep.subr.mxu0 %v9570_v30  ;;  %2294 = vmatpush2.msra.mxu1 %v9571_v28  ;;  %v9580_v30 = vld [vmem:[#allocation151_spill] sm:$0xff] }
 0x758   :  { %2154 = vmatpush2.msra.mxu0 %v9572_v34  ;;  %2295 = vmatprep.subr.mxu1 %v9573_v43  ;;  %v9581_v28 = vld [vmem:[#allocation35_spill] sm:$0xff]  ;;  %v9582_v34 = vld [vmem:[#allocation152_spill] sm:$0xff]  ;;  %v9583_v43 = vld [vmem:[#allocation37_spill] sm:$0xff] }
 0x759   :  { %2155 = vmatprep.subr.mxu0 %v9574_v27  ;;  %2296 = vmatpush2.msra.mxu1 %v9575_v1  ;;  %v9584_v27 = vld [vmem:[#allocation39_spill] sm:$0xff]  ;;  %v9585_v1 = vld [vmem:[#allocation41_spill] sm:$0xff] }
 0x75a   :  { %2156 = vmatpush2.msra.mxu0 %v9576_v11  ;;  %2297 = vmatprep.subr.mxu1 %v9577_v2  ;;  %v9586_v11 = vld [vmem:[#allocation43_spill] sm:$0xff]  ;;  %v9587_v2 = vld [vmem:[#allocation45_spill] sm:$0xff] }
 0x75b   :  { %2158 = vmatmul.mubr.f32.vlgmr.msra.gmra.mxu0 %v7567_v45  ;;  %2306 = vmatprep.subr.mxu0 %v9578_v32  ;;  %v9588_v45 = vld [vmem:[#allocation47_spill] sm:$0xff]  ;;  %v9589_v32 = vld [vmem:[#allocation49_spill] sm:$0xff] }
 0x75c   :  { %2307 = vmatpush1.msra.mxu0 %v9579_v38  ;;  %2298 = vmatpush2.msra.mxu1 %v9580_v30  ;;  %v9590_v38 = vld [vmem:[#allocation51_spill] sm:$0xff]  ;;  %v9591_v30 = vld [vmem:[#allocation53_spill] sm:$0xff] }
 0x75d   :  { %2308 = vmatprep.subr.mxu0 %v9581_v28  ;;  %2377 = vmatprep.subr.mxu1 %v9582_v34  ;;  %v9592_v28 = vld [vmem:[#allocation55_spill] sm:$0xff]  ;;  %v9593_v34 = vld [vmem:[#allocation57_spill] sm:$0xff] }
 0x75e   :  { %2309 = vmatpush1.msra.mxu0 %v9583_v43  ;;  %v9594_v43 = vld [vmem:[#allocation59_spill] sm:$0xff] }
 0x75f   :  { %2310 = vmatprep.subr.mxu0 %v9584_v27  ;;  %v9595_v27 = vld [vmem:[#allocation61_spill] sm:$0xff] }
 0x760   :  { %2311 = vmatpush1.msra.mxu0 %v9585_v1  ;;  %v9596_v1 = vld [vmem:[#allocation63_spill] sm:$0xff] }
 0x761   :  { %2312 = vmatprep.subr.mxu0 %v9586_v11  ;;  %v9597_v11 = vld [vmem:[#allocation66_spill] sm:$0xff] }
 0x762   :  { %2313 = vmatpush1.msra.mxu0 %v9587_v2  ;;  %v9598_v2 = vld [vmem:[#allocation68_spill] sm:$0xff] }
 0x763   :  { %2314 = vmatprep.subr.mxu0 %v9588_v45  ;;  %v9599_v45 = vld [vmem:[#allocation70_spill] sm:$0xff] }
 0x764   :  { %2315 = vmatpush1.msra.mxu0 %v9589_v32  ;;  %v9600_v32 = vld [vmem:[#allocation72_spill] sm:$0xff] }
 0x765   :  { %2316 = vmatprep.subr.mxu0 %v9590_v38  ;;  %v9601_v38 = vld [vmem:[#allocation74_spill] sm:$0xff] }
 0x766   :  { %2317 = vmatpush1.msra.mxu0 %v9591_v30  ;;  %v9602_v30 = vld [vmem:[#allocation76_spill] sm:$0xff] }
 0x767   :  { %2318 = vmatprep.subr.mxu0 %v9592_v28  ;;  %v9603_v28 = vld [vmem:[#allocation78_spill] sm:$0xff] }
 0x768   :  { %2319 = vmatpush1.msra.mxu0 %v9593_v34  ;;  %v9604_v34 = vld [vmem:[#allocation80_spill] sm:$0xff] }
 0x769   :  { %2320 = vmatprep.subr.mxu0 %v9594_v43  ;;  %v9605_v43 = vld [vmem:[#allocation82_spill] sm:$0xff] }
 0x76a   :  { %2321 = vmatpush1.msra.mxu0 %v9595_v27  ;;  %v9606_v27 = vld [vmem:[#allocation65_spill] sm:$0xff] }
 0x76b   :  { %2322 = vmatprep.subr.mxu0 %v9596_v1  ;;  %v9607_v1 = vld [vmem:[#allocation67_spill] sm:$0xff] }
 0x76c   :  { %2323 = vmatpush1.msra.mxu0 %v9597_v11  ;;  %v9608_v11 = vld [vmem:[#allocation69_spill] sm:$0xff] }
 0x76d   :  { %2324 = vmatprep.subr.mxu0 %v9598_v2  ;;  %v9609_v2 = vld [vmem:[#allocation71_spill] sm:$0xff] }
 0x76e   :  { %2325 = vmatpush1.msra.mxu0 %v9599_v45  ;;  %v9610_v45 = vld [vmem:[#allocation73_spill] sm:$0xff] }
 0x76f   :  { %2326 = vmatprep.subr.mxu0 %v9600_v32  ;;  %v9611_v32 = vld [vmem:[#allocation75_spill] sm:$0xff] }
 0x770   :  { %2327 = vmatpush1.msra.mxu0 %v9601_v38  ;;  %v9612_v38 = vld [vmem:[#allocation77_spill] sm:$0xff] }
 0x771   :  { %2328 = vmatprep.subr.mxu0 %v9602_v30  ;;  %v9613_v30 = vld [vmem:[#allocation79_spill] sm:$0xff] }
 0x772   :  { %2329 = vmatpush1.msra.mxu0 %v9603_v28  ;;  %v9614_v28 = vld [vmem:[#allocation81_spill] sm:$0xff] }
 0x773   :  { %2330 = vmatprep.subr.mxu0 %v9604_v34  ;;  %v9615_v34 = vld [vmem:[#allocation83_spill] sm:$0xff] }
 0x774   :  { %2331 = vmatpush1.msra.mxu0 %v9605_v43  ;;  %v9616_v43 = vld [vmem:[#allocation85_spill] sm:$0xff] }
 0x775   :  { %2332 = vmatprep.subr.mxu0 %v9606_v27  ;;  %v9617_v27 = vld [vmem:[#allocation87_spill] sm:$0xff] }
 0x776   :  { %2333 = vmatpush1.msra.mxu0 %v9607_v1  ;;  %v9618_v1 = vld [vmem:[#allocation89_spill] sm:$0xff] }
 0x777   :  { %2334 = vmatprep.subr.mxu0 %v9608_v11  ;;  %v9619_v11 = vld [vmem:[#allocation91_spill] sm:$0xff] }
 0x778   :  { %2335 = vmatpush1.msra.mxu0 %v9609_v2  ;;  %v9620_v2 = vld [vmem:[#allocation93_spill] sm:$0xff] }
 0x779   :  { %2336 = vmatprep.subr.mxu0 %v9610_v45  ;;  %v9621_v45 = vld [vmem:[#allocation95_spill] sm:$0xff] }
 0x77a   :  { %2337 = vmatpush1.msra.mxu0 %v9611_v32  ;;  %v9622_v32 = vld [vmem:[#allocation96_spill] sm:$0xff] }
 0x77b   :  { %2338 = vmatprep.subr.mxu0 %v9612_v38  ;;  %v9623_v38 = vld [vmem:[#allocation97_spill] sm:$0xff] }
 0x77c   :  { %2339 = vmatpush2.msra.mxu0 %v9613_v30  ;;  %v9624_v30 = vld [vmem:[#allocation50_spill] sm:$0xff] }
 0x77d   :  { %2340 = vmatprep.subr.mxu0 %v9614_v28  ;;  %v9625_v28 = vld [vmem:[#allocation98_spill] sm:$0xff] }
 0x77e   :  { %2341 = vmatpush2.msra.mxu0 %v9615_v34  ;;  %v9626_v34 = vld [vmem:[#allocation52_spill] sm:$0xff] }
 0x77f   :  { %2342 = vmatprep.subr.mxu0 %v9616_v43  ;;  %v9627_v43 = vld [vmem:[#allocation99_spill] sm:$0xff] }
 0x780   :  { %2343 = vmatpush2.msra.mxu0 %v9617_v27  ;;  %v9628_v27 = vld [vmem:[#allocation54_spill] sm:$0xff] }
 0x781   :  { %2344 = vmatprep.subr.mxu0 %v9618_v1  ;;  %v9629_v1 = vld [vmem:[#allocation100_spill] sm:$0xff] }
 0x782   :  { %2345 = vmatpush2.msra.mxu0 %v9619_v11  ;;  %v9630_v11 = vld [vmem:[#allocation56_spill] sm:$0xff] }
 0x783   :  { %2346 = vmatprep.subr.mxu0 %v9620_v2  ;;  %v9631_v2 = vld [vmem:[#allocation101_spill] sm:$0xff] }
 0x784   :  { %2347 = vmatpush2.msra.mxu0 %v9621_v45  ;;  %v9632_v45 = vld [vmem:[#allocation58_spill] sm:$0xff] }
 0x785   :  { %2348 = vmatprep.subr.mxu0 %v9622_v32  ;;  %v9633_v32 = vld [vmem:[#allocation102_spill] sm:$0xff] }
 0x786   :  { %2349 = vmatpush2.msra.mxu0 %v9623_v38  ;;  %v9634_v38 = vld [vmem:[#allocation60_spill] sm:$0xff] }
 0x787   :  { %2350 = vmatprep.subr.mxu0 %v9624_v30  ;;  %v9635_v30 = vld [vmem:[#allocation62_spill] sm:$0xff] }
 0x788   :  { %2351 = vmatpush2.msra.mxu0 %v9625_v28  ;;  %v9636_v28 = vld [vmem:[#allocation64_spill] sm:$0xff] }
 0x789   :  { %2352 = vmatprep.subr.mxu0 %v9626_v34  ;;  %v9637_v34 = vld [vmem:[#allocation103_spill] sm:$0xff] }
 0x78a   :  { %2353 = vmatpush2.msra.mxu0 %v9627_v43  ;;  %v9638_v43 = vld [vmem:[#allocation153_spill] sm:$0xff] }
 0x78b   :  { %2354 = vmatprep.subr.mxu0 %v9628_v27  ;;  %v9639_v27 = vld [vmem:[#allocation154_spill] sm:$0xff] }
 0x78c   :  { %2355 = vmatpush2.msra.mxu0 %v9629_v1  ;;  %v9640_v1 = vld [vmem:[#allocation155_spill] sm:$0xff] }
 0x78d   :  { %2356 = vmatprep.subr.mxu0 %v9630_v11  ;;  %v9641_v11 = vld [vmem:[#allocation156_spill] sm:$0xff] }
 0x78e   :  { %2357 = vmatpush2.msra.mxu0 %v9631_v2  ;;  %v9642_v2 = vld [vmem:[#allocation157_spill] sm:$0xff] }
 0x78f   :  { %2358 = vmatprep.subr.mxu0 %v9632_v45  ;;  %v9643_v45 = vld [vmem:[#allocation158_spill] sm:$0xff] }
 0x790   :  { %2359 = vmatpush2.msra.mxu0 %v9633_v32 }
 0x791   :  { %2360 = vmatprep.subr.mxu0 %v9634_v38 }
 0x792   :  { %2361 = vmatpush2.msra.mxu0 %v9635_v30 }
 0x793   :  { %2362 = vmatprep.subr.mxu0 %v9636_v28 }
 0x794   :  { %2363 = vmatpush2.msra.mxu0 %v9637_v34 }
 0x795   :  { %2364 = vmatprep.subr.mxu0 %v9638_v43 }
 0x796   :  { %2365 = vmatpush2.msra.mxu0 %v9639_v27  ;;  %v2662_v27 = vld [vmem:[%s7974_s0 + $0x48] sm:$0xff] }
 0x797   :  { %2366 = vmatprep.subr.mxu0 %v9640_v1 }
 0x798   :  { %2367 = vmatpush2.msra.mxu0 %v9641_v11 }
 0x799   :  { %2368 = vmatprep.subr.mxu0 %v9642_v2 }
 0x79a   :  { %2369 = vmatpush2.msra.mxu0 %v9643_v45 }
 0x7db   :  { %v2017_v32 = vpop.f32.mrf.mxu0  ;;  %v2088_v34 = vpop.f32.mrf.mxu1 }
 0x7dc   :  { %v2018_v28 = vadd.f32 %v2017_v32, %v9645_v54  ;;  %v2089_v45 = vadd.f32 %v2088_v34, %v4536_v20 }
 0x7dd   :  { %v2019_v38 = vpop.f32.mrf.mxu0  ;;  %v2090_v1 = vpop.f32.mrf.mxu1 }
 0x7de   :  { %v2020_v30 = vadd.f32 %v2019_v38, %v9644_v52  ;;  %v2091_v2 = vadd.f32 %v2090_v1, %v4538_v47  ;;  %v2183_v38 = vrot.slane %v2662_v27, 4 }
 0x7e0   :  { %v2166_v22 = vcombine.low %v2018_v28, %v2020_v30  ;;  %v2187_v57 = vcombine.low %v2089_v45, %v2091_v2 }
 0x7e2   :  { %v2173_v43 = vrot.slane %v2166_v22, %v4530_v61  ;;  %v2194_v32 = vrot.slane %v2187_v57, %v4530_v61  ;;  %v2663_v57 = vld [vmem:[%s7974_s0 + $0x50] sm:$0xf] }
 0x7e4   :  { %v2175_v11 = vadd.f32 %v2662_v27, %v2173_v43  ;;  %v2196_v30 = vadd.f32 %v2194_v32, %v2183_v38 }
 0x7e6   :  { %v2664_v35 = vmul.f32 -1.442695, %v2175_v11  ;;  %v2665_v28 = vmul.f32 -1.442695, %v2196_v30 }
 0x7e8   :  { %2769 = vpow2.f32 %v2664_v35 }
 0x7e9   :  { %2771 = vpow2.f32 %v2665_v28 }
 0x7f5   :  { %v2770_v54 = vpop.eup %2769 }
 0x7f6   :  { %v2179_v22 = vadd.f32 1.0, %v2770_v54  ;;  %v2772_v50 = vpop.eup %2771 }
 0x7f7   :  { %v2200_v34 = vadd.f32 1.0, %v2772_v50 }
 0x7f8   :  { %2773 = vrcp.f32 %v2179_v22  ;;  %v2527_v22 = vld [vmem:[%s7977_s3 + $0xb0] sm:$0xff] }
 0x7f9   :  { %2775 = vrcp.f32 %v2200_v34  ;;  %v2510_v34 = vld [vmem:[%s7977_s3 + $0x28] sm:$0xff] }
 0x805   :  { %v2774_v27 = vpop.eup %2773 }
 0x806   :  { %v2776_v45 = vpop.eup %2775 }
 0x807   :  { %v2217_v38 = vsub.f32 1.0, %v2776_v45 }
 0x81b   :  { %v2159_v52 = vpop.f32.mrf.mxu0 }
 0x81c   :  { %v2160_v43 = vadd.f32 %v2159_v52, %v4543_v53  ;;  %v2219_v52 = vmul.f32 %v2776_v45, %v7563_v31  ;;  %v2534_v31 = vld [vmem:[%s7977_s3 + $0xe8] sm:$0xff] }
 0x81d   :  { %v2161_v63 = vpop.f32.mrf.mxu0  ;;  %v2522_v45 = vld [vmem:[%s7977_s3 + $0x88] sm:$0xff] }
 0x81e   :  { %v2162_v1 = vadd.f32 %v2161_v63, %v4545_v51 }
 0x820   :  { %v2205_v11 = vcombine.low %v2160_v43, %v2162_v1  ;;  %v2511_v43 = vld [vmem:[%s7977_s3 + $0x30] sm:$0xff]  ;;  %v2526_v1 = vld [vmem:[%s7977_s3 + $0xa8] sm:$0xff] }
 0x822   :  { %v2212_v35 = vrot.slane %v2205_v11, %v4530_v61  ;;  %v2525_v11 = vld [vmem:[%s7977_s3 + $0xa0] sm:$0xff] }
 0x824   :  { %v2214_v2 = vmul.f32 %v2774_v27, %v2212_v35  ;;  %v2509_v35 = vld [vmem:[%s7977_s3 + $0x20] sm:$0xff]  ;;  %v2524_v27 = vld [vmem:[%s7977_s3 + $0x98] sm:$0xff] }
 0x826   :  { %v2215_v54 = vadd.f32 %v2663_v57, %v2214_v2  ;;  %v2508_v57 = vld [vmem:[%s7977_s3 + $0x18] sm:$0xff]  ;;  %v2523_v2 = vld [vmem:[%s7977_s3 + $0x90] sm:$0xff] }
 0x828   :  { %2777 = vtanh.f32 %v2215_v54  ;;  %v2507_v54 = vld [vmem:[%s7977_s3 + $0x10] sm:$0xff] }
 0x835   :  { %v2778_v32 = vpop.eup %2777 }
 0x836   :  { %v2218_v30 = vmul.f32 %v2778_v32, %v2217_v38  ;;  %v2506_v38 = vld [vmem:[%s7977_s3 + $0x8] sm:$0xff]  ;;  %v2521_v32 = vld [vmem:[%s7977_s3 + $0x80] sm:$0xff] }
 0x838   :  { %v7781_v63 = vadd.f32 %v2219_v52, %v2218_v30  ;;  %v2505_v30 = vld [vmem:[%s7977_s3] sm:$0xff] }
 0x83a   :  { %v7785_v50 = vrot.slane %v7781_v63, %v4530_v61 }
 0x83c   :  { %v2232_v28 = vcombine.high %v7785_v50, %v7785_v50 }
 0x83e   :  { %2299 = vmatprep.mubr.f32.mxu1 %v2232_v28  ;;  %2370 = vmatprep.mubr.f32.mxu0 %v2232_v28 }
 0x83f   :  { %2300 = vmatmul.mubr.f32.vlgmr.msra.gmra.mxu1 %v7785_v50  ;;  %2371 = vmatmul.mubr.f32.vlgmr.msra.gmra.mxu0 %v7785_v50 }
 0x840   :  { %2378 = vmatpush1.msra.mxu1 %v6967_v13  ;;  %2441 = vmatprep.mubr.f32.mxu1 %v2232_v28  ;;  %v9656_v13 = vld [vmem:[#allocation131_spill] sm:$0xff]  ;;  %v9669_v28 = vld [vmem:[#allocation36_spill] sm:$0xff] }
 0x841   :  { %2379 = vmatprep.subr.mxu1 %v6973_v9  ;;  %v9657_v9 = vld [vmem:[#allocation132_spill] sm:$0xff] }
 0x842   :  { %2380 = vmatpush1.msra.mxu1 %v6980_v19  ;;  %v9658_v19 = vld [vmem:[#allocation133_spill] sm:$0xff] }
 0x843   :  { %2381 = vmatprep.subr.mxu1 %v6987_v24  ;;  %v9659_v24 = vld [vmem:[#allocation134_spill] sm:$0xff] }
 0x844   :  { %2382 = vmatpush1.msra.mxu1 %v6994_v7  ;;  %v9660_v7 = vld [vmem:[#allocation135_spill] sm:$0xff] }
 0x845   :  { %2383 = vmatprep.subr.mxu1 %v7001_v8  ;;  %v9661_v8 = vld [vmem:[#allocation136_spill] sm:$0xff] }
 0x846   :  { %2384 = vmatpush1.msra.mxu1 %v7008_v6  ;;  %v9662_v6 = vld [vmem:[#allocation137_spill] sm:$0xff] }
 0x847   :  { %2385 = vmatprep.subr.mxu1 %v7015_v62  ;;  %v9663_v62 = vld [vmem:[#allocation139_spill] sm:$0xff] }
 0x848   :  { %2386 = vmatpush1.msra.mxu1 %v7022_v5  ;;  %v9664_v5 = vld [vmem:[#allocation141_spill] sm:$0xff] }
 0x849   :  { %2387 = vmatprep.subr.mxu1 %v7029_v29  ;;  %v9665_v29 = vld [vmem:[#allocation143_spill] sm:$0xff] }
 0x84a   :  { %2388 = vmatpush1.msra.mxu1 %v7036_v16  ;;  %v9666_v16 = vld [vmem:[#allocation145_spill] sm:$0xff] }
 0x84b   :  { %2389 = vmatprep.subr.mxu1 %v7043_v12  ;;  %v9667_v12 = vld [vmem:[#allocation147_spill] sm:$0xff] }
 0x84c   :  { %2390 = vmatpush1.msra.mxu1 %v7050_v26  ;;  %v9668_v26 = vld [vmem:[#allocation149_spill] sm:$0xff] }
 0x84d   :  { %2391 = vmatprep.subr.mxu1 %v7057_v3  ;;  %v2536_v3 = vld [vmem:[%s7977_s3 + $0xf8] sm:$0xff] }
 0x84e   :  { %2392 = vmatpush1.msra.mxu1 %v7064_v18  ;;  %2671 = vmatprep.subr.mxu0 %v2536_v3  ;;  %v2520_v18 = vld [vmem:[%s7977_s3 + $0x78] sm:$0xff] }
 0x84f   :  { %2393 = vmatprep.subr.mxu1 %v7071_v15  ;;  %2672 = vmatpush3.msra.mxu0 %v2520_v18  ;;  %v2535_v15 = vld [vmem:[%s7977_s3 + $0xf0] sm:$0xff] }
 0x850   :  { %2394 = vmatpush1.msra.mxu1 %v7078_v55  ;;  %2673 = vmatprep.subr.mxu0 %v2535_v15  ;;  %v2519_v55 = vld [vmem:[%s7977_s3 + $0x70] sm:$0xff] }
 0x851   :  { %2395 = vmatprep.subr.mxu1 %v7085_v46  ;;  %v9646_v46 = vld [vmem:[#allocation121_spill] sm:$0xff]  ;;  %2674 = vmatpush3.msra.mxu0 %v2519_v55  ;;  %v2667_v55 = vld [vmem:[%s7974_s0 + $0x5c] sm:$0xf] }
 0x852   :  { %2396 = vmatpush1.msra.mxu1 %v7092_v44  ;;  %v9647_v44 = vld [vmem:[#allocation122_spill] sm:$0xff]  ;;  %2675 = vmatprep.subr.mxu0 %v2534_v31 }
 0x853   :  { %2397 = vmatprep.subr.mxu1 %v7099_v60  ;;  %v9648_v60 = vld [vmem:[#allocation123_spill] sm:$0xff] }
 0x854   :  { %2398 = vmatpush1.msra.mxu1 %v7106_v42  ;;  %v9649_v42 = vld [vmem:[#allocation124_spill] sm:$0xff] }
 0x855   :  { %2399 = vmatprep.subr.mxu1 %v7113_v36  ;;  %v9650_v36 = vld [vmem:[#allocation125_spill] sm:$0xff] }
 0x856   :  { %2400 = vmatpush1.msra.mxu1 %v7120_v25  ;;  %v9651_v25 = vld [vmem:[#allocation126_spill] sm:$0xff] }
 0x857   :  { %2401 = vmatprep.subr.mxu1 %v7127_v33  ;;  %v9652_v33 = vld [vmem:[#allocation127_spill] sm:$0xff] }
 0x858   :  { %2402 = vmatpush1.msra.mxu1 %v7134_v56  ;;  %v9653_v56 = vld [vmem:[#allocation128_spill] sm:$0xff] }
 0x859   :  { %2403 = vmatprep.subr.mxu1 %v7141_v41  ;;  %v9654_v41 = vld [vmem:[#allocation129_spill] sm:$0xff] }
 0x85a   :  { %2404 = vmatpush1.msra.mxu1 %v7148_v4  ;;  %v9655_v4 = vld [vmem:[#allocation130_spill] sm:$0xff] }
 0x85b   :  { %2405 = vmatprep.subr.mxu1 %v9506_v23  ;;  %v2518_v23 = vld [vmem:[%s7977_s3 + $0x68] sm:$0xff] }
 0x85c   :  { %2406 = vmatpush1.msra.mxu1 %v9508_v0  ;;  %2676 = vmatpush3.msra.mxu0 %v2518_v23  ;;  %v2533_v0 = vld [vmem:[%s7977_s3 + $0xe0] sm:$0xff] }
 0x85d   :  { %2407 = vmatprep.subr.mxu1 %v9510_v59  ;;  %2677 = vmatprep.subr.mxu0 %v2533_v0  ;;  %v2517_v59 = vld [vmem:[%s7977_s3 + $0x60] sm:$0xff] }
 0x85e   :  { %2408 = vmatpush1.msra.mxu1 %v9512_v37  ;;  %2678 = vmatpush3.msra.mxu0 %v2517_v59  ;;  %v2532_v37 = vld [vmem:[%s7977_s3 + $0xd8] sm:$0xff] }
 0x85f   :  { %2409 = vmatprep.subr.mxu1 %v9514_v39  ;;  %2679 = vmatprep.subr.mxu0 %v2532_v37  ;;  %v2516_v39 = vld [vmem:[%s7977_s3 + $0x58] sm:$0xff] }
 0x860   :  { %2410 = vmatpush2.msra.mxu1 %v9516_v10  ;;  %2680 = vmatpush3.msra.mxu0 %v2516_v39  ;;  %v2531_v10 = vld [vmem:[%s7977_s3 + $0xd0] sm:$0xff] }
 0x861   :  { %2411 = vmatprep.subr.mxu1 %v9518_v21  ;;  %v2515_v21 = vld [vmem:[%s7977_s3 + $0x50] sm:$0xff]  ;;  %2681 = vmatprep.subr.mxu0 %v2531_v10 }
 0x862   :  { %2412 = vmatpush2.msra.mxu1 %v9520_v17  ;;  %v2530_v17 = vld [vmem:[%s7977_s3 + $0xc8] sm:$0xff]  ;;  %2682 = vmatpush3.msra.mxu0 %v2515_v21 }
 0x863   :  { %2413 = vmatprep.subr.mxu1 %v9522_v58  ;;  %v2514_v58 = vld [vmem:[%s7977_s3 + $0x48] sm:$0xff]  ;;  %2683 = vmatprep.subr.mxu0 %v2530_v17 }
 0x864   :  { %2414 = vmatpush2.msra.mxu1 %v9524_v14  ;;  %v2529_v14 = vld [vmem:[%s7977_s3 + $0xc0] sm:$0xff]  ;;  %2684 = vmatpush3.msra.mxu0 %v2514_v58 }
 0x865   :  { %2415 = vmatprep.subr.mxu1 %v9526_v49  ;;  %v2513_v49 = vld [vmem:[%s7977_s3 + $0x40] sm:$0xff]  ;;  %2685 = vmatprep.subr.mxu0 %v2529_v14 }
 0x866   :  { %2416 = vmatpush2.msra.mxu1 %v9528_v40  ;;  %v2528_v40 = vld [vmem:[%s7977_s3 + $0xb8] sm:$0xff]  ;;  %2686 = vmatpush3.msra.mxu0 %v2513_v49  ;;  %v2670_v14 = vld [vmem:[%s7978_s4] ss:$0 sm:$0xff] }
 0x867   :  { %2417 = vmatprep.subr.mxu1 %v9530_v48  ;;  %v2512_v48 = vld [vmem:[%s7977_s3 + $0x38] sm:$0xff]  ;;  %2687 = vmatprep.subr.mxu0 %v2528_v40 }
 0x868   :  { %2418 = vmatpush2.msra.mxu1 %v9646_v46  ;;  %2688 = vmatpush3.msra.mxu0 %v2512_v48 }
 0x869   :  { %2419 = vmatprep.subr.mxu1 %v9647_v44  ;;  %2689 = vmatprep.subr.mxu0 %v2527_v22  ;;  %v9670_v44 = vld [vmem:[#allocation5_spill] sm:$0xff] }
 0x86a   :  { %2420 = vmatpush2.msra.mxu1 %v9648_v60  ;;  %2690 = vmatpush3.msra.mxu0 %v2511_v43 }
 0x86b   :  { %2421 = vmatprep.subr.mxu1 %v9649_v42  ;;  %2691 = vmatprep.subr.mxu0 %v2526_v1 }
 0x86c   :  { %2422 = vmatpush2.msra.mxu1 %v9650_v36  ;;  %2692 = vmatpush3.msra.mxu0 %v2510_v34 }
 0x86d   :  { %2423 = vmatprep.subr.mxu1 %v9651_v25  ;;  %2693 = vmatprep.subr.mxu0 %v2525_v11 }
 0x86e   :  { %2424 = vmatpush2.msra.mxu1 %v9652_v33  ;;  %2694 = vmatpush3.msra.mxu0 %v2509_v35  ;;  %v2666_v33 = vld [vmem:[%s7974_s0 + $0x54] sm:$0xff] }
 0x86f   :  { %2425 = vmatprep.subr.mxu1 %v9653_v56  ;;  %2695 = vmatprep.subr.mxu0 %v2524_v27 }
 0x870   :  { %2426 = vmatpush2.msra.mxu1 %v9654_v41  ;;  %2696 = vmatpush3.msra.mxu0 %v2508_v57 }
 0x871   :  { %2427 = vmatprep.subr.mxu1 %v9655_v4  ;;  %2697 = vmatprep.subr.mxu0 %v2523_v2 }
 0x872   :  { %2428 = vmatpush2.msra.mxu1 %v9656_v13  ;;  %2698 = vmatpush3.msra.mxu0 %v2507_v54 }
 0x873   :  { %2429 = vmatprep.subr.mxu1 %v9657_v9  ;;  %2699 = vmatprep.subr.mxu0 %v2522_v45 }
 0x874   :  { %2430 = vmatpush2.msra.mxu1 %v9658_v19  ;;  %2700 = vmatpush3.msra.mxu0 %v2506_v38 }
 0x875   :  { %2431 = vmatprep.subr.mxu1 %v9659_v24  ;;  %2701 = vmatprep.subr.mxu0 %v2521_v32  ;;  %v2467_v24 = vrot.slane %v2666_v33, 4 }
 0x876   :  { %2432 = vmatpush2.msra.mxu1 %v9660_v7  ;;  %2702 = vmatpush3.msra.mxu0 %v2505_v30 }
 0x877   :  { %2433 = vmatprep.subr.mxu1 %v9661_v8 }
 0x878   :  { %2434 = vmatpush2.msra.mxu1 %v9662_v6 }
 0x879   :  { %2435 = vmatprep.subr.mxu1 %v9663_v62 }
 0x87a   :  { %2436 = vmatpush2.msra.mxu1 %v9664_v5 }
 0x87b   :  { %2437 = vmatprep.subr.mxu1 %v9665_v29 }
 0x87c   :  { %2438 = vmatpush2.msra.mxu1 %v9666_v16 }
 0x87d   :  { %2439 = vmatprep.subr.mxu1 %v9667_v12 }
 0x87e   :  { %2440 = vmatpush2.msra.mxu1 %v9668_v26 }
 0x87f   :  { %2442 = vmatmul.mubr.f32.vlgmr.msra.gmra.mxu1 %v7785_v50 }
 0x8ff   :  { %v2301_v52 = vpop.f32.mrf.mxu1  ;;  %v2372_v36 = vpop.f32.mrf.mxu0 }
 0x900   :  { %v2302_v60 = vadd.f32 %v2301_v52, %v9670_v44  ;;  %v2373_v13 = vadd.f32 %v2372_v36, %v4536_v20 }
 0x901   :  { %v2303_v50 = vpop.f32.mrf.mxu1  ;;  %v2374_v56 = vpop.f32.mrf.mxu0 }
 0x902   :  { %v2304_v46 = vadd.f32 %v2303_v50, %v9669_v28  ;;  %v2375_v4 = vadd.f32 %v2374_v56, %v4538_v47 }
 0x904   :  { %v2450_v42 = vcombine.low %v2302_v60, %v2304_v46  ;;  %v2471_v19 = vcombine.low %v2373_v13, %v2375_v4 }
 0x906   :  { %v2457_v25 = vrot.slane %v2450_v42, %v4530_v61  ;;  %v2478_v7 = vrot.slane %v2471_v19, %v4530_v61 }
 0x908   :  { %v2459_v41 = vadd.f32 %v2666_v33, %v2457_v25  ;;  %v2480_v8 = vadd.f32 %v2478_v7, %v2467_v24 }
 0x90a   :  { %v2668_v9 = vmul.f32 -1.442695, %v2459_v41  ;;  %v2669_v6 = vmul.f32 -1.442695, %v2480_v8 }
 0x90c   :  { %2779 = vpow2.f32 %v2668_v9 }
 0x90d   :  { %2781 = vpow2.f32 %v2669_v6 }
 0x919   :  { %v2780_v62 = vpop.eup %2779 }
 0x91a   :  { %v2463_v5 = vadd.f32 1.0, %v2780_v62  ;;  %v2782_v16 = vpop.eup %2781 }
 0x91b   :  { %v2484_v20 = vadd.f32 1.0, %v2782_v16 }
 0x91c   :  { %2783 = vrcp.f32 %v2463_v5 }
 0x91d   :  { %2785 = vrcp.f32 %v2484_v20 }
 0x929   :  { %v2784_v15 = vpop.eup %2783 }
 0x92a   :  { %v2786_v0 = vpop.eup %2785 }
 0x92b   :  { %v2501_v59 = vsub.f32 1.0, %v2786_v0 }
 0x93f   :  { %v2443_v29 = vpop.f32.mrf.mxu1 }
 0x940   :  { %v2444_v26 = vadd.f32 %v2443_v29, %v4543_v53  ;;  %v2503_v53 = vmul.f32 %v2786_v0, %v7781_v63 }
 0x941   :  { %v2445_v12 = vpop.f32.mrf.mxu1 }
 0x942   :  { %v2446_v47 = vadd.f32 %v2445_v12, %v4545_v51 }
 0x944   :  { %v2489_v3 = vcombine.low %v2444_v26, %v2446_v47 }
 0x946   :  { %v2496_v18 = vrot.slane %v2489_v3, %v4530_v61 }
 0x948   :  { %v2498_v31 = vmul.f32 %v2784_v15, %v2496_v18 }
 0x94a   :  { %v2499_v23 = vadd.f32 %v2667_v55, %v2498_v31 }
 0x94c   :  { %2787 = vtanh.f32 %v2499_v23 }
 0x959   :  { %v2788_v37 = vpop.eup %2787 }
 0x95a   :  { %v2502_v39 = vmul.f32 %v2788_v37, %v2501_v59 }
 0x95c   :  { %v2504_v51 = vadd.f32 %v2503_v53, %v2502_v39 }
 0x95e   :  { %v2551_v10 = vrot.slane %v2504_v51, %v4530_v61 }
 0x960   :  { %v2552_v21 = vcombine.high %v2551_v10, %v2551_v10 }
 0x962   :  { %2619 = vmatprep.mubr.f32.mxu0 %v2552_v21 }
 0x963   :  { %2620 = vmatmul.mubr.f32.vlgmr.msra.gmra.mxu0 %v2551_v10 }
 0xa23   :  { %v2703_v17 = vpop.f32.mrf.mxu0 }
 0xa25   :  { %v2704_v58 = vpop.f32.mrf.mxu0 }
 0xa26   :  { %v2705_v49 = vadd.f32 %v2704_v58, %v2703_v17 }
 0xa28   :  { %v2622_v40 = vadd.f32 %v2705_v49, %v2670_v14 }
 0xa2a   :  { %2625 = vst [vmem:[#allocation2] sm:$0x3] %v2622_v40 }
 0xa2b   :  { %3184 = shalt.err (!%p3181_p4)
}
 0xa2c   :  { %2635 = dma.vmem_to_hbm [thread:$0]  %s2633_s7, 32, %s7979_s5, [#allocation3]  }
 0xa2d   :  { %3193 = dma.done.wait [#allocation3], 32  }
 0xa2e   :  { %3194 = vsyncadd [#allocation3], 4294967264 }
 0xa2f   :  { %2639 = vsyncpa [#allocation3], 1 }

</bundles_post_ra>
